<compile_context>
chip_gen: v7x
topology: tpu7x:2x2x1
jax: 0.10.0
libtpu: 0.0.40
codegen_flags: <defaults>
</compile_context>

<pallas_src>
import functools

import jax
import jax.numpy as jnp
from jax.experimental import pallas as pl
from jax.experimental.pallas import tpu as pltpu

# ---- module hyper-parameters (PyTorch defaults) ----
DIMPROJ = 64
DIMLINEAR = 128
LORDER = 20
RORDER = 1
LSTRIDE = 1
RSTRIDE = 1

LPAD = (LORDER - 1) * LSTRIDE           # causal (left) halo rows of p1
RPAD = RORDER * RSTRIDE                 # lookahead (right) halo rows of p1
HEAD = ((LPAD + 7) // 8) * 8            # sublane-aligned head of the scratch
HALO = max(8, ((RPAD + 7) // 8) * 8)    # sublane-aligned lookahead halo rows


def _dfsmn_kernel(x_ref, xh_ref, we_ref, be_ref, ws_ref, wl_ref, wr_ref,
                  o_ref, pe_ref, *, t_tile, fir_chunk):
    """One (batch, time-tile) grid step.

    pe_ref layout (extended p1 buffer, f32):
      rows [0, HEAD)                     : carry (last rows of prev tile's p1)
      rows [HEAD, HEAD + t_tile)         : current tile's p1
      rows [HEAD + t_tile, ... + HALO)   : first RPAD rows of next tile's p1
    """
    t = pl.program_id(1)
    nt = pl.num_programs(1)
    f32 = jnp.float32

    # ---- causal-halo carry across time tiles (VMEM scratch persists) ----
    @pl.when(t == 0)
    def _init_carry():
        pe_ref[0:HEAD, :] = jnp.zeros((HEAD, DIMPROJ), f32)

    @pl.when(t > 0)
    def _carry():
        # Previous tile's p1 lived at rows [HEAD, HEAD + t_tile); shifting by
        # t_tile brings its last HEAD (>= LPAD) rows into the head region.
        pe_ref[0:HEAD, :] = pe_ref[pl.ds(t_tile, HEAD), :]

    # ---- expand -> relu -> shrink on the full time tile (big-M matmuls) ----
    x = x_ref[0]                                                 # (t_tile, D)
    f1 = jnp.dot(x, we_ref[...], preferred_element_type=f32) + be_ref[...]
    f1 = jnp.maximum(f1, 0.0)                                    # (t_tile, H)
    p1 = jnp.dot(f1, ws_ref[...], preferred_element_type=f32)    # (t_tile, D)
    pe_ref[pl.ds(HEAD, t_tile), :] = p1

    # ---- lookahead halo: recompute first rows of the *next* tile's p1 ----
    @pl.when(t < nt - 1)
    def _halo():
        xh = xh_ref[0]                                           # (HALO, D)
        fh = jnp.dot(xh, we_ref[...], preferred_element_type=f32) + be_ref[...]
        fh = jnp.maximum(fh, 0.0)
        pe_ref[pl.ds(HEAD + t_tile, HALO), :] = jnp.dot(
            fh, ws_ref[...], preferred_element_type=f32)

    @pl.when(t == nt - 1)
    def _halo_zero():
        pe_ref[pl.ds(HEAD + t_tile, HALO), :] = jnp.zeros((HALO, DIMPROJ), f32)

    # ---- depthwise FIR over time + residual (f32), chunked over rows ----
    # Tap weights arrive pre-broadcast to (taps, fir_chunk, D): plain loads,
    # no broadcast_in_dim inside the chunk x tap nest.
    for c in range(t_tile // fir_chunk):
        base = c * fir_chunk
        # residual + centre tap (p1 itself)
        acc = (x_ref[0, pl.ds(base, fir_chunk), :].astype(f32)
               + pe_ref[pl.ds(HEAD + base, fir_chunk), :])
        # causal taps: tap k touches p1[t - LPAD + k*LSTRIDE]
        for k in range(LORDER):
            off = HEAD - LPAD + k * LSTRIDE + base
            acc = acc + pe_ref[pl.ds(off, fir_chunk), :] * wl_ref[k]
        # lookahead taps: tap k touches p1[t + (k+1)*RSTRIDE]
        for k in range(RORDER):
            off = HEAD + (k + 1) * RSTRIDE + base
            acc = acc + pe_ref[pl.ds(off, fir_chunk), :] * wr_ref[k]
        o_ref[0, pl.ds(base, fir_chunk), :] = acc.astype(o_ref.dtype)


def _pick_t_tile(T, requested):
    """Largest multiple-of-8 divisor of T that is <= requested and >= HEAD."""
    if T % 8 != 0 or T < HEAD:
        raise ValueError(
            "sequence length must be a multiple of 8 and >= %d, got %d"
            % (HEAD, T))
    cand = min(requested, T)
    cand -= cand % 8
    while cand >= HEAD:
        if T % cand == 0:
            return cand
        cand -= 8
    return T   # fall back to a single whole-sequence tile


def _pick_fir_chunk(t_tile):
    for c in (64, 56, 48, 40, 32, 24, 16, 8):
        if t_tile % c == 0:
            return c
    return t_tile


@functools.partial(jax.jit, static_argnames=("t_tile",))
def dfsmn_forward(x, w_expand, b_expand, w_shrink, w_left, w_right, *,
                  t_tile=2048):
    B, T, D = x.shape
    H = w_expand.shape[1]
    assert D == DIMPROJ and H == DIMLINEAR
    tt = _pick_t_tile(T, t_tile)
    nt = T // tt
    fir_chunk = _pick_fir_chunk(tt)
    assert tt % 8 == 0 and tt >= HEAD and tt % HALO == 0 and RPAD <= HALO

    f32 = jnp.float32
    we = w_expand.astype(f32)
    be = b_expand.reshape(1, H).astype(f32)
    ws = w_shrink.astype(f32)
    # Pre-broadcast FIR tap weights so the kernel reads plain (fir_chunk, D)
    # slabs instead of re-emitting a broadcast_in_dim per (chunk, tap).
    wl_b = jnp.broadcast_to(w_left.astype(f32)[:, None, :],
                            (LORDER, fir_chunk, D))
    wr_b = jnp.broadcast_to(w_right.astype(f32)[:, None, :],
                            (RORDER, fir_chunk, D))

    blocks_per_tile = tt // HALO
    last_halo_block = T // HALO - 1

    def x_map(b, t):
        return (b, t, 0)

    def xh_map(b, t):
        # First HALO rows of the *next* time tile (clamped on the last tile,
        # where the kernel zeroes the lookahead halo anyway).
        return (b, jnp.minimum((t + 1) * blocks_per_tile, last_halo_block), 0)

    def w2_map(b, t):
        return (0, 0)

    def w3_map(b, t):
        return (0, 0, 0)

    kernel = functools.partial(_dfsmn_kernel, t_tile=tt, fir_chunk=fir_chunk)

    flops = (4 * B * T * D * H                          # expand + shrink
             + 4 * B * nt * HALO * D * H                # lookahead halo redo
             + 2 * B * T * D * (LORDER + RORDER + 1))   # FIR + residual
    bytes_accessed = int(2 * x.size * x.dtype.itemsize          # x in, out
                         + B * nt * HALO * D * x.dtype.itemsize  # halo refetch
                         + (we.size + ws.size + be.size) * 4
                         + (wl_b.size + wr_b.size) * 4)

    return pl.pallas_call(
        kernel,
        out_shape=jax.ShapeDtypeStruct((B, T, D), x.dtype),
        grid_spec=pltpu.PrefetchScalarGridSpec(
            num_scalar_prefetch=0,
            grid=(B, nt),
            in_specs=[
                pl.BlockSpec((1, tt, D), x_map),              # input time tile
                pl.BlockSpec((1, HALO, D), xh_map),           # lookahead x halo
                pl.BlockSpec((D, H), w2_map),                 # expand weight
                pl.BlockSpec((1, H), w2_map),                 # expand bias
                pl.BlockSpec((H, D), w2_map),                 # shrink weight
                pl.BlockSpec((LORDER, fir_chunk, D), w3_map),  # left taps (pre-bcast)
                pl.BlockSpec((RORDER, fir_chunk, D), w3_map),  # right taps (pre-bcast)
            ],
            out_specs=pl.BlockSpec((1, tt, D), x_map),
            scratch_shapes=[
                pltpu.VMEM((HEAD + tt + HALO, D), jnp.float32),
            ]),
        compiler_params=pltpu.CompilerParams(
            dimension_semantics=("parallel", "arbitrary"),
            vmem_limit_bytes=32 * 1024 * 1024),
        cost_estimate=pl.CostEstimate(
            flops=flops, transcendentals=0, bytes_accessed=bytes_accessed),
    )(x, x, we, be, ws, wl_b, wr_b)


def dfsmn_reference(x, w_expand, b_expand, w_shrink, w_left, w_right):
    """Pure-JAX f32 reference mirroring the PyTorch forward."""
    f1 = jax.nn.relu(
        jnp.dot(x, w_expand, preferred_element_type=jnp.float32)
        + b_expand.reshape(1, -1))
    p1 = jnp.dot(f1, w_shrink, preferred_element_type=jnp.float32)
    B, T, D = x.shape
    acc = x + p1
    lpad = (LORDER - 1) * LSTRIDE
    p1_l = jnp.pad(p1, ((0, 0), (lpad, 0), (0, 0)))
    for k in range(LORDER):
        s = k * LSTRIDE
        acc = acc + p1_l[:, s:s + T, :] * w_left[k][None, None, :]
    if RORDER > 0:
        rpad = RORDER * RSTRIDE
        p1_r = jnp.pad(p1, ((0, 0), (0, rpad), (0, 0)))
        for k in range(RORDER):
            s = (k + 1) * RSTRIDE
            acc = acc + p1_r[:, s:s + T, :] * w_right[k][None, None, :]
    return acc


if __name__ == "__main__":
    B, T = 2, 256
    T_TILE = 128          # 2 time tiles -> exercises carry, halo and last-tile paths
    key = jax.random.PRNGKey(0)
    k_x, k_we, k_be, k_ws, k_wl, k_wr = jax.random.split(key, 6)

    # Deterministic synthetic parameters (shapes follow the module __init__;
    # stored transposed relative to PyTorch nn.Linear so the kernel does x @ W).
    x = jax.random.normal(k_x, (B, T, DIMPROJ), dtype=jnp.float32)
    w_expand = 0.1 * jax.random.normal(k_we, (DIMPROJ, DIMLINEAR), dtype=jnp.float32)
    b_expand = 0.1 * jax.random.normal(k_be, (1, DIMLINEAR), dtype=jnp.float32)
    w_shrink = 0.1 * jax.random.normal(k_ws, (DIMLINEAR, DIMPROJ), dtype=jnp.float32)
    # conv_left.weight[d, 0, k, 0]  -> w_left[k, d]
    w_left = 0.1 * jax.random.normal(k_wl, (LORDER, DIMPROJ), dtype=jnp.float32)
    # conv_right.weight[d, 0, k, 0] -> w_right[k, d]
    w_right = 0.1 * jax.random.normal(k_wr, (RORDER, DIMPROJ), dtype=jnp.float32)

    out = dfsmn_forward(x, w_expand, b_expand, w_shrink, w_left, w_right,
                        t_tile=T_TILE)
    jax.block_until_ready(out)

    ref = dfsmn_reference(x, w_expand, b_expand, w_shrink, w_left, w_right)
    assert out.shape == (B, T, DIMPROJ)
    max_err = float(jnp.max(jnp.abs(out - ref)))
    # Differences come only from MXU default-precision rounding (Mosaic vs XLA
    # f32 matmul paths); structural errors would be O(0.1) or larger.
    assert jnp.allclose(out, ref, atol=2e-2, rtol=2e-2), (
        "mismatch vs JAX reference, max abs err = %g" % max_err)

    print("KERNEL_OK")
</pallas_src>

<mosaic_0001>
module attributes {stable_mosaic.version = 11 : i64} {
  func.func @_dfsmn_kernel(%arg0: i32, %arg1: i32, %arg2: memref<1x128x64xf32, #tpu.memory_space<vmem>>, %arg3: memref<1x8x64xf32, #tpu.memory_space<vmem>>, %arg4: memref<64x128xf32, #tpu.memory_space<vmem>>, %arg5: memref<1x128xf32, #tpu.memory_space<vmem>>, %arg6: memref<128x64xf32, #tpu.memory_space<vmem>>, %arg7: memref<20x64x64xf32, #tpu.memory_space<vmem>>, %arg8: memref<1x64x64xf32, #tpu.memory_space<vmem>>, %arg9: memref<1x128x64xf32, #tpu.memory_space<vmem>>, %arg10: memref<160x64xf32, #tpu.memory_space<vmem>>) attributes {dimension_semantics = [#tpu.dimension_semantics<parallel>, #tpu.dimension_semantics<arbitrary>], iteration_bounds = array<i64: 2, 2>, scalar_prefetch = 0 : i64, scratch_operands = 1 : i64, tpu.core_type = #tpu.core_type<tc>, window_params = [{transform_indices = @transform_0, window_bounds = array<i64: 1, 128, 64>}, {transform_indices = @transform_1, window_bounds = array<i64: 1, 8, 64>}, {pipeline_mode = #tpu.pipeline_mode<synchronous>, transform_indices = @transform_2, window_bounds = array<i64: 64, 128>}, {pipeline_mode = #tpu.pipeline_mode<synchronous>, transform_indices = @transform_3, window_bounds = array<i64: 1, 128>}, {pipeline_mode = #tpu.pipeline_mode<synchronous>, transform_indices = @transform_4, window_bounds = array<i64: 128, 64>}, {pipeline_mode = #tpu.pipeline_mode<synchronous>, transform_indices = @transform_5, window_bounds = array<i64: 20, 64, 64>}, {pipeline_mode = #tpu.pipeline_mode<synchronous>, transform_indices = @transform_6, window_bounds = array<i64: 1, 64, 64>}, {transform_indices = @transform_7, window_bounds = array<i64: 1, 128, 64>}]} {
    %c0_i32 = arith.constant 0 : i32
    %0 = arith.cmpi eq, %arg1, %c0_i32 : i32
    %1 = arith.extui %0 : i1 to i32
    %c0_i32_0 = arith.constant 0 : i32
    %2 = arith.cmpi ne, %1, %c0_i32_0 : i32
    scf.if %2 {
      %cst_197 = arith.constant 0.000000e+00 : f32
      %248 = vector.broadcast %cst_197 : f32 to vector<24x64xf32>
      %c0_198 = arith.constant 0 : index
      %c0_199 = arith.constant 0 : index
      %249 = vector.load %arg10[%c0_198, %c0_199] : memref<160x64xf32, #tpu.memory_space<vmem>>, vector<24x64xf32>
      tpu.vector_store %arg10[%c0_198, %c0_199], %248 {strides = array<i32>} : memref<160x64xf32, #tpu.memory_space<vmem>>, vector<24x64xf32>,
    } else {
    }
    %c0_i32_1 = arith.constant 0 : i32
    %3 = arith.cmpi sgt, %arg1, %c0_i32_1 : i32
    %4 = arith.extui %3 : i1 to i32
    %c0_i32_2 = arith.constant 0 : i32
    %5 = arith.cmpi ne, %4, %c0_i32_2 : i32
    scf.if %5 {
      %c128 = arith.constant 128 : index
      %c0_197 = arith.constant 0 : index
      %248 = vector.load %arg10[%c128, %c0_197] : memref<160x64xf32, #tpu.memory_space<vmem>>, vector<24x64xf32>
      %c0_198 = arith.constant 0 : index
      %c0_199 = arith.constant 0 : index
      %249 = vector.load %arg10[%c0_198, %c0_199] : memref<160x64xf32, #tpu.memory_space<vmem>>, vector<24x64xf32>
      tpu.vector_store %arg10[%c0_198, %c0_199], %248 {strides = array<i32>} : memref<160x64xf32, #tpu.memory_space<vmem>>, vector<24x64xf32>,
    } else {
    }
    %c0 = arith.constant 0 : index
    %c0_3 = arith.constant 0 : index
    %c0_4 = arith.constant 0 : index
    %6 = vector.load %arg2[%c0, %c0_3, %c0_4] : memref<1x128x64xf32, #tpu.memory_space<vmem>>, vector<1x128x64xf32>
    %7 = vector.shape_cast %6 : vector<1x128x64xf32> to vector<128x64xf32>
    %c0_5 = arith.constant 0 : index
    %c0_6 = arith.constant 0 : index
    %8 = vector.load %arg4[%c0_5, %c0_6] : memref<64x128xf32, #tpu.memory_space<vmem>>, vector<64x128xf32>
    %cst = arith.constant dense<0.000000e+00> : vector<128x128xf32>
    %9 = tpu.matmul %7, %8, %cst {dimension_numbers = #tpu.dot_dimension_numbers<[1], [0], [0], [1], [0, 0, 1, 1], [], []>} : vector<128x64xf32>, vector<64x128xf32>, vector<128x128xf32> -> vector<128x128xf32>
    %c0_7 = arith.constant 0 : index
    %c0_8 = arith.constant 0 : index
    %10 = vector.load %arg5[%c0_7, %c0_8] : memref<1x128xf32, #tpu.memory_space<vmem>>, vector<1x128xf32>
    %11 = vector.broadcast %10 : vector<1x128xf32> to vector<128x128xf32>
    %12 = arith.addf %9, %11 : vector<128x128xf32>
    %cst_9 = arith.constant 0.000000e+00 : f32
    %13 = vector.broadcast %cst_9 : f32 to vector<128x128xf32>
    %14 = arith.maximumf %12, %13 : vector<128x128xf32>
    %c0_10 = arith.constant 0 : index
    %c0_11 = arith.constant 0 : index
    %15 = vector.load %arg6[%c0_10, %c0_11] : memref<128x64xf32, #tpu.memory_space<vmem>>, vector<128x64xf32>
    %cst_12 = arith.constant dense<0.000000e+00> : vector<128x64xf32>
    %16 = tpu.matmul %14, %15, %cst_12 {dimension_numbers = #tpu.dot_dimension_numbers<[1], [0], [0], [1], [0, 0, 1, 1], [], []>} : vector<128x128xf32>, vector<128x64xf32>, vector<128x64xf32> -> vector<128x64xf32>
    %c24 = arith.constant 24 : index
    %c0_13 = arith.constant 0 : index
    %17 = vector.load %arg10[%c24, %c0_13] : memref<160x64xf32, #tpu.memory_space<vmem>>, vector<128x64xf32>
    tpu.vector_store %arg10[%c24, %c0_13], %16 {strides = array<i32>} : memref<160x64xf32, #tpu.memory_space<vmem>>, vector<128x64xf32>,
    %c1_i32 = arith.constant 1 : i32
    %18 = arith.cmpi slt, %arg1, %c1_i32 : i32
    %19 = arith.extui %18 : i1 to i32
    %c0_i32_14 = arith.constant 0 : i32
    %20 = arith.cmpi ne, %19, %c0_i32_14 : i32
    scf.if %20 {
      %c0_197 = arith.constant 0 : index
      %c0_198 = arith.constant 0 : index
      %c0_199 = arith.constant 0 : index
      %248 = vector.load %arg3[%c0_197, %c0_198, %c0_199] : memref<1x8x64xf32, #tpu.memory_space<vmem>>, vector<1x8x64xf32>
      %249 = vector.shape_cast %248 : vector<1x8x64xf32> to vector<8x64xf32>
      %c0_200 = arith.constant 0 : index
      %c0_201 = arith.constant 0 : index
      %250 = vector.load %arg4[%c0_200, %c0_201] : memref<64x128xf32, #tpu.memory_space<vmem>>, vector<64x128xf32>
      %cst_202 = arith.constant dense<0.000000e+00> : vector<8x128xf32>
      %251 = tpu.matmul %249, %250, %cst_202 {dimension_numbers = #tpu.dot_dimension_numbers<[1], [0], [0], [1], [0, 0, 1, 1], [], []>} : vector<8x64xf32>, vector<64x128xf32>, vector<8x128xf32> -> vector<8x128xf32>
      %c0_203 = arith.constant 0 : index
      %c0_204 = arith.constant 0 : index
      %252 = vector.load %arg5[%c0_203, %c0_204] : memref<1x128xf32, #tpu.memory_space<vmem>>, vector<1x128xf32>
      %253 = vector.broadcast %252 : vector<1x128xf32> to vector<8x128xf32>
      %254 = arith.addf %251, %253 : vector<8x128xf32>
      %cst_205 = arith.constant 0.000000e+00 : f32
      %255 = vector.broadcast %cst_205 : f32 to vector<8x128xf32>
      %256 = arith.maximumf %254, %255 : vector<8x128xf32>
      %c0_206 = arith.constant 0 : index
      %c0_207 = arith.constant 0 : index
      %257 = vector.load %arg6[%c0_206, %c0_207] : memref<128x64xf32, #tpu.memory_space<vmem>>, vector<128x64xf32>
      %cst_208 = arith.constant dense<0.000000e+00> : vector<8x64xf32>
      %258 = tpu.matmul %256, %257, %cst_208 {dimension_numbers = #tpu.dot_dimension_numbers<[1], [0], [0], [1], [0, 0, 1, 1], [], []>} : vector<8x128xf32>, vector<128x64xf32>, vector<8x64xf32> -> vector<8x64xf32>
      %c152 = arith.constant 152 : index
      %c0_209 = arith.constant 0 : index
      %259 = vector.load %arg10[%c152, %c0_209] : memref<160x64xf32, #tpu.memory_space<vmem>>, vector<8x64xf32>
      tpu.vector_store %arg10[%c152, %c0_209], %258 {strides = array<i32>} : memref<160x64xf32, #tpu.memory_space<vmem>>, vector<8x64xf32>,
    } else {
    }
    %c1_i32_15 = arith.constant 1 : i32
    %21 = arith.cmpi eq, %arg1, %c1_i32_15 : i32
    %22 = arith.extui %21 : i1 to i32
    %c0_i32_16 = arith.constant 0 : i32
    %23 = arith.cmpi ne, %22, %c0_i32_16 : i32
    scf.if %23 {
      %cst_197 = arith.constant 0.000000e+00 : f32
      %248 = vector.broadcast %cst_197 : f32 to vector<8x64xf32>
      %c152 = arith.constant 152 : index
      %c0_198 = arith.constant 0 : index
      %249 = vector.load %arg10[%c152, %c0_198] : memref<160x64xf32, #tpu.memory_space<vmem>>, vector<8x64xf32>
      tpu.vector_store %arg10[%c152, %c0_198], %248 {strides = array<i32>} : memref<160x64xf32, #tpu.memory_space<vmem>>, vector<8x64xf32>,
    } else {
    }
    %c0_17 = arith.constant 0 : index
    %c0_18 = arith.constant 0 : index
    %c0_19 = arith.constant 0 : index
    %24 = vector.load %arg2[%c0_17, %c0_18, %c0_19] : memref<1x128x64xf32, #tpu.memory_space<vmem>>, vector<1x64x64xf32>
    %25 = vector.shape_cast %24 : vector<1x64x64xf32> to vector<64x64xf32>
    %c24_20 = arith.constant 24 : index
    %c0_21 = arith.constant 0 : index
    %26 = vector.load %arg10[%c24_20, %c0_21] : memref<160x64xf32, #tpu.memory_space<vmem>>, vector<64x64xf32>
    %27 = arith.addf %25, %26 : vector<64x64xf32>
    %c5 = arith.constant 5 : index
    %c0_22 = arith.constant 0 : index
    %28 = vector.load %arg10[%c5, %c0_22] : memref<160x64xf32, #tpu.memory_space<vmem>>, vector<64x64xf32>
    %c0_23 = arith.constant 0 : index
    %c0_24 = arith.constant 0 : index
    %c0_25 = arith.constant 0 : index
    %29 = vector.load %arg7[%c0_23, %c0_24, %c0_25] : memref<20x64x64xf32, #tpu.memory_space<vmem>>, vector<1x64x64xf32>
    %30 = vector.shape_cast %29 : vector<1x64x64xf32> to vector<64x64xf32>
    %31 = arith.mulf %28, %30 : vector<64x64xf32>
    %32 = arith.addf %27, %31 : vector<64x64xf32>
    %c6 = arith.constant 6 : index
    %c0_26 = arith.constant 0 : index
    %33 = vector.load %arg10[%c6, %c0_26] : memref<160x64xf32, #tpu.memory_space<vmem>>, vector<64x64xf32>
    %c1 = arith.constant 1 : index
    %c0_27 = arith.constant 0 : index
    %c0_28 = arith.constant 0 : index
    %34 = vector.load %arg7[%c1, %c0_27, %c0_28] : memref<20x64x64xf32, #tpu.memory_space<vmem>>, vector<1x64x64xf32>
    %35 = vector.shape_cast %34 : vector<1x64x64xf32> to vector<64x64xf32>
    %36 = arith.mulf %33, %35 : vector<64x64xf32>
    %37 = arith.addf %32, %36 : vector<64x64xf32>
    %c7 = arith.constant 7 : index
    %c0_29 = arith.constant 0 : index
    %38 = vector.load %arg10[%c7, %c0_29] : memref<160x64xf32, #tpu.memory_space<vmem>>, vector<64x64xf32>
    %c2 = arith.constant 2 : index
    %c0_30 = arith.constant 0 : index
    %c0_31 = arith.constant 0 : index
    %39 = vector.load %arg7[%c2, %c0_30, %c0_31] : memref<20x64x64xf32, #tpu.memory_space<vmem>>, vector<1x64x64xf32>
    %40 = vector.shape_cast %39 : vector<1x64x64xf32> to vector<64x64xf32>
    %41 = arith.mulf %38, %40 : vector<64x64xf32>
    %42 = arith.addf %37, %41 : vector<64x64xf32>
    %c8 = arith.constant 8 : index
    %c0_32 = arith.constant 0 : index
    %43 = vector.load %arg10[%c8, %c0_32] : memref<160x64xf32, #tpu.memory_space<vmem>>, vector<64x64xf32>
    %c3 = arith.constant 3 : index
    %c0_33 = arith.constant 0 : index
    %c0_34 = arith.constant 0 : index
    %44 = vector.load %arg7[%c3, %c0_33, %c0_34] : memref<20x64x64xf32, #tpu.memory_space<vmem>>, vector<1x64x64xf32>
    %45 = vector.shape_cast %44 : vector<1x64x64xf32> to vector<64x64xf32>
    %46 = arith.mulf %43, %45 : vector<64x64xf32>
    %47 = arith.addf %42, %46 : vector<64x64xf32>
    %c9 = arith.constant 9 : index
    %c0_35 = arith.constant 0 : index
    %48 = vector.load %arg10[%c9, %c0_35] : memref<160x64xf32, #tpu.memory_space<vmem>>, vector<64x64xf32>
    %c4 = arith.constant 4 : index
    %c0_36 = arith.constant 0 : index
    %c0_37 = arith.constant 0 : index
    %49 = vector.load %arg7[%c4, %c0_36, %c0_37] : memref<20x64x64xf32, #tpu.memory_space<vmem>>, vector<1x64x64xf32>
    %50 = vector.shape_cast %49 : vector<1x64x64xf32> to vector<64x64xf32>
    %51 = arith.mulf %48, %50 : vector<64x64xf32>
    %52 = arith.addf %47, %51 : vector<64x64xf32>
    %c10 = arith.constant 10 : index
    %c0_38 = arith.constant 0 : index
    %53 = vector.load %arg10[%c10, %c0_38] : memref<160x64xf32, #tpu.memory_space<vmem>>, vector<64x64xf32>
    %c5_39 = arith.constant 5 : index
    %c0_40 = arith.constant 0 : index
    %c0_41 = arith.constant 0 : index
    %54 = vector.load %arg7[%c5_39, %c0_40, %c0_41] : memref<20x64x64xf32, #tpu.memory_space<vmem>>, vector<1x64x64xf32>
    %55 = vector.shape_cast %54 : vector<1x64x64xf32> to vector<64x64xf32>
    %56 = arith.mulf %53, %55 : vector<64x64xf32>
    %57 = arith.addf %52, %56 : vector<64x64xf32>
    %c11 = arith.constant 11 : index
    %c0_42 = arith.constant 0 : index
    %58 = vector.load %arg10[%c11, %c0_42] : memref<160x64xf32, #tpu.memory_space<vmem>>, vector<64x64xf32>
    %c6_43 = arith.constant 6 : index
    %c0_44 = arith.constant 0 : index
    %c0_45 = arith.constant 0 : index
    %59 = vector.load %arg7[%c6_43, %c0_44, %c0_45] : memref<20x64x64xf32, #tpu.memory_space<vmem>>, vector<1x64x64xf32>
    %60 = vector.shape_cast %59 : vector<1x64x64xf32> to vector<64x64xf32>
    %61 = arith.mulf %58, %60 : vector<64x64xf32>
    %62 = arith.addf %57, %61 : vector<64x64xf32>
    %c12 = arith.constant 12 : index
    %c0_46 = arith.constant 0 : index
    %63 = vector.load %arg10[%c12, %c0_46] : memref<160x64xf32, #tpu.memory_space<vmem>>, vector<64x64xf32>
    %c7_47 = arith.constant 7 : index
    %c0_48 = arith.constant 0 : index
    %c0_49 = arith.constant 0 : index
    %64 = vector.load %arg7[%c7_47, %c0_48, %c0_49] : memref<20x64x64xf32, #tpu.memory_space<vmem>>, vector<1x64x64xf32>
    %65 = vector.shape_cast %64 : vector<1x64x64xf32> to vector<64x64xf32>
    %66 = arith.mulf %63, %65 : vector<64x64xf32>
    %67 = arith.addf %62, %66 : vector<64x64xf32>
    %c13 = arith.constant 13 : index
    %c0_50 = arith.constant 0 : index
    %68 = vector.load %arg10[%c13, %c0_50] : memref<160x64xf32, #tpu.memory_space<vmem>>, vector<64x64xf32>
    %c8_51 = arith.constant 8 : index
    %c0_52 = arith.constant 0 : index
    %c0_53 = arith.constant 0 : index
    %69 = vector.load %arg7[%c8_51, %c0_52, %c0_53] : memref<20x64x64xf32, #tpu.memory_space<vmem>>, vector<1x64x64xf32>
    %70 = vector.shape_cast %69 : vector<1x64x64xf32> to vector<64x64xf32>
    %71 = arith.mulf %68, %70 : vector<64x64xf32>
    %72 = arith.addf %67, %71 : vector<64x64xf32>
    %c14 = arith.constant 14 : index
    %c0_54 = arith.constant 0 : index
    %73 = vector.load %arg10[%c14, %c0_54] : memref<160x64xf32, #tpu.memory_space<vmem>>, vector<64x64xf32>
    %c9_55 = arith.constant 9 : index
    %c0_56 = arith.constant 0 : index
    %c0_57 = arith.constant 0 : index
    %74 = vector.load %arg7[%c9_55, %c0_56, %c0_57] : memref<20x64x64xf32, #tpu.memory_space<vmem>>, vector<1x64x64xf32>
    %75 = vector.shape_cast %74 : vector<1x64x64xf32> to vector<64x64xf32>
    %76 = arith.mulf %73, %75 : vector<64x64xf32>
    %77 = arith.addf %72, %76 : vector<64x64xf32>
    %c15 = arith.constant 15 : index
    %c0_58 = arith.constant 0 : index
    %78 = vector.load %arg10[%c15, %c0_58] : memref<160x64xf32, #tpu.memory_space<vmem>>, vector<64x64xf32>
    %c10_59 = arith.constant 10 : index
    %c0_60 = arith.constant 0 : index
    %c0_61 = arith.constant 0 : index
    %79 = vector.load %arg7[%c10_59, %c0_60, %c0_61] : memref<20x64x64xf32, #tpu.memory_space<vmem>>, vector<1x64x64xf32>
    %80 = vector.shape_cast %79 : vector<1x64x64xf32> to vector<64x64xf32>
    %81 = arith.mulf %78, %80 : vector<64x64xf32>
    %82 = arith.addf %77, %81 : vector<64x64xf32>
    %c16 = arith.constant 16 : index
    %c0_62 = arith.constant 0 : index
    %83 = vector.load %arg10[%c16, %c0_62] : memref<160x64xf32, #tpu.memory_space<vmem>>, vector<64x64xf32>
    %c11_63 = arith.constant 11 : index
    %c0_64 = arith.constant 0 : index
    %c0_65 = arith.constant 0 : index
    %84 = vector.load %arg7[%c11_63, %c0_64, %c0_65] : memref<20x64x64xf32, #tpu.memory_space<vmem>>, vector<1x64x64xf32>
    %85 = vector.shape_cast %84 : vector<1x64x64xf32> to vector<64x64xf32>
    %86 = arith.mulf %83, %85 : vector<64x64xf32>
    %87 = arith.addf %82, %86 : vector<64x64xf32>
    %c17 = arith.constant 17 : index
    %c0_66 = arith.constant 0 : index
    %88 = vector.load %arg10[%c17, %c0_66] : memref<160x64xf32, #tpu.memory_space<vmem>>, vector<64x64xf32>
    %c12_67 = arith.constant 12 : index
    %c0_68 = arith.constant 0 : index
    %c0_69 = arith.constant 0 : index
    %89 = vector.load %arg7[%c12_67, %c0_68, %c0_69] : memref<20x64x64xf32, #tpu.memory_space<vmem>>, vector<1x64x64xf32>
    %90 = vector.shape_cast %89 : vector<1x64x64xf32> to vector<64x64xf32>
    %91 = arith.mulf %88, %90 : vector<64x64xf32>
    %92 = arith.addf %87, %91 : vector<64x64xf32>
    %c18 = arith.constant 18 : index
    %c0_70 = arith.constant 0 : index
    %93 = vector.load %arg10[%c18, %c0_70] : memref<160x64xf32, #tpu.memory_space<vmem>>, vector<64x64xf32>
    %c13_71 = arith.constant 13 : index
    %c0_72 = arith.constant 0 : index
    %c0_73 = arith.constant 0 : index
    %94 = vector.load %arg7[%c13_71, %c0_72, %c0_73] : memref<20x64x64xf32, #tpu.memory_space<vmem>>, vector<1x64x64xf32>
    %95 = vector.shape_cast %94 : vector<1x64x64xf32> to vector<64x64xf32>
    %96 = arith.mulf %93, %95 : vector<64x64xf32>
    %97 = arith.addf %92, %96 : vector<64x64xf32>
    %c19 = arith.constant 19 : index
    %c0_74 = arith.constant 0 : index
    %98 = vector.load %arg10[%c19, %c0_74] : memref<160x64xf32, #tpu.memory_space<vmem>>, vector<64x64xf32>
    %c14_75 = arith.constant 14 : index
    %c0_76 = arith.constant 0 : index
    %c0_77 = arith.constant 0 : index
    %99 = vector.load %arg7[%c14_75, %c0_76, %c0_77] : memref<20x64x64xf32, #tpu.memory_space<vmem>>, vector<1x64x64xf32>
    %100 = vector.shape_cast %99 : vector<1x64x64xf32> to vector<64x64xf32>
    %101 = arith.mulf %98, %100 : vector<64x64xf32>
    %102 = arith.addf %97, %101 : vector<64x64xf32>
    %c20 = arith.constant 20 : index
    %c0_78 = arith.constant 0 : index
    %103 = vector.load %arg10[%c20, %c0_78] : memref<160x64xf32, #tpu.memory_space<vmem>>, vector<64x64xf32>
    %c15_79 = arith.constant 15 : index
    %c0_80 = arith.constant 0 : index
    %c0_81 = arith.constant 0 : index
    %104 = vector.load %arg7[%c15_79, %c0_80, %c0_81] : memref<20x64x64xf32, #tpu.memory_space<vmem>>, vector<1x64x64xf32>
    %105 = vector.shape_cast %104 : vector<1x64x64xf32> to vector<64x64xf32>
    %106 = arith.mulf %103, %105 : vector<64x64xf32>
    %107 = arith.addf %102, %106 : vector<64x64xf32>
    %c21 = arith.constant 21 : index
    %c0_82 = arith.constant 0 : index
    %108 = vector.load %arg10[%c21, %c0_82] : memref<160x64xf32, #tpu.memory_space<vmem>>, vector<64x64xf32>
    %c16_83 = arith.constant 16 : index
    %c0_84 = arith.constant 0 : index
    %c0_85 = arith.constant 0 : index
    %109 = vector.load %arg7[%c16_83, %c0_84, %c0_85] : memref<20x64x64xf32, #tpu.memory_space<vmem>>, vector<1x64x64xf32>
    %110 = vector.shape_cast %109 : vector<1x64x64xf32> to vector<64x64xf32>
    %111 = arith.mulf %108, %110 : vector<64x64xf32>
    %112 = arith.addf %107, %111 : vector<64x64xf32>
    %c22 = arith.constant 22 : index
    %c0_86 = arith.constant 0 : index
    %113 = vector.load %arg10[%c22, %c0_86] : memref<160x64xf32, #tpu.memory_space<vmem>>, vector<64x64xf32>
    %c17_87 = arith.constant 17 : index
    %c0_88 = arith.constant 0 : index
    %c0_89 = arith.constant 0 : index
    %114 = vector.load %arg7[%c17_87, %c0_88, %c0_89] : memref<20x64x64xf32, #tpu.memory_space<vmem>>, vector<1x64x64xf32>
    %115 = vector.shape_cast %114 : vector<1x64x64xf32> to vector<64x64xf32>
    %116 = arith.mulf %113, %115 : vector<64x64xf32>
    %117 = arith.addf %112, %116 : vector<64x64xf32>
    %c23 = arith.constant 23 : index
    %c0_90 = arith.constant 0 : index
    %118 = vector.load %arg10[%c23, %c0_90] : memref<160x64xf32, #tpu.memory_space<vmem>>, vector<64x64xf32>
    %c18_91 = arith.constant 18 : index
    %c0_92 = arith.constant 0 : index
    %c0_93 = arith.constant 0 : index
    %119 = vector.load %arg7[%c18_91, %c0_92, %c0_93] : memref<20x64x64xf32, #tpu.memory_space<vmem>>, vector<1x64x64xf32>
    %120 = vector.shape_cast %119 : vector<1x64x64xf32> to vector<64x64xf32>
    %121 = arith.mulf %118, %120 : vector<64x64xf32>
    %122 = arith.addf %117, %121 : vector<64x64xf32>
    %c24_94 = arith.constant 24 : index
    %c0_95 = arith.constant 0 : index
    %123 = vector.load %arg10[%c24_94, %c0_95] : memref<160x64xf32, #tpu.memory_space<vmem>>, vector<64x64xf32>
    %c19_96 = arith.constant 19 : index
    %c0_97 = arith.constant 0 : index
    %c0_98 = arith.constant 0 : index
    %124 = vector.load %arg7[%c19_96, %c0_97, %c0_98] : memref<20x64x64xf32, #tpu.memory_space<vmem>>, vector<1x64x64xf32>
    %125 = vector.shape_cast %124 : vector<1x64x64xf32> to vector<64x64xf32>
    %126 = arith.mulf %123, %125 : vector<64x64xf32>
    %127 = arith.addf %122, %126 : vector<64x64xf32>
    %c25 = arith.constant 25 : index
    %c0_99 = arith.constant 0 : index
    %128 = vector.load %arg10[%c25, %c0_99] : memref<160x64xf32, #tpu.memory_space<vmem>>, vector<64x64xf32>
    %c0_100 = arith.constant 0 : index
    %c0_101 = arith.constant 0 : index
    %c0_102 = arith.constant 0 : index
    %129 = vector.load %arg8[%c0_100, %c0_101, %c0_102] : memref<1x64x64xf32, #tpu.memory_space<vmem>>, vector<1x64x64xf32>
    %130 = vector.shape_cast %129 : vector<1x64x64xf32> to vector<64x64xf32>
    %131 = arith.mulf %128, %130 : vector<64x64xf32>
    %132 = arith.addf %127, %131 : vector<64x64xf32>
    %c0_103 = arith.constant 0 : index
    %c0_104 = arith.constant 0 : index
    %c0_105 = arith.constant 0 : index
    %133 = vector.load %arg9[%c0_103, %c0_104, %c0_105] : memref<1x128x64xf32, #tpu.memory_space<vmem>>, vector<1x64x64xf32>
    %134 = vector.shape_cast %133 : vector<1x64x64xf32> to vector<64x64xf32>
    %135 = vector.shape_cast %132 : vector<64x64xf32> to vector<1x64x64xf32>
    tpu.vector_store %arg9[%c0_103, %c0_104, %c0_105], %135 {strides = array<i32>} : memref<1x128x64xf32, #tpu.memory_space<vmem>>, vector<1x64x64xf32>,
    %c0_106 = arith.constant 0 : index
    %c64 = arith.constant 64 : index
    %c0_107 = arith.constant 0 : index
    %136 = vector.load %arg2[%c0_106, %c64, %c0_107] : memref<1x128x64xf32, #tpu.memory_space<vmem>>, vector<1x64x64xf32>
    %137 = vector.shape_cast %136 : vector<1x64x64xf32> to vector<64x64xf32>
    %c88 = arith.constant 88 : index
    %c0_108 = arith.constant 0 : index
    %138 = vector.load %arg10[%c88, %c0_108] : memref<160x64xf32, #tpu.memory_space<vmem>>, vector<64x64xf32>
    %139 = arith.addf %137, %138 : vector<64x64xf32>
    %c69 = arith.constant 69 : index
    %c0_109 = arith.constant 0 : index
    %140 = vector.load %arg10[%c69, %c0_109] : memref<160x64xf32, #tpu.memory_space<vmem>>, vector<64x64xf32>
    %c0_110 = arith.constant 0 : index
    %c0_111 = arith.constant 0 : index
    %c0_112 = arith.constant 0 : index
    %141 = vector.load %arg7[%c0_110, %c0_111, %c0_112] : memref<20x64x64xf32, #tpu.memory_space<vmem>>, vector<1x64x64xf32>
    %142 = vector.shape_cast %141 : vector<1x64x64xf32> to vector<64x64xf32>
    %143 = arith.mulf %140, %142 : vector<64x64xf32>
    %144 = arith.addf %139, %143 : vector<64x64xf32>
    %c70 = arith.constant 70 : index
    %c0_113 = arith.constant 0 : index
    %145 = vector.load %arg10[%c70, %c0_113] : memref<160x64xf32, #tpu.memory_space<vmem>>, vector<64x64xf32>
    %c1_114 = arith.constant 1 : index
    %c0_115 = arith.constant 0 : index
    %c0_116 = arith.constant 0 : index
    %146 = vector.load %arg7[%c1_114, %c0_115, %c0_116] : memref<20x64x64xf32, #tpu.memory_space<vmem>>, vector<1x64x64xf32>
    %147 = vector.shape_cast %146 : vector<1x64x64xf32> to vector<64x64xf32>
    %148 = arith.mulf %145, %147 : vector<64x64xf32>
    %149 = arith.addf %144, %148 : vector<64x64xf32>
    %c71 = arith.constant 71 : index
    %c0_117 = arith.constant 0 : index
    %150 = vector.load %arg10[%c71, %c0_117] : memref<160x64xf32, #tpu.memory_space<vmem>>, vector<64x64xf32>
    %c2_118 = arith.constant 2 : index
    %c0_119 = arith.constant 0 : index
    %c0_120 = arith.constant 0 : index
    %151 = vector.load %arg7[%c2_118, %c0_119, %c0_120] : memref<20x64x64xf32, #tpu.memory_space<vmem>>, vector<1x64x64xf32>
    %152 = vector.shape_cast %151 : vector<1x64x64xf32> to vector<64x64xf32>
    %153 = arith.mulf %150, %152 : vector<64x64xf32>
    %154 = arith.addf %149, %153 : vector<64x64xf32>
    %c72 = arith.constant 72 : index
    %c0_121 = arith.constant 0 : index
    %155 = vector.load %arg10[%c72, %c0_121] : memref<160x64xf32, #tpu.memory_space<vmem>>, vector<64x64xf32>
    %c3_122 = arith.constant 3 : index
    %c0_123 = arith.constant 0 : index
    %c0_124 = arith.constant 0 : index
    %156 = vector.load %arg7[%c3_122, %c0_123, %c0_124] : memref<20x64x64xf32, #tpu.memory_space<vmem>>, vector<1x64x64xf32>
    %157 = vector.shape_cast %156 : vector<1x64x64xf32> to vector<64x64xf32>
    %158 = arith.mulf %155, %157 : vector<64x64xf32>
    %159 = arith.addf %154, %158 : vector<64x64xf32>
    %c73 = arith.constant 73 : index
    %c0_125 = arith.constant 0 : index
    %160 = vector.load %arg10[%c73, %c0_125] : memref<160x64xf32, #tpu.memory_space<vmem>>, vector<64x64xf32>
    %c4_126 = arith.constant 4 : index
    %c0_127 = arith.constant 0 : index
    %c0_128 = arith.constant 0 : index
    %161 = vector.load %arg7[%c4_126, %c0_127, %c0_128] : memref<20x64x64xf32, #tpu.memory_space<vmem>>, vector<1x64x64xf32>
    %162 = vector.shape_cast %161 : vector<1x64x64xf32> to vector<64x64xf32>
    %163 = arith.mulf %160, %162 : vector<64x64xf32>
    %164 = arith.addf %159, %163 : vector<64x64xf32>
    %c74 = arith.constant 74 : index
    %c0_129 = arith.constant 0 : index
    %165 = vector.load %arg10[%c74, %c0_129] : memref<160x64xf32, #tpu.memory_space<vmem>>, vector<64x64xf32>
    %c5_130 = arith.constant 5 : index
    %c0_131 = arith.constant 0 : index
    %c0_132 = arith.constant 0 : index
    %166 = vector.load %arg7[%c5_130, %c0_131, %c0_132] : memref<20x64x64xf32, #tpu.memory_space<vmem>>, vector<1x64x64xf32>
    %167 = vector.shape_cast %166 : vector<1x64x64xf32> to vector<64x64xf32>
    %168 = arith.mulf %165, %167 : vector<64x64xf32>
    %169 = arith.addf %164, %168 : vector<64x64xf32>
    %c75 = arith.constant 75 : index
    %c0_133 = arith.constant 0 : index
    %170 = vector.load %arg10[%c75, %c0_133] : memref<160x64xf32, #tpu.memory_space<vmem>>, vector<64x64xf32>
    %c6_134 = arith.constant 6 : index
    %c0_135 = arith.constant 0 : index
    %c0_136 = arith.constant 0 : index
    %171 = vector.load %arg7[%c6_134, %c0_135, %c0_136] : memref<20x64x64xf32, #tpu.memory_space<vmem>>, vector<1x64x64xf32>
    %172 = vector.shape_cast %171 : vector<1x64x64xf32> to vector<64x64xf32>
    %173 = arith.mulf %170, %172 : vector<64x64xf32>
    %174 = arith.addf %169, %173 : vector<64x64xf32>
    %c76 = arith.constant 76 : index
    %c0_137 = arith.constant 0 : index
    %175 = vector.load %arg10[%c76, %c0_137] : memref<160x64xf32, #tpu.memory_space<vmem>>, vector<64x64xf32>
    %c7_138 = arith.constant 7 : index
    %c0_139 = arith.constant 0 : index
    %c0_140 = arith.constant 0 : index
    %176 = vector.load %arg7[%c7_138, %c0_139, %c0_140] : memref<20x64x64xf32, #tpu.memory_space<vmem>>, vector<1x64x64xf32>
    %177 = vector.shape_cast %176 : vector<1x64x64xf32> to vector<64x64xf32>
    %178 = arith.mulf %175, %177 : vector<64x64xf32>
    %179 = arith.addf %174, %178 : vector<64x64xf32>
    %c77 = arith.constant 77 : index
    %c0_141 = arith.constant 0 : index
    %180 = vector.load %arg10[%c77, %c0_141] : memref<160x64xf32, #tpu.memory_space<vmem>>, vector<64x64xf32>
    %c8_142 = arith.constant 8 : index
    %c0_143 = arith.constant 0 : index
    %c0_144 = arith.constant 0 : index
    %181 = vector.load %arg7[%c8_142, %c0_143, %c0_144] : memref<20x64x64xf32, #tpu.memory_space<vmem>>, vector<1x64x64xf32>
    %182 = vector.shape_cast %181 : vector<1x64x64xf32> to vector<64x64xf32>
    %183 = arith.mulf %180, %182 : vector<64x64xf32>
    %184 = arith.addf %179, %183 : vector<64x64xf32>
    %c78 = arith.constant 78 : index
    %c0_145 = arith.constant 0 : index
    %185 = vector.load %arg10[%c78, %c0_145] : memref<160x64xf32, #tpu.memory_space<vmem>>, vector<64x64xf32>
    %c9_146 = arith.constant 9 : index
    %c0_147 = arith.constant 0 : index
    %c0_148 = arith.constant 0 : index
    %186 = vector.load %arg7[%c9_146, %c0_147, %c0_148] : memref<20x64x64xf32, #tpu.memory_space<vmem>>, vector<1x64x64xf32>
    %187 = vector.shape_cast %186 : vector<1x64x64xf32> to vector<64x64xf32>
    %188 = arith.mulf %185, %187 : vector<64x64xf32>
    %189 = arith.addf %184, %188 : vector<64x64xf32>
    %c79 = arith.constant 79 : index
    %c0_149 = arith.constant 0 : index
    %190 = vector.load %arg10[%c79, %c0_149] : memref<160x64xf32, #tpu.memory_space<vmem>>, vector<64x64xf32>
    %c10_150 = arith.constant 10 : index
    %c0_151 = arith.constant 0 : index
    %c0_152 = arith.constant 0 : index
    %191 = vector.load %arg7[%c10_150, %c0_151, %c0_152] : memref<20x64x64xf32, #tpu.memory_space<vmem>>, vector<1x64x64xf32>
    %192 = vector.shape_cast %191 : vector<1x64x64xf32> to vector<64x64xf32>
    %193 = arith.mulf %190, %192 : vector<64x64xf32>
    %194 = arith.addf %189, %193 : vector<64x64xf32>
    %c80 = arith.constant 80 : index
    %c0_153 = arith.constant 0 : index
    %195 = vector.load %arg10[%c80, %c0_153] : memref<160x64xf32, #tpu.memory_space<vmem>>, vector<64x64xf32>
    %c11_154 = arith.constant 11 : index
    %c0_155 = arith.constant 0 : index
    %c0_156 = arith.constant 0 : index
    %196 = vector.load %arg7[%c11_154, %c0_155, %c0_156] : memref<20x64x64xf32, #tpu.memory_space<vmem>>, vector<1x64x64xf32>
    %197 = vector.shape_cast %196 : vector<1x64x64xf32> to vector<64x64xf32>
    %198 = arith.mulf %195, %197 : vector<64x64xf32>
    %199 = arith.addf %194, %198 : vector<64x64xf32>
    %c81 = arith.constant 81 : index
    %c0_157 = arith.constant 0 : index
    %200 = vector.load %arg10[%c81, %c0_157] : memref<160x64xf32, #tpu.memory_space<vmem>>, vector<64x64xf32>
    %c12_158 = arith.constant 12 : index
    %c0_159 = arith.constant 0 : index
    %c0_160 = arith.constant 0 : index
    %201 = vector.load %arg7[%c12_158, %c0_159, %c0_160] : memref<20x64x64xf32, #tpu.memory_space<vmem>>, vector<1x64x64xf32>
    %202 = vector.shape_cast %201 : vector<1x64x64xf32> to vector<64x64xf32>
    %203 = arith.mulf %200, %202 : vector<64x64xf32>
    %204 = arith.addf %199, %203 : vector<64x64xf32>
    %c82 = arith.constant 82 : index
    %c0_161 = arith.constant 0 : index
    %205 = vector.load %arg10[%c82, %c0_161] : memref<160x64xf32, #tpu.memory_space<vmem>>, vector<64x64xf32>
    %c13_162 = arith.constant 13 : index
    %c0_163 = arith.constant 0 : index
    %c0_164 = arith.constant 0 : index
    %206 = vector.load %arg7[%c13_162, %c0_163, %c0_164] : memref<20x64x64xf32, #tpu.memory_space<vmem>>, vector<1x64x64xf32>
    %207 = vector.shape_cast %206 : vector<1x64x64xf32> to vector<64x64xf32>
    %208 = arith.mulf %205, %207 : vector<64x64xf32>
    %209 = arith.addf %204, %208 : vector<64x64xf32>
    %c83 = arith.constant 83 : index
    %c0_165 = arith.constant 0 : index
    %210 = vector.load %arg10[%c83, %c0_165] : memref<160x64xf32, #tpu.memory_space<vmem>>, vector<64x64xf32>
    %c14_166 = arith.constant 14 : index
    %c0_167 = arith.constant 0 : index
    %c0_168 = arith.constant 0 : index
    %211 = vector.load %arg7[%c14_166, %c0_167, %c0_168] : memref<20x64x64xf32, #tpu.memory_space<vmem>>, vector<1x64x64xf32>
    %212 = vector.shape_cast %211 : vector<1x64x64xf32> to vector<64x64xf32>
    %213 = arith.mulf %210, %212 : vector<64x64xf32>
    %214 = arith.addf %209, %213 : vector<64x64xf32>
    %c84 = arith.constant 84 : index
    %c0_169 = arith.constant 0 : index
    %215 = vector.load %arg10[%c84, %c0_169] : memref<160x64xf32, #tpu.memory_space<vmem>>, vector<64x64xf32>
    %c15_170 = arith.constant 15 : index
    %c0_171 = arith.constant 0 : index
    %c0_172 = arith.constant 0 : index
    %216 = vector.load %arg7[%c15_170, %c0_171, %c0_172] : memref<20x64x64xf32, #tpu.memory_space<vmem>>, vector<1x64x64xf32>
    %217 = vector.shape_cast %216 : vector<1x64x64xf32> to vector<64x64xf32>
    %218 = arith.mulf %215, %217 : vector<64x64xf32>
    %219 = arith.addf %214, %218 : vector<64x64xf32>
    %c85 = arith.constant 85 : index
    %c0_173 = arith.constant 0 : index
    %220 = vector.load %arg10[%c85, %c0_173] : memref<160x64xf32, #tpu.memory_space<vmem>>, vector<64x64xf32>
    %c16_174 = arith.constant 16 : index
    %c0_175 = arith.constant 0 : index
    %c0_176 = arith.constant 0 : index
    %221 = vector.load %arg7[%c16_174, %c0_175, %c0_176] : memref<20x64x64xf32, #tpu.memory_space<vmem>>, vector<1x64x64xf32>
    %222 = vector.shape_cast %221 : vector<1x64x64xf32> to vector<64x64xf32>
    %223 = arith.mulf %220, %222 : vector<64x64xf32>
    %224 = arith.addf %219, %223 : vector<64x64xf32>
    %c86 = arith.constant 86 : index
    %c0_177 = arith.constant 0 : index
    %225 = vector.load %arg10[%c86, %c0_177] : memref<160x64xf32, #tpu.memory_space<vmem>>, vector<64x64xf32>
    %c17_178 = arith.constant 17 : index
    %c0_179 = arith.constant 0 : index
    %c0_180 = arith.constant 0 : index
    %226 = vector.load %arg7[%c17_178, %c0_179, %c0_180] : memref<20x64x64xf32, #tpu.memory_space<vmem>>, vector<1x64x64xf32>
    %227 = vector.shape_cast %226 : vector<1x64x64xf32> to vector<64x64xf32>
    %228 = arith.mulf %225, %227 : vector<64x64xf32>
    %229 = arith.addf %224, %228 : vector<64x64xf32>
    %c87 = arith.constant 87 : index
    %c0_181 = arith.constant 0 : index
    %230 = vector.load %arg10[%c87, %c0_181] : memref<160x64xf32, #tpu.memory_space<vmem>>, vector<64x64xf32>
    %c18_182 = arith.constant 18 : index
    %c0_183 = arith.constant 0 : index
    %c0_184 = arith.constant 0 : index
    %231 = vector.load %arg7[%c18_182, %c0_183, %c0_184] : memref<20x64x64xf32, #tpu.memory_space<vmem>>, vector<1x64x64xf32>
    %232 = vector.shape_cast %231 : vector<1x64x64xf32> to vector<64x64xf32>
    %233 = arith.mulf %230, %232 : vector<64x64xf32>
    %234 = arith.addf %229, %233 : vector<64x64xf32>
    %c88_185 = arith.constant 88 : index
    %c0_186 = arith.constant 0 : index
    %235 = vector.load %arg10[%c88_185, %c0_186] : memref<160x64xf32, #tpu.memory_space<vmem>>, vector<64x64xf32>
    %c19_187 = arith.constant 19 : index
    %c0_188 = arith.constant 0 : index
    %c0_189 = arith.constant 0 : index
    %236 = vector.load %arg7[%c19_187, %c0_188, %c0_189] : memref<20x64x64xf32, #tpu.memory_space<vmem>>, vector<1x64x64xf32>
    %237 = vector.shape_cast %236 : vector<1x64x64xf32> to vector<64x64xf32>
    %238 = arith.mulf %235, %237 : vector<64x64xf32>
    %239 = arith.addf %234, %238 : vector<64x64xf32>
    %c89 = arith.constant 89 : index
    %c0_190 = arith.constant 0 : index
    %240 = vector.load %arg10[%c89, %c0_190] : memref<160x64xf32, #tpu.memory_space<vmem>>, vector<64x64xf32>
    %c0_191 = arith.constant 0 : index
    %c0_192 = arith.constant 0 : index
    %c0_193 = arith.constant 0 : index
    %241 = vector.load %arg8[%c0_191, %c0_192, %c0_193] : memref<1x64x64xf32, #tpu.memory_space<vmem>>, vector<1x64x64xf32>
    %242 = vector.shape_cast %241 : vector<1x64x64xf32> to vector<64x64xf32>
    %243 = arith.mulf %240, %242 : vector<64x64xf32>
    %244 = arith.addf %239, %243 : vector<64x64xf32>
    %c0_194 = arith.constant 0 : index
    %c64_195 = arith.constant 64 : index
    %c0_196 = arith.constant 0 : index
    %245 = vector.load %arg9[%c0_194, %c64_195, %c0_196] : memref<1x128x64xf32, #tpu.memory_space<vmem>>, vector<1x64x64xf32>
    %246 = vector.shape_cast %245 : vector<1x64x64xf32> to vector<64x64xf32>
    %247 = vector.shape_cast %244 : vector<64x64xf32> to vector<1x64x64xf32>
    tpu.vector_store %arg9[%c0_194, %c64_195, %c0_196], %247 {strides = array<i32>} : memref<1x128x64xf32, #tpu.memory_space<vmem>>, vector<1x64x64xf32>,
    return
  }
  func.func @transform_0(%arg0: i32, %arg1: i32) -> (i32, i32, i32) {
    %c0_i32 = arith.constant 0 : i32
    %c0_i32_0 = arith.constant 0 : i32
    return %arg0, %arg1, %c0_i32 : i32, i32, i32
  }
  func.func @transform_1(%arg0: i32, %arg1: i32) -> (i32, i32, i32) {
    %c1_i32 = arith.constant 1 : i32
    %0 = arith.addi %arg1, %c1_i32 : i32
    %c16_i32 = arith.constant 16 : i32
    %1 = arith.muli %0, %c16_i32 : i32
    %c31_i32 = arith.constant 31 : i32
    %2 = arith.minsi %1, %c31_i32 : i32
    %c0_i32 = arith.constant 0 : i32
    %c0_i32_0 = arith.constant 0 : i32
    return %arg0, %2, %c0_i32 : i32, i32, i32
  }
  func.func @transform_2(%arg0: i32, %arg1: i32) -> (i32, i32) {
    %c0_i32 = arith.constant 0 : i32
    %c0_i32_0 = arith.constant 0 : i32
    %c0_i32_1 = arith.constant 0 : i32
    return %c0_i32, %c0_i32_0 : i32, i32
  }
  func.func @transform_3(%arg0: i32, %arg1: i32) -> (i32, i32) {
    %c0_i32 = arith.constant 0 : i32
    %c0_i32_0 = arith.constant 0 : i32
    %c0_i32_1 = arith.constant 0 : i32
    return %c0_i32, %c0_i32_0 : i32, i32
  }
  func.func @transform_4(%arg0: i32, %arg1: i32) -> (i32, i32) {
    %c0_i32 = arith.constant 0 : i32
    %c0_i32_0 = arith.constant 0 : i32
    %c0_i32_1 = arith.constant 0 : i32
    return %c0_i32, %c0_i32_0 : i32, i32
  }
  func.func @transform_5(%arg0: i32, %arg1: i32) -> (i32, i32, i32) {
    %c0_i32 = arith.constant 0 : i32
    %c0_i32_0 = arith.constant 0 : i32
    %c0_i32_1 = arith.constant 0 : i32
    %c0_i32_2 = arith.constant 0 : i32
    return %c0_i32, %c0_i32_0, %c0_i32_1 : i32, i32, i32
  }
  func.func @transform_6(%arg0: i32, %arg1: i32) -> (i32, i32, i32) {
    %c0_i32 = arith.constant 0 : i32
    %c0_i32_0 = arith.constant 0 : i32
    %c0_i32_1 = arith.constant 0 : i32
    %c0_i32_2 = arith.constant 0 : i32
    return %c0_i32, %c0_i32_0, %c0_i32_1 : i32, i32, i32
  }
  func.func @transform_7(%arg0: i32, %arg1: i32) -> (i32, i32, i32) {
    %c0_i32 = arith.constant 0 : i32
    %c0_i32_0 = arith.constant 0 : i32
    return %arg0, %arg1, %c0_i32 : i32, i32, i32
  }
}

</mosaic_0001>

<bundles_post_ra>
// kernel: dfsmn_forward.1
= control target key start
LH: loop header
LB: loop body
LE: loop exit
PB: predicated region body
PF: predicated region fallthrough
CT: control target
= control target key end

     0   :  { %s3169_s24 = smov 0   ;;  %s3171_s25 = smov 0   ;;  %s5062_s0 = inlined_call_operand.vmem [shape: f32[2,256,64], index: 0, kind: input, shape index: {}, may-alias: {0,1}]   ;;  %s5063_s1 = inlined_call_operand.vmem [shape: f32[2,256,64], index: 1, kind: input, shape index: {}, may-alias: {0,1}]   ;;  %s5064_s2 = inlined_call_operand.vmem [shape: f32[64,128], index: 2, kind: input, shape index: {}]   ;;  %s5065_s3 = inlined_call_operand.vmem [shape: f32[1,128], index: 3, kind: input, shape index: {}]   ;;  %s5066_s4 = inlined_call_operand.vmem [shape: f32[128,64], index: 4, kind: input, shape index: {}]   ;;  %s5067_s5 = inlined_call_operand.vmem [shape: f32[20,64,64], index: 5, kind: input, shape index: {}]   ;;  %s5068_s6 = inlined_call_operand.vmem [shape: f32[1,64,64], index: 6, kind: input, shape index: {}]   ;;  %s5069_s7 = inlined_call_operand.vmem [shape: f32[2,256,64], index: 7, kind: output, shape index: {}]  }
   0x1   :  { %s3173_s26 = smov 0   ;;  %s3175_s27 = smov 0  }
   0x2   :  { %s3177_s28 = smov 0  }
   0x3 LB: > { %s26_s29 = sadd.s32 1, %s3114_s26  ;;  %s29_s30 = sadd.s32 1, %s3118_s27  ;;  %s3122_s28 = sphi %s3177_s28, %s17_s28   ;;  %s3118_s27 = sphi %s3175_s27, %s5241_s27   ;;  %s3114_s26 = sphi %s3173_s26, %s5240_s26   ;;  %s3110_s25 = sphi %s3171_s25, %s5239_s25   ;;  %s3106_s24 = sphi %s3169_s24, %s5238_s24  }
   0x4   : > { %p27_p0 = scmp.ge.s32.totalorder %s26_s29, 2  ;;  %p2343_p1 = scmp.ge.s32.totalorder %s3122_s28, 1 }
   0x5   : > { %p289_p2 = scmp.lt.s32.totalorder %s3122_s28, 5 }
   0x6   : > { %s5243_s29 = smov (%p27_p0, %s26_s29), 0  ;;  %s5245_s30 = smov (!%p27_p0, %s29_s30), %s3118_s27 }
   0x7   : > { %p290_p3 = pnand %p2343_p1, %p289_p2  ;;  %p31_p4 = scmp.ge.s32.totalorder %s5245_s30, 2 }
   0x9   : > { %s5247_s30 = smov (%p31_p4, %s5245_s30), 0  ;;  %293 = sbr.rel (%p290_p3) target bundleno = 938 (0x3aa), region = 48 }
  0x10   : > { %s2344_s8 = sshll.u32 %s3106_s24, 4  ;;  %p342_p5 = scmp.lt.s32.totalorder %s3110_s25, 1 }
  0x11   : > { %p344_p6 = scmp.lt.s32.totalorder %s2344_s8, 31  ;;  %s2690_s9 = sadd.s32 16, %s2344_s8 }
  0x12   : > { %s5249_s25 = smov (!%p342_p5, %s3110_s25), 1  ;;  %p353_p7 = scmp.lt.s32.totalorder %s2690_s9, 31 }
  0x13   : > { %s5251_s8 = smov (!%p344_p6, %s2344_s8), 31  ;;  %s2345_s10 = sshll.u32 %s5249_s25, 5 }
  0x14   : > { %s347_s11 = sadd.s32 %s2345_s10, %s5251_s8  ;;  %s5253_s9 = smov (!%p353_p7, %s2690_s9), 31 }
  0x15   : > { %s2346_s12 = sshll.u32 %s347_s11, 3  ;;  %s5255_s9 = smov (!%p353_p7, %s5253_s9), 31 }
  0x16   : > { %s3205_s15 = scalar_lea.vmem %s5062_s0, %s2346_s12  ;;  %s3210_s18 = scalar_lea.vmem %s5069_s7, %s2346_s12 }
  0x17   : > { %s360_s19 = sadd.s32 %s2345_s10, %s5255_s9  ;;  %p2356_p8 = scmp.ne.s32.totalorder %s3106_s24, 0 }
  0x18   : > { %s2352_s20 = sshll.u32 %s360_s19, 3  ;;  %vm381_vm0 = vcmask (!%p2356_p8), 523264   ;;  %v3124_v0 = vmov (!%p2356_p8), 0.0  }
  0x19   : > { %s3215_s23 = scalar_lea.vmem %s5063_s1, %s2352_s20  ;;  %380 = sbr.rel (%p2356_p8) target bundleno = 32 (0x20), region = 52  ;;  %382 = vst.msk [vmem:[#allocation2] sm:$0xff] (!%p2356_p8), %vm381_vm0, %v3124_v0  ;;  %383 = vst.msk [vmem:[#allocation2 + $0x8] sm:$0xff] (!%p2356_p8), %vm381_vm0, %v3124_v0 }
  0x1a   : > { %384 = vst.msk [vmem:[#allocation2 + $0x10] sm:$0xff] (!%p2356_p8), %vm381_vm0, %v3124_v0 }
  0x20 PF: > { %p2357_p9 = scmp.le.s32.totalorder %s3106_s24, 0 }
  0x21   : > { %v389_v1 = vld [vmem:[#allocation2 + $0x80] sm:$0xff] (!%p2357_p9)  ;;  %vm392_vm1 = vcmask (!%p2357_p9), 523264   ;;  %v390_v2 = vld [vmem:[#allocation2 + $0x88] sm:$0xff] (!%p2357_p9)  ;;  %v391_v3 = vld [vmem:[#allocation2 + $0x90] sm:$0xff] (!%p2357_p9) }
  0x22   : > { %388 = sbr.rel (%p2357_p9) target bundleno = 41 (0x29), region = 56  ;;  %393 = vst.msk [vmem:[#allocation2] sm:$0xff] (!%p2357_p9), %vm392_vm1, %v389_v1  ;;  %394 = vst.msk [vmem:[#allocation2 + $0x8] sm:$0xff] (!%p2357_p9), %vm392_vm1, %v390_v2 }
  0x23   : > { %395 = vst.msk [vmem:[#allocation2 + $0x10] sm:$0xff] (!%p2357_p9), %vm392_vm1, %v391_v3 }
  0x29 PF: > { %v412_v4 = vld [vmem:[%s5064_s2] sm:$0xff]  ;;  %v413_v5 = vld [vmem:[%s5064_s2 + $0x8] sm:$0xff]  ;;  %v414_v6 = vld [vmem:[%s5064_s2 + $0x10] sm:$0xff]  ;;  %vm427_vm2 = vcmask 523264   ;;  %p2375_p10 = scmp.ge.s32.totalorder %s3106_s24, 1 }
  0x2a   : > { %v2923_v7 = vpack.c.bf16 %v413_v5, %v412_v4  ;;  %v415_v8 = vld [vmem:[%s5064_s2 + $0x18] sm:$0xff]  ;;  %v416_v10 = vld [vmem:[%s5064_s2 + $0x20] sm:$0xff]  ;;  %v417_v11 = vld [vmem:[%s5064_s2 + $0x28] sm:$0xff]  ;;  %vm3126_vm3 = vmmov (!%p2375_p10), 0  }
  0x2b   : > { %v2927_v9 = vpack.c.bf16 %v415_v8, %v414_v6  ;;  %v396_v12 = vld [vmem:[%s3205_s15] sm:$0xff]  ;;  %v2931_v13 = vpack.c.bf16 %v417_v11, %v416_v10  ;;  %v418_v14 = vld [vmem:[%s5064_s2 + $0x30] sm:$0xff]  ;;  %v419_v15 = vld [vmem:[%s5064_s2 + $0x38] sm:$0xff] }
  0x2c   : > { %2924 = vmatprep.subr.bf16.mxu0 %v2923_v7  ;;  %2789 = vmatprep.mubr.msk.f32.mxu0 %vm427_vm2, %v396_v12  ;;  %v637_v16 = vld [vmem:[%s5066_s4] sm:$0xff]  ;;  %v638_v17 = vld [vmem:[%s5066_s4 + $0x8] sm:$0xff]  ;;  %v639_v18 = vld [vmem:[%s5066_s4 + $0x10] sm:$0xff]  ;;  %v2935_v19 = vpack.c.bf16 %v419_v15, %v418_v14 }
  0x2d   : > { %2926 = vmatpush3.bf16.msra.mxu0 %v2923_v7  ;;  %v2939_v20 = vpack.c.bf16 %v638_v17, %v637_v16  ;;  %v640_v21 = vld [vmem:[%s5066_s4 + $0x18] sm:$0xff]  ;;  %v641_v23 = vld [vmem:[%s5066_s4 + $0x20] sm:$0xff]  ;;  %v642_v24 = vld [vmem:[%s5066_s4 + $0x28] sm:$0xff] }
  0x2e   : > { %2928 = vmatprep.subr.bf16.mxu0 %v2927_v9  ;;  %v2943_v22 = vpack.c.bf16 %v640_v21, %v639_v18  ;;  %v2947_v25 = vpack.c.bf16 %v642_v24, %v641_v23  ;;  %v397_v26 = vld [vmem:[%s3205_s15 + $0x8] sm:$0xff]  ;;  %v398_v27 = vld [vmem:[%s3205_s15 + $0x10] sm:$0xff]  ;;  %v644_v29 = vld [vmem:[%s5066_s4 + $0x38] sm:$0xff] }
  0x2f   : > { %3007 = vmatprep.subr.bf16.mxu1 %v2939_v20  ;;  %v643_v28 = vld [vmem:[%s5066_s4 + $0x30] sm:$0xff]  ;;  %v399_v30 = vld [vmem:[%s3205_s15 + $0x18] sm:$0xff]  ;;  %v400_v32 = vld [vmem:[%s3205_s15 + $0x20] sm:$0xff] }
  0x30   : > { %3015 = vmatpush3.bf16.msra.mxu1 %v2939_v20  ;;  %v2951_v31 = vpack.c.bf16 %v644_v29, %v643_v28  ;;  %v645_v33 = vld [vmem:[%s5066_s4 + $0x40] sm:$0xff]  ;;  %v646_v34 = vld [vmem:[%s5066_s4 + $0x48] sm:$0xff]  ;;  %v402_v37 = vld [vmem:[%s3205_s15 + $0x30] sm:$0xff] }
  0x31   : > { %2930 = vmatpush3.bf16.msra.mxu0 %v2927_v9  ;;  %3008 = vmatprep.subr.bf16.mxu1 %v2943_v22  ;;  %v401_v35 = vld [vmem:[%s3205_s15 + $0x28] sm:$0xff]  ;;  %v2955_v36 = vpack.c.bf16 %v646_v34, %v645_v33  ;;  %v647_v38 = vld [vmem:[%s5066_s4 + $0x50] sm:$0xff]  ;;  %v648_v39 = vld [vmem:[%s5066_s4 + $0x58] sm:$0xff] }
  0x32   : > { %2932 = vmatprep.subr.bf16.mxu0 %v2931_v13  ;;  %v403_v40 = vld [vmem:[%s3205_s15 + $0x38] sm:$0xff]  ;;  %v2959_v41 = vpack.c.bf16 %v648_v39, %v647_v38  ;;  %v404_v42 = vld [vmem:[%s3205_s15 + $0x40] sm:$0xff]  ;;  %v650_v44 = vld [vmem:[%s5066_s4 + $0x68] sm:$0xff] }
  0x33   : > { %v649_v43 = vld [vmem:[%s5066_s4 + $0x60] sm:$0xff]  ;;  %v405_v45 = vld [vmem:[%s3205_s15 + $0x48] sm:$0xff]  ;;  %v406_v47 = vld [vmem:[%s3205_s15 + $0x50] sm:$0xff] }
  0x34   : > { %3016 = vmatpush3.bf16.msra.mxu1 %v2943_v22  ;;  %v2963_v46 = vpack.c.bf16 %v650_v44, %v649_v43  ;;  %v407_v48 = vld [vmem:[%s3205_s15 + $0x58] sm:$0xff]  ;;  %v408_v49 = vld [vmem:[%s3205_s15 + $0x60] sm:$0xff]  ;;  %v409_v50 = vld [vmem:[%s3205_s15 + $0x68] sm:$0xff] }
  0x35   : > { %2934 = vmatpush3.bf16.msra.mxu0 %v2931_v13  ;;  %3009 = vmatprep.subr.bf16.mxu1 %v2947_v25  ;;  %v410_v51 = vld [vmem:[%s3205_s15 + $0x70] sm:$0xff]  ;;  %v411_v52 = vld [vmem:[%s3205_s15 + $0x78] sm:$0xff]  ;;  %v2358_v56 = vld [vmem:[%s5065_s3] ss:$0 sm:$0xff] }
  0x36   : > { %2936 = vmatprep.subr.bf16.mxu0 %v2935_v19  ;;  %v651_v53 = vld [vmem:[%s5066_s4 + $0x70] sm:$0xff]  ;;  %v652_v54 = vld [vmem:[%s5066_s4 + $0x78] sm:$0xff] }
  0x37   : > { %v2967_v55 = vpack.c.bf16 %v652_v54, %v651_v53 }
  0x38   : > { %3017 = vmatpush3.bf16.msra.mxu1 %v2947_v25 }
  0x39   : > { %2938 = vmatpush3.bf16.msra.mxu0 %v2935_v19  ;;  %3010 = vmatprep.subr.bf16.mxu1 %v2951_v31 }
  0x3a   : > { %2940 = vmatprep.subr.bf16.mxu0 %v2939_v20 }
  0x3c   : > { %2790 = vmatmul.mubr.msk.f32.vlgmr.msra.gmra.mrb[0].mxu0 %vm427_vm2, %v397_v26  ;;  %3018 = vmatpush3.bf16.msra.mxu1 %v2951_v31 }
  0x3d   : > { %2792 = vmatprep.mubr.msk.f32.mxu0 %vm427_vm2, %v398_v27  ;;  %2942 = vmatpush3.bf16.msra.mxu0 %v2939_v20 }
  0x3e   : > { %2944 = vmatprep.subr.bf16.mxu0 %v2943_v22  ;;  %3011 = vmatprep.subr.bf16.mxu1 %v2955_v36 }
  0x40   : > { %2793 = vmatmul.mubr.msk.f32.gmra.mrb[2].mxu0 %vm427_vm2, %v399_v30  ;;  %3019 = vmatpush3.bf16.msra.mxu1 %v2955_v36 }
  0x41   : > { %2795 = vmatprep.mubr.msk.f32.mxu0 %vm427_vm2, %v400_v32  ;;  %2946 = vmatpush3.bf16.msra.mxu0 %v2943_v22 }
  0x42   : > { %2948 = vmatprep.subr.bf16.mxu0 %v2947_v25  ;;  %3012 = vmatprep.subr.bf16.mxu1 %v2959_v41 }
  0x44   : > { %2796 = vmatmul.mubr.msk.f32.gmra.mrb[4].mxu0 %vm427_vm2, %v401_v35  ;;  %3020 = vmatpush3.bf16.msra.mxu1 %v2959_v41 }
  0x45   : > { %2798 = vmatprep.mubr.msk.f32.mxu0 %vm427_vm2, %v402_v37  ;;  %2950 = vmatpush3.bf16.msra.mxu0 %v2947_v25 }
  0x46   : > { %2952 = vmatprep.subr.bf16.mxu0 %v2951_v31  ;;  %3013 = vmatprep.subr.bf16.mxu1 %v2963_v46 }
  0x48   : > { %2799 = vmatmul.mubr.msk.f32.gmra.mrb[6].mxu0 %vm427_vm2, %v403_v40  ;;  %3021 = vmatpush3.bf16.msra.mxu1 %v2963_v46 }
  0x49   : > { %2801 = vmatprep.mubr.msk.f32.mxu0 %vm427_vm2, %v404_v42  ;;  %2954 = vmatpush3.bf16.msra.mxu0 %v2951_v31 }
  0x4a   : > { %2956 = vmatprep.subr.bf16.mxu0 %v2955_v36  ;;  %3014 = vmatprep.subr.bf16.mxu1 %v2967_v55 }
  0x4c   : > { %2802 = vmatmul.mubr.msk.f32.gmra.mrb[8].mxu0 %vm427_vm2, %v405_v45  ;;  %3022 = vmatpush3.bf16.msra.mxu1 %v2967_v55 }
  0x4d   : > { %2804 = vmatprep.mubr.msk.f32.mxu0 %vm427_vm2, %v406_v47  ;;  %2958 = vmatpush3.bf16.msra.mxu0 %v2955_v36 }
  0x4e   : > { %2960 = vmatprep.subr.bf16.mxu0 %v2959_v41 }
  0x50   : > { %2805 = vmatmul.mubr.msk.f32.gmra.mrb[10].mxu0 %vm427_vm2, %v407_v48 }
  0x51   : > { %2807 = vmatprep.mubr.msk.f32.mxu0 %vm427_vm2, %v408_v49  ;;  %2962 = vmatpush3.bf16.msra.mxu0 %v2959_v41 }
  0x52   : > { %2964 = vmatprep.subr.bf16.mxu0 %v2963_v46 }
  0x54   : > { %2808 = vmatmul.mubr.msk.f32.gmra.mrb[12].mxu0 %vm427_vm2, %v409_v50 }
  0x55   : > { %2810 = vmatprep.mubr.msk.f32.mxu0 %vm427_vm2, %v410_v51  ;;  %2966 = vmatpush3.bf16.msra.mxu0 %v2963_v46 }
  0x56   : > { %2968 = vmatprep.subr.bf16.mxu0 %v2967_v55 }
  0x58   : > { %2811 = vmatmul.mubr.msk.f32.gmra.mrb[14].mxu0 %vm427_vm2, %v411_v52 }
  0x59   : > { %2970 = vmatpush3.bf16.msra.mxu0 %v2967_v55 }
 0x10f   : > { %v2791_v57 = vpop.f32.mrb[0].mxu0 }
 0x110   : > { %v548_v58 = vadd.f32 %v2791_v57, %v2358_v56  ;;  %v542_v59 = vpop.f32.mrb[1].mxu0  ;;  %v819_v57 = vld [vmem:[%s5064_s2] sm:$0xff] (!%p2375_p10) }
 0x111   : > { %v543_v60 = vadd.f32 %v2358_v56, %v542_v59  ;;  %v821_v59 = vld [vmem:[%s5064_s2 + $0x10] sm:$0xff] (!%p2375_p10) }
 0x112   : > { %v622_v63 = vmax.f32 %v548_v58, 0.0  ;;  %v820_v58 = vld [vmem:[%s5064_s2 + $0x8] sm:$0xff] (!%p2375_p10) }
 0x113   : > { %v621_v61 = vmax.f32 %v543_v60, 0.0  ;;  %v2794_v62 = vpop.f32.mrb[2].mxu0  ;;  %v3125_v60 = vmov (!%p2375_p10), 0.0|0.0  }
 0x114   : > { %v558_v0 = vadd.f32 %v2794_v62, %v2358_v56  ;;  %v552_v1 = vpop.f32.mrb[3].mxu0  ;;  %2971 = vmatprep.subr.bf16.mxu0 (!%p2375_p10), %v3125_v60  ;;  %v822_v62 = vld [vmem:[%s5064_s2 + $0x18] sm:$0xff] (!%p2375_p10)  ;;  %2983 = vmatprep.subr.bf16.mxu1 (!%p2375_p10), %v3125_v60 }
 0x115   : > { %v553_v2 = vadd.f32 %v2358_v56, %v552_v1  ;;  %2845 = vmatprep.mubr.f32.mxu0 %v621_v61  ;;  %v2972_v61 = vpack.c.bf16 (!%p2375_p10), %v820_v58, %v819_v57  ;;  %v908_v1 = vld [vmem:[%s5066_s4] sm:$0xff] (!%p2375_p10) }
 0x116   : > { %2846 = vmatmul.mubr.f32.vlgmr.msra.gmra.mrb[16].mxu0 %v622_v63  ;;  %v624_v5 = vmax.f32 %v558_v0, 0.0  ;;  %v3127_v63 = vmov (!%p2375_p10), 0.0   ;;  %v2975_v0 = vpack.c.bf16 (!%p2375_p10), %v822_v62, %v821_v59 }
 0x117   : > { %v623_v3 = vmax.f32 %v553_v2, 0.0  ;;  %v2797_v4 = vpop.f32.mrb[4].mxu0  ;;  %2973 = vmatpush3.bf16.msra.mxu0 (!%p2375_p10), %v2972_v61  ;;  %v909_v2 = vld [vmem:[%s5066_s4 + $0x8] sm:$0xff] (!%p2375_p10) }
 0x118   : > { %v568_v6 = vadd.f32 %v2797_v4, %v2358_v56  ;;  %v562_v7 = vpop.f32.mrb[5].mxu0  ;;  %2974 = vmatprep.subr.bf16.mxu0 (!%p2375_p10), %v3125_v60  ;;  %v823_v4 = vld [vmem:[%s5064_s2 + $0x20] sm:$0xff] (!%p2375_p10) }
 0x119   : > { %2848 = vmatprep.mubr.f32.mxu0 %v623_v3  ;;  %v563_v8 = vadd.f32 %v2358_v56, %v562_v7  ;;  %v910_v3 = vld [vmem:[%s5066_s4 + $0x10] sm:$0xff] (!%p2375_p10)  ;;  %v911_v7 = vld [vmem:[%s5066_s4 + $0x18] sm:$0xff] (!%p2375_p10) }
 0x11a   : > { %2849 = vmatmul.mubr.f32.gmra.mrb[18].mxu0 %v624_v5  ;;  %v626_v11 = vmax.f32 %v568_v6, 0.0  ;;  %v824_v5 = vld [vmem:[%s5064_s2 + $0x28] sm:$0xff] (!%p2375_p10)  ;;  %v2984_v6 = vpack.c.bf16 (!%p2375_p10), %v909_v2, %v908_v1 }
 0x11b   : > { %v2800_v9 = vpop.f32.mrb[6].mxu0  ;;  %v625_v10 = vmax.f32 %v563_v8, 0.0  ;;  %2885 = vmatprep.mubr.msk.f32.mxu0 (!%p2375_p10), %vm3126_vm3, %v3127_v63  ;;  %v2987_v8 = vpack.c.bf16 (!%p2375_p10), %v911_v7, %v910_v3  ;;  %2976 = vmatpush3.bf16.msra.mxu0 (!%p2375_p10), %v2975_v0 }
 0x11c   : > { %v578_v12 = vadd.f32 %v2800_v9, %v2358_v56  ;;  %v572_v13 = vpop.f32.mrb[7].mxu0  ;;  %v2978_v9 = vpack.c.bf16 (!%p2375_p10), %v824_v5, %v823_v4  ;;  %2977 = vmatprep.subr.bf16.mxu0 (!%p2375_p10), %v3125_v60 }
 0x11d   : > { %v573_v14 = vadd.f32 %v2358_v56, %v572_v13  ;;  %2851 = vmatprep.mubr.f32.mxu1 %v625_v10  ;;  %v912_v10 = vld [vmem:[%s5066_s4 + $0x20] sm:$0xff] (!%p2375_p10)  ;;  %v826_v13 = vld [vmem:[%s5064_s2 + $0x38] sm:$0xff] (!%p2375_p10) }
 0x11e   : > { %2852 = vmatmul.mubr.f32.vlgmr.msra.gmra.mrb[0].mxu1 %v626_v11  ;;  %v628_v17 = vmax.f32 %v578_v12, 0.0  ;;  %v913_v11 = vld [vmem:[%s5066_s4 + $0x28] sm:$0xff] (!%p2375_p10)  ;;  %v825_v12 = vld [vmem:[%s5064_s2 + $0x30] sm:$0xff] (!%p2375_p10) }
 0x11f   : > { %v627_v15 = vmax.f32 %v573_v14, 0.0  ;;  %v2803_v16 = vpop.f32.mrb[8].mxu0  ;;  %2985 = vmatpush3.bf16.msra.mxu1 (!%p2375_p10), %v2984_v6  ;;  %v2990_v14 = vpack.c.bf16 (!%p2375_p10), %v913_v11, %v912_v10  ;;  %2979 = vmatpush3.bf16.msra.mxu0 (!%p2375_p10), %v2978_v9 }
 0x120   : > { %v588_v18 = vadd.f32 %v2803_v16, %v2358_v56  ;;  %v582_v19 = vpop.f32.mrb[9].mxu0  ;;  %2986 = vmatprep.subr.bf16.mxu1 (!%p2375_p10), %v3125_v60  ;;  %v914_v16 = vld [vmem:[%s5066_s4 + $0x30] sm:$0xff] (!%p2375_p10)  ;;  %2980 = vmatprep.subr.bf16.mxu0 (!%p2375_p10), %v3125_v60 }
 0x121   : > { %v583_v20 = vadd.f32 %v2358_v56, %v582_v19  ;;  %2854 = vmatprep.mubr.f32.mxu1 %v627_v15  ;;  %v2981_v15 = vpack.c.bf16 (!%p2375_p10), %v826_v13, %v825_v12  ;;  %v818_v19 = vld [vmem:[%s3215_s23] sm:$0xff] (!%p2375_p10) }
 0x122   : > { %2855 = vmatmul.mubr.f32.gmra.mrb[2].mxu1 %v628_v17  ;;  %v630_v23 = vmax.f32 %v588_v18, 0.0  ;;  %v915_v17 = vld [vmem:[%s5066_s4 + $0x38] sm:$0xff] (!%p2375_p10) }
 0x123   : > { %v629_v21 = vmax.f32 %v583_v20, 0.0  ;;  %v2806_v22 = vpop.f32.mrb[10].mxu0  ;;  %2988 = vmatpush3.bf16.msra.mxu1 (!%p2375_p10), %v2987_v8  ;;  %v2993_v18 = vpack.c.bf16 (!%p2375_p10), %v915_v17, %v914_v16  ;;  %2982 = vmatpush3.bf16.msra.mxu0 (!%p2375_p10), %v2981_v15  ;;  %v916_v20 = vld [vmem:[%s5066_s4 + $0x40] sm:$0xff] (!%p2375_p10) }
 0x124   : > { %v598_v24 = vadd.f32 %v2806_v22, %v2358_v56  ;;  %v592_v25 = vpop.f32.mrb[11].mxu0  ;;  %2989 = vmatprep.subr.bf16.mxu1 (!%p2375_p10), %v3125_v60 }
 0x125   : > { %v593_v26 = vadd.f32 %v2358_v56, %v592_v25  ;;  %2857 = vmatprep.mubr.f32.mxu1 %v629_v21  ;;  %v917_v21 = vld [vmem:[%s5066_s4 + $0x48] sm:$0xff] (!%p2375_p10) }
 0x126   : > { %2858 = vmatmul.mubr.f32.gmra.mrb[4].mxu1 %v630_v23  ;;  %v632_v29 = vmax.f32 %v598_v24, 0.0  ;;  %2886 = vmatmul.mubr.msk.f32.vlgmr.msra.gmra.mrb[0].mxu0 (!%p2375_p10), %vm427_vm2, %v818_v19  ;;  %v2996_v22 = vpack.c.bf16 (!%p2375_p10), %v917_v21, %v916_v20  ;;  %v918_v23 = vld [vmem:[%s5066_s4 + $0x50] sm:$0xff] (!%p2375_p10)  ;;  %v919_v24 = vld [vmem:[%s5066_s4 + $0x58] sm:$0xff] (!%p2375_p10) }
 0x127   : > { %v631_v27 = vmax.f32 %v593_v26, 0.0  ;;  %v2809_v28 = vpop.f32.mrb[12].mxu0  ;;  %2991 = vmatpush3.bf16.msra.mxu1 (!%p2375_p10), %v2990_v14  ;;  %v2999_v25 = vpack.c.bf16 (!%p2375_p10), %v919_v24, %v918_v23  ;;  %v920_v26 = vld [vmem:[%s5066_s4 + $0x60] sm:$0xff] (!%p2375_p10) }
 0x128   : > { %v608_v30 = vadd.f32 %v2809_v28, %v2358_v56  ;;  %v602_v31 = vpop.f32.mrb[13].mxu0  ;;  %2992 = vmatprep.subr.bf16.mxu1 (!%p2375_p10), %v3125_v60 }
 0x129   : > { %v603_v32 = vadd.f32 %v2358_v56, %v602_v31  ;;  %2860 = vmatprep.mubr.f32.mxu1 %v631_v27  ;;  %v921_v27 = vld [vmem:[%s5066_s4 + $0x68] sm:$0xff] (!%p2375_p10) }
 0x12a   : > { %2861 = vmatmul.mubr.f32.gmra.mrb[6].mxu1 %v632_v29  ;;  %v634_v35 = vmax.f32 %v608_v30, 0.0  ;;  %v3002_v28 = vpack.c.bf16 (!%p2375_p10), %v921_v27, %v920_v26  ;;  %v922_v29 = vld [vmem:[%s5066_s4 + $0x70] sm:$0xff] (!%p2375_p10)  ;;  %v923_v30 = vld [vmem:[%s5066_s4 + $0x78] sm:$0xff] (!%p2375_p10) }
 0x12b   : > { %v633_v33 = vmax.f32 %v603_v32, 0.0  ;;  %v2812_v34 = vpop.f32.mrb[14].mxu0  ;;  %2994 = vmatpush3.bf16.msra.mxu1 (!%p2375_p10), %v2993_v18  ;;  %v3005_v31 = vpack.c.bf16 (!%p2375_p10), %v923_v30, %v922_v29  ;;  %v2376_v32 = vld [vmem:[%s5065_s3] ss:$0 sm:$0xff] (!%p2375_p10) }
 0x12c   : > { %v618_v36 = vadd.f32 %v2812_v34, %v2358_v56  ;;  %v612_v37 = vpop.f32.mrb[15].mxu0  ;;  %2995 = vmatprep.subr.bf16.mxu1 (!%p2375_p10), %v3125_v60 }
 0x12d   : > { %v613_v38 = vadd.f32 %v2358_v56, %v612_v37  ;;  %2863 = vmatprep.mubr.f32.mxu1 %v633_v33 }
 0x12e   : > { %2864 = vmatmul.mubr.f32.gmra.mrb[8].mxu1 %v634_v35  ;;  %v636_v40 = vmax.f32 %v618_v36, 0.0 }
 0x12f   : > { %v635_v39 = vmax.f32 %v613_v38, 0.0  ;;  %2997 = vmatpush3.bf16.msra.mxu1 (!%p2375_p10), %v2996_v22 }
 0x130   : > { %2998 = vmatprep.subr.bf16.mxu1 (!%p2375_p10), %v3125_v60 }
 0x131   : > { %2866 = vmatprep.mubr.f32.mxu1 %v635_v39 }
 0x132   : > { %2867 = vmatmul.mubr.f32.gmra.mrb[10].mxu1 %v636_v40 }
 0x133   : > { %2920 = vmatprep.mubr.msk.f32.mxu1 (!%p2375_p10), %vm3126_vm3, %v3127_v63  ;;  %3000 = vmatpush3.bf16.msra.mxu1 (!%p2375_p10), %v2999_v25 }
 0x134   : > { %3001 = vmatprep.subr.bf16.mxu1 (!%p2375_p10), %v3125_v60 }
 0x137   : > { %3003 = vmatpush3.bf16.msra.mxu1 (!%p2375_p10), %v3002_v28 }
 0x138   : > { %3004 = vmatprep.subr.bf16.mxu1 (!%p2375_p10), %v3125_v60 }
 0x13b   : > { %3006 = vmatpush3.bf16.msra.mxu1 (!%p2375_p10), %v3005_v31 }
 0x1e9   : > { %v2847_v41 = vpop.f32.mrb[16].mxu0 }
 0x1ea   : > { %799 = vst.msk [vmem:[#allocation2 + $0x20] sm:$0xff] %vm427_vm2, %v2847_v41  ;;  %v719_v42 = vpop.f32.mrb[17].mxu0 }
 0x1eb   : > { %798 = vst.msk [vmem:[#allocation2 + $0x18] sm:$0xff] %vm427_vm2, %v719_v42 }
 0x1ed   : > { %v2850_v43 = vpop.f32.mrb[18].mxu0 }
 0x1ee   : > { %801 = vst.msk [vmem:[#allocation2 + $0x30] sm:$0xff] %vm427_vm2, %v2850_v43  ;;  %v729_v44 = vpop.f32.mrb[19].mxu0 }
 0x1ef   : > { %800 = vst.msk [vmem:[#allocation2 + $0x28] sm:$0xff] %vm427_vm2, %v729_v44 }
 0x1f1   : > { %v2853_v45 = vpop.f32.mrb[0].mxu1 }
 0x1f2   : > { %803 = vst.msk [vmem:[#allocation2 + $0x40] sm:$0xff] %vm427_vm2, %v2853_v45  ;;  %v739_v46 = vpop.f32.mrb[1].mxu1 }
 0x1f3   : > { %802 = vst.msk [vmem:[#allocation2 + $0x38] sm:$0xff] %vm427_vm2, %v739_v46 }
 0x1f5   : > { %v2856_v47 = vpop.f32.mrb[2].mxu1 }
 0x1f6   : > { %805 = vst.msk [vmem:[#allocation2 + $0x50] sm:$0xff] %vm427_vm2, %v2856_v47  ;;  %v749_v48 = vpop.f32.mrb[3].mxu1 }
 0x1f7   : > { %804 = vst.msk [vmem:[#allocation2 + $0x48] sm:$0xff] %vm427_vm2, %v749_v48 }
 0x1f9   : > { %v2859_v49 = vpop.f32.mrb[4].mxu1  ;;  %v903_v33 = vpop.f32.mrb[0].mxu0 (!%p2375_p10) }
 0x1fa   : > { %807 = vst.msk [vmem:[#allocation2 + $0x60] sm:$0xff] %vm427_vm2, %v2859_v49  ;;  %v759_v50 = vpop.f32.mrb[5].mxu1  ;;  %v904_v34 = vadd.f32 (!%p2375_p10), %v2376_v32, %v903_v33  ;;  %v2887_v35 = vpop.f32.mrb[1].mxu0 (!%p2375_p10) }
 0x1fb   : > { %806 = vst.msk [vmem:[#allocation2 + $0x58] sm:$0xff] %vm427_vm2, %v759_v50 }
 0x1fc   : > { %v907_v36 = vmax.f32 (!%p2375_p10), %v904_v34, 0.0 }
 0x1fd   : > { %v2862_v51 = vpop.f32.mrb[6].mxu1 }
 0x1fe   : > { %809 = vst.msk [vmem:[#allocation2 + $0x70] sm:$0xff] %vm427_vm2, %v2862_v51  ;;  %v769_v52 = vpop.f32.mrb[7].mxu1  ;;  %2921 = vmatmul.mubr.f32.vlgmr.msra.gmra.mrb[0].mxu1 (!%p2375_p10), %v907_v36 }
 0x1ff   : > { %808 = vst.msk [vmem:[#allocation2 + $0x68] sm:$0xff] %vm427_vm2, %v769_v52 }
 0x201   : > { %v2865_v53 = vpop.f32.mrb[8].mxu1  ;;  %817 = sbr.rel (%p2375_p10) target bundleno = 723 (0x2d3), region = 60 }
 0x202   : > { %811 = vst.msk [vmem:[#allocation2 + $0x80] sm:$0xff] %vm427_vm2, %v2865_v53  ;;  %v779_v54 = vpop.f32.mrb[9].mxu1 }
 0x203   : > { %810 = vst.msk [vmem:[#allocation2 + $0x78] sm:$0xff] %vm427_vm2, %v779_v54 }
 0x205   : > { %v2868_v55 = vpop.f32.mrb[10].mxu1 }
 0x206   : > { %813 = vst.msk [vmem:[#allocation2 + $0x90] sm:$0xff] %vm427_vm2, %v2868_v55  ;;  %v789_v56 = vpop.f32.mrb[11].mxu1 }
 0x207   : > { %812 = vst.msk [vmem:[#allocation2 + $0x88] sm:$0xff] %vm427_vm2, %v789_v56 }
 0x2d1   : > { %v990_v37 = vpop.f32.mrb[0].mxu1 }
 0x2d2   : > { %994 = vst.msk [vmem:[#allocation2 + $0x98] sm:$0xff] %vm427_vm2, %v990_v37  ;;  %v2922_v38 = vpop.f32.mrb[1].mxu1 }
 0x2d3 PF: > { %p2378_p11 = scmp.ne.s32.totalorder %s3106_s24, 1 }
 0x2d4   : > { %v3128_v39 = vmov (!%p2378_p11), 0.0  }
 0x2d5   : > { %998 = sbr.rel (%p2378_p11) target bundleno = 732 (0x2dc), region = 64  ;;  %999 = vst.msk [vmem:[#allocation2 + $0x98] sm:$0xff] (!%p2378_p11), %vm427_vm2, %v3128_v39 }
 0x2dc PF: > { %v1000_v40 = vld [vmem:[%s3205_s15] sm:$0xff]  ;;  %v1001_v41 = vld [vmem:[%s3205_s15 + $0x8] sm:$0xff]  ;;  %v3425_v42 = vld [vmem:[#allocation2 + $0x18] sm:$0xff] }
 0x2dd   : > { %v3427_v43 = vld [vmem:[#allocation2 + $0x20] sm:$0xff]  ;;  %v1002_v44 = vld [vmem:[%s3205_s15 + $0x10] sm:$0xff]  ;;  %v1003_v45 = vld [vmem:[%s3205_s15 + $0x18] sm:$0xff]  ;;  %v1016_v6 = vadd.f32 %v3425_v42, %v1000_v40 }
 0x2de   : > { %v1004_v46 = vld [vmem:[%s3205_s15 + $0x20] sm:$0xff]  ;;  %v3432_v47 = vld [vmem:[#allocation2 + $0x28] sm:$0xff]  ;;  %v3434_v48 = vld [vmem:[#allocation2 + $0x30] sm:$0xff]  ;;  %v1017_v7 = vadd.f32 %v3427_v43, %v1001_v41 }
 0x2df   : > { %v3436_v49 = vld [vmem:[#allocation2 + $0x38] sm:$0xff]  ;;  %v1024_v50 = vld [vmem:[#allocation2 + $0x5] sm:$0xff]  ;;  %v3438_v51 = vld [vmem:[#allocation2 + $0xd] sm:$0xff]  ;;  %v1018_v13 = vadd.f32 %v3432_v47, %v1002_v44  ;;  %v1019_v14 = vadd.f32 %v3434_v48, %v1003_v45 }
 0x2e0   : > { %v3440_v52 = vld [vmem:[#allocation2 + $0x15] sm:$0xff]  ;;  %v1005_v53 = vld [vmem:[%s3205_s15 + $0x28] sm:$0xff]  ;;  %v3443_v54 = vld [vmem:[#allocation2 + $0x40] sm:$0xff]  ;;  %v1020_v15 = vadd.f32 %v3436_v49, %v1004_v46 }
 0x2e1   : > { %5133 = vst [vmem:[#allocation3_spill] sm:$0xff] %v3443_v54  ;;  %v3445_v55 = vld [vmem:[#allocation2 + $0x1d] sm:$0xff]  ;;  %v3447_v56 = vld [vmem:[#allocation2 + $0x25] sm:$0xff]  ;;  %v3449_v57 = vld [vmem:[#allocation2 + $0x2d] sm:$0xff]  ;;  %v1021_v20 = vadd.f32 %v3443_v54, %v1005_v53 }
 0x2e2   : > { %v1006_v58 = vld [vmem:[%s3205_s15 + $0x30] sm:$0xff]  ;;  %v3452_v59 = vld [vmem:[#allocation2 + $0x48] sm:$0xff]  ;;  %v1032_v61 = vld [vmem:[%s5067_s5] sm:$0xff] }
 0x2e3   : > { %5134 = vst [vmem:[#allocation4_spill] sm:$0xff] %v3452_v59  ;;  %v3454_v60 = vld [vmem:[#allocation2 + $0x35] sm:$0xff]  ;;  %v1033_v62 = vld [vmem:[%s5067_s5 + $0x8] sm:$0xff]  ;;  %v3466_v2 = vld [vmem:[#allocation2 + $0x3d] sm:$0xff]  ;;  %v1040_v10 = vmul.f32 %v1032_v61, %v1024_v50  ;;  %v1022_v27 = vadd.f32 %v3452_v59, %v1006_v58 }
 0x2e4   : > { %5135 = vst [vmem:[#allocation5_spill] sm:$0xff] %v3454_v60  ;;  %v1034_v63 = vld [vmem:[%s5067_s5 + $0x10] sm:$0xff]  ;;  %v1007_v0 = vld [vmem:[%s3205_s15 + $0x38] sm:$0xff]  ;;  %5136 = vst [vmem:[#allocation6_spill] sm:$0xff] %v3466_v2  ;;  %v1041_v11 = vmul.f32 %v1033_v62, %v3438_v51 }
 0x2e5   : > { %v1015_v1 = vld [vmem:[#allocation2 + $0x50] sm:$0xff]  ;;  %v1035_v3 = vld [vmem:[%s5067_s5 + $0x18] sm:$0xff]  ;;  %v1036_v4 = vld [vmem:[%s5067_s5 + $0x20] sm:$0xff]  ;;  %v1042_v16 = vmul.f32 %v1034_v63, %v3440_v52  ;;  %v1048_v34 = vadd.f32 %v1040_v10, %v1016_v6 }
 0x2e6   : > { %v1037_v5 = vld [vmem:[%s5067_s5 + $0x28] sm:$0xff]  ;;  %v1038_v8 = vld [vmem:[%s5067_s5 + $0x30] sm:$0xff]  ;;  %v1039_v9 = vld [vmem:[%s5067_s5 + $0x38] sm:$0xff]  ;;  %v1043_v21 = vmul.f32 %v1035_v3, %v3445_v55  ;;  %v1044_v22 = vmul.f32 %v1036_v4, %v3447_v56  ;;  %v1023_v32 = vadd.f32 %v1015_v1, %v1007_v0  ;;  %v1049_v35 = vadd.f32 %v1041_v11, %v1017_v7 }
 0x2e7   : > { %v1056_v12 = vld [vmem:[#allocation2 + $0x6] sm:$0xff]  ;;  %v3490_v17 = vld [vmem:[#allocation2 + $0xe] sm:$0xff]  ;;  %v3492_v18 = vld [vmem:[#allocation2 + $0x16] sm:$0xff]  ;;  %v1045_v23 = vmul.f32 %v1037_v5, %v3449_v57  ;;  %v1046_v28 = vmul.f32 %v1038_v8, %v3454_v60  ;;  %v1047_v33 = vmul.f32 %v1039_v9, %v3466_v2  ;;  %v1050_v39 = vadd.f32 %v1042_v16, %v1018_v13 }
 0x2e8   : > { %v3494_v19 = vld [vmem:[#allocation2 + $0x1e] sm:$0xff]  ;;  %v3500_v24 = vld [vmem:[#allocation2 + $0x26] sm:$0xff]  ;;  %v3502_v25 = vld [vmem:[#allocation2 + $0x2e] sm:$0xff]  ;;  %v1051_v53 = vadd.f32 %v1043_v21, %v1019_v14  ;;  %v1052_v58 = vadd.f32 %v1044_v22, %v1020_v15 }
 0x2e9   : > { %v3504_v26 = vld [vmem:[#allocation2 + $0x36] sm:$0xff]  ;;  %v3508_v29 = vld [vmem:[#allocation2 + $0x3e] sm:$0xff]  ;;  %v2380_v31 = vld [vmem:[%s5067_s5 + $0x48] sm:$0xff]  ;;  %v1053_v61 = vadd.f32 %v1045_v23, %v1021_v20  ;;  %v1054_v3 = vadd.f32 %v1046_v28, %v1022_v27  ;;  %v1055_v10 = vadd.f32 %v1047_v33, %v1023_v32 }
 0x2ea   : > { %v2379_v30 = vld [vmem:[%s5067_s5 + $0x40] sm:$0xff]  ;;  %v2381_v36 = vld [vmem:[%s5067_s5 + $0x50] sm:$0xff]  ;;  %v2382_v37 = vld [vmem:[%s5067_s5 + $0x58] sm:$0xff]  ;;  %v1074_v46 = vmul.f32 %v2380_v31, %v3490_v17 }
 0x2eb   : > { %v2383_v38 = vld [vmem:[%s5067_s5 + $0x60] sm:$0xff]  ;;  %v2384_v40 = vld [vmem:[%s5067_s5 + $0x68] sm:$0xff]  ;;  %v2385_v41 = vld [vmem:[%s5067_s5 + $0x70] sm:$0xff]  ;;  %v1073_v45 = vmul.f32 %v2379_v30, %v1056_v12  ;;  %v1075_v50 = vmul.f32 %v2381_v36, %v3492_v18  ;;  %v1076_v62 = vmul.f32 %v2382_v37, %v3494_v19 }
 0x2ec   : > { %v2386_v44 = vld [vmem:[%s5067_s5 + $0x78] sm:$0xff]  ;;  %v1089_v63 = vld [vmem:[#allocation2 + $0x7] sm:$0xff]  ;;  %v3538_v0 = vld [vmem:[#allocation2 + $0xf] sm:$0xff]  ;;  %v1077_v4 = vmul.f32 %v2383_v38, %v3500_v24  ;;  %v1078_v5 = vmul.f32 %v2384_v40, %v3502_v25  ;;  %v1079_v6 = vmul.f32 %v2385_v41, %v3504_v26  ;;  %v1082_v16 = vadd.f32 %v1074_v46, %v1049_v35 }
 0x2ed   : > { %v3540_v1 = vld [vmem:[#allocation2 + $0x17] sm:$0xff]  ;;  %v3545_v7 = vld [vmem:[#allocation2 + $0x1f] sm:$0xff]  ;;  %v3547_v8 = vld [vmem:[#allocation2 + $0x27] sm:$0xff]  ;;  %v1080_v11 = vmul.f32 %v2386_v44, %v3508_v29  ;;  %v1081_v15 = vadd.f32 %v1073_v45, %v1048_v34  ;;  %v1083_v20 = vadd.f32 %v1075_v50, %v1050_v39  ;;  %v1084_v28 = vadd.f32 %v1076_v62, %v1051_v53 }
 0x2ee   : > { %v3549_v9 = vld [vmem:[#allocation2 + $0x2f] sm:$0xff]  ;;  %v3552_v12 = vld [vmem:[#allocation2 + $0x37] sm:$0xff]  ;;  %v3554_v13 = vld [vmem:[#allocation2 + $0x3f] sm:$0xff]  ;;  %v1085_v36 = vadd.f32 %v1077_v4, %v1052_v58  ;;  %v1086_v37 = vadd.f32 %v1078_v5, %v1053_v61  ;;  %v1087_v38 = vadd.f32 %v1079_v6, %v1054_v3 }
 0x2ef   : > { %v2387_v14 = vld [vmem:[%s5067_s5 + $0x80] sm:$0xff]  ;;  %v2388_v21 = vld [vmem:[%s5067_s5 + $0x88] sm:$0xff]  ;;  %v2389_v22 = vld [vmem:[%s5067_s5 + $0x90] sm:$0xff]  ;;  %v1088_v45 = vadd.f32 %v1080_v11, %v1055_v10 }
 0x2f0   : > { %v2390_v23 = vld [vmem:[%s5067_s5 + $0x98] sm:$0xff]  ;;  %v1106_v27 = vmul.f32 %v2387_v14, %v1089_v63  ;;  %v2391_v30 = vld [vmem:[%s5067_s5 + $0xa0] sm:$0xff]  ;;  %v2392_v31 = vld [vmem:[%s5067_s5 + $0xa8] sm:$0xff]  ;;  %v1107_v33 = vmul.f32 %v2388_v21, %v3538_v0  ;;  %v1108_v34 = vmul.f32 %v2389_v22, %v3540_v1 }
 0x2f1   : > { %v2393_v32 = vld [vmem:[%s5067_s5 + $0xb0] sm:$0xff]  ;;  %v1109_v35 = vmul.f32 %v2390_v23, %v3545_v7  ;;  %v2394_v39 = vld [vmem:[%s5067_s5 + $0xb8] sm:$0xff]  ;;  %v1110_v40 = vmul.f32 %v2391_v30, %v3547_v8  ;;  %v1122_v41 = vld [vmem:[#allocation2 + $0x8] sm:$0xff]  ;;  %v1111_v46 = vmul.f32 %v2392_v31, %v3549_v9 }
 0x2f2   : > { %v3584_v44 = vld [vmem:[#allocation2 + $0x10] sm:$0xff]  ;;  %v1112_v50 = vmul.f32 %v2393_v32, %v3552_v12  ;;  %v1113_v53 = vmul.f32 %v2394_v39, %v3554_v13  ;;  %v2395_v58 = vld [vmem:[%s5067_s5 + $0xc0] sm:$0xff]  ;;  %v2396_v61 = vld [vmem:[%s5067_s5 + $0xc8] sm:$0xff]  ;;  %v1114_v63 = vadd.f32 %v1106_v27, %v1081_v15  ;;  %v1115_v3 = vadd.f32 %v1107_v33, %v1082_v16 }
 0x2f3   : > { %v2397_v62 = vld [vmem:[%s5067_s5 + $0xd0] sm:$0xff]  ;;  %v1116_v4 = vadd.f32 %v1108_v34, %v1083_v20  ;;  %v2398_v5 = vld [vmem:[%s5067_s5 + $0xd8] sm:$0xff]  ;;  %v2399_v6 = vld [vmem:[%s5067_s5 + $0xe0] sm:$0xff]  ;;  %v1133_v11 = vmul.f32 %v2395_v58, %v1122_v41  ;;  %v1117_v14 = vadd.f32 %v1109_v35, %v1084_v28  ;;  %v1134_v20 = vmul.f32 %v2396_v61, %v3584_v44 }
 0x2f4   : > { %v2400_v10 = vld [vmem:[%s5067_s5 + $0xe8] sm:$0xff]  ;;  %v2401_v15 = vld [vmem:[%s5067_s5 + $0xf0] sm:$0xff]  ;;  %v2402_v16 = vld [vmem:[%s5067_s5 + $0xf8] sm:$0xff]  ;;  %v1135_v21 = vmul.f32 %v2397_v62, %v3425_v42  ;;  %v1136_v22 = vmul.f32 %v2398_v5, %v3427_v43  ;;  %v1118_v27 = vadd.f32 %v1110_v40, %v1085_v36  ;;  %v1137_v30 = vmul.f32 %v2399_v6, %v3432_v47 }
 0x2f5   : > { %v1149_v23 = vld [vmem:[#allocation2 + $0x9] sm:$0xff]  ;;  %v3617_v31 = vld [vmem:[#allocation2 + $0x11] sm:$0xff]  ;;  %v3619_v28 = vld [vmem:[#allocation2 + $0x19] sm:$0xff]  ;;  %v1119_v33 = vadd.f32 %v1111_v46, %v1086_v37  ;;  %v1120_v34 = vadd.f32 %v1112_v50, %v1087_v38  ;;  %v1121_v35 = vadd.f32 %v1113_v53, %v1088_v45  ;;  %v1138_v39 = vmul.f32 %v2400_v10, %v3434_v48 }
 0x2f6   : > { %5137 = vst [vmem:[#allocation7_spill] sm:$0xff] %v3617_v31  ;;  %v3621_v32 = vld [vmem:[#allocation2 + $0x21] sm:$0xff]  ;;  %v3624_v41 = vld [vmem:[#allocation2 + $0x29] sm:$0xff]  ;;  %v3626_v58 = vld [vmem:[#allocation2 + $0x31] sm:$0xff]  ;;  %v1139_v36 = vmul.f32 %v2401_v15, %v3436_v49  ;;  %v1140_v40 = vmul.f32 %v2402_v16, %v3443_v54  ;;  %v1141_v62 = vadd.f32 %v1133_v11, %v1114_v63  ;;  %v1142_v5 = vadd.f32 %v1134_v20, %v1115_v3 }
 0x2f7   : > { %5138 = vst [vmem:[#allocation8_spill] sm:$0xff] %v3624_v41  ;;  %5139 = vst [vmem:[#allocation9_spill] sm:$0xff] %v3626_v58  ;;  %v3628_v61 = vld [vmem:[#allocation2 + $0x39] sm:$0xff]  ;;  %v3632_v6 = vld [vmem:[#allocation2 + $0x41] sm:$0xff]  ;;  %v1143_v45 = vadd.f32 %v1135_v21, %v1116_v4  ;;  %v1144_v46 = vadd.f32 %v1136_v22, %v1117_v14  ;;  %v1145_v11 = vadd.f32 %v1137_v30, %v1118_v27 }
 0x2f8   : > { %5140 = vst [vmem:[#allocation10_spill] sm:$0xff] %v3628_v61  ;;  %5141 = vst [vmem:[#allocation11_spill] sm:$0xff] %v3632_v6  ;;  %v2403_v37 = vld [vmem:[%s5067_s5 + $0x100] sm:$0xff]  ;;  %v2404_v38 = vld [vmem:[%s5067_s5 + $0x108] sm:$0xff]  ;;  %v1146_v22 = vadd.f32 %v1138_v39, %v1119_v33 }
 0x2f9   : > { %v2405_v50 = vld [vmem:[%s5067_s5 + $0x110] sm:$0xff]  ;;  %v2406_v53 = vld [vmem:[%s5067_s5 + $0x118] sm:$0xff]  ;;  %v2407_v63 = vld [vmem:[%s5067_s5 + $0x120] sm:$0xff]  ;;  %v1166_v3 = vmul.f32 %v2403_v37, %v1149_v23  ;;  %v1167_v10 = vmul.f32 %v2404_v38, %v3617_v31  ;;  %v1147_v38 = vadd.f32 %v1139_v36, %v1120_v34 }
 0x2fa   : > { %v2408_v4 = vld [vmem:[%s5067_s5 + $0x128] sm:$0xff]  ;;  %v2409_v14 = vld [vmem:[%s5067_s5 + $0x130] sm:$0xff]  ;;  %v2410_v15 = vld [vmem:[%s5067_s5 + $0x138] sm:$0xff]  ;;  %v1168_v16 = vmul.f32 %v2405_v50, %v3619_v28  ;;  %v1169_v20 = vmul.f32 %v2406_v53, %v3621_v32  ;;  %v1170_v21 = vmul.f32 %v2407_v63, %v3624_v41  ;;  %v1148_v53 = vadd.f32 %v1140_v40, %v1121_v35 }
 0x2fb   : > { %v1171_v23 = vmul.f32 %v2408_v4, %v3626_v58  ;;  %v1182_v27 = vld [vmem:[#allocation2 + $0xa] sm:$0xff]  ;;  %v3663_v30 = vld [vmem:[#allocation2 + $0x12] sm:$0xff]  ;;  %v3665_v37 = vld [vmem:[#allocation2 + $0x1a] sm:$0xff]  ;;  %v1172_v31 = vmul.f32 %v2409_v14, %v3628_v61  ;;  %v1173_v63 = vmul.f32 %v2410_v15, %v3632_v6  ;;  %v1174_v33 = vadd.f32 %v1166_v3, %v1141_v62 }
 0x2fc   : > { %5142 = vst [vmem:[#allocation12_spill] sm:$0xff] %v3665_v37  ;;  %v3668_v59 = vld [vmem:[#allocation2 + $0x22] sm:$0xff]  ;;  %v3670_v54 = vld [vmem:[#allocation2 + $0x2a] sm:$0xff]  ;;  %v3672_v50 = vld [vmem:[#allocation2 + $0x32] sm:$0xff]  ;;  %v1175_v39 = vadd.f32 %v1167_v10, %v1142_v5  ;;  %v1176_v36 = vadd.f32 %v1168_v16, %v1143_v45  ;;  %v1177_v14 = vadd.f32 %v1169_v20, %v1144_v46  ;;  %v1178_v61 = vadd.f32 %v1170_v21, %v1145_v11 }
 0x2fd   : > { %5143 = vst [vmem:[#allocation13_spill] sm:$0xff] %v3668_v59  ;;  %5144 = vst [vmem:[#allocation14_spill] sm:$0xff] %v3672_v50  ;;  %v3675_v4 = vld [vmem:[#allocation2 + $0x3a] sm:$0xff]  ;;  %v3677_v58 = vld [vmem:[#allocation2 + $0x42] sm:$0xff]  ;;  %v1179_v5 = vadd.f32 %v1171_v23, %v1146_v22  ;;  %v1180_v16 = vadd.f32 %v1172_v31, %v1147_v38  ;;  %v1181_v6 = vadd.f32 %v1173_v63, %v1148_v53 }
 0x2fe   : > { %5145 = vst [vmem:[#allocation15_spill] sm:$0xff] %v3675_v4  ;;  %5146 = vst [vmem:[#allocation16_spill] sm:$0xff] %v3677_v58  ;;  %v2411_v34 = vld [vmem:[%s5067_s5 + $0x140] sm:$0xff]  ;;  %v2412_v41 = vld [vmem:[%s5067_s5 + $0x148] sm:$0xff] }
 0x2ff   : > { %v2413_v35 = vld [vmem:[%s5067_s5 + $0x150] sm:$0xff]  ;;  %v2414_v40 = vld [vmem:[%s5067_s5 + $0x158] sm:$0xff]  ;;  %v1199_v62 = vmul.f32 %v2411_v34, %v1182_v27  ;;  %v2415_v45 = vld [vmem:[%s5067_s5 + $0x160] sm:$0xff]  ;;  %v1200_v10 = vmul.f32 %v2412_v41, %v3663_v30 }
 0x300   : > { %v2416_v46 = vld [vmem:[%s5067_s5 + $0x168] sm:$0xff]  ;;  %v2417_v3 = vld [vmem:[%s5067_s5 + $0x170] sm:$0xff]  ;;  %v1201_v11 = vmul.f32 %v2413_v35, %v3665_v37  ;;  %v1202_v15 = vmul.f32 %v2414_v40, %v3668_v59  ;;  %v2418_v20 = vld [vmem:[%s5067_s5 + $0x178] sm:$0xff]  ;;  %v1203_v21 = vmul.f32 %v2415_v45, %v3670_v54 }
 0x301   : > { %v1204_v22 = vmul.f32 %v2416_v46, %v3672_v50  ;;  %v1205_v23 = vmul.f32 %v2417_v3, %v3675_v4  ;;  %v1215_v27 = vld [vmem:[#allocation2 + $0xb] sm:$0xff]  ;;  %v3709_v34 = vld [vmem:[#allocation2 + $0x13] sm:$0xff]  ;;  %v1206_v41 = vmul.f32 %v2418_v20, %v3677_v58  ;;  %v3712_v35 = vld [vmem:[#allocation2 + $0x1b] sm:$0xff]  ;;  %v1207_v38 = vadd.f32 %v1199_v62, %v1174_v33 }
 0x302   : > { %5147 = vst [vmem:[#allocation17_spill] sm:$0xff] %v3709_v34  ;;  %5148 = vst [vmem:[#allocation18_spill] sm:$0xff] %v3712_v35  ;;  %v3714_v40 = vld [vmem:[#allocation2 + $0x23] sm:$0xff]  ;;  %v3716_v31 = vld [vmem:[#allocation2 + $0x2b] sm:$0xff]  ;;  %v1208_v59 = vadd.f32 %v1200_v10, %v1175_v39  ;;  %v1209_v3 = vadd.f32 %v1201_v11, %v1176_v36  ;;  %v1210_v4 = vadd.f32 %v1202_v15, %v1177_v14 }
 0x303   : > { %5149 = vst [vmem:[#allocation19_spill] sm:$0xff] %v3716_v31  ;;  %v3718_v37 = vld [vmem:[#allocation2 + $0x33] sm:$0xff]  ;;  %v3720_v45 = vld [vmem:[#allocation2 + $0x3b] sm:$0xff]  ;;  %v3722_v46 = vld [vmem:[#allocation2 + $0x43] sm:$0xff]  ;;  %v1211_v50 = vadd.f32 %v1203_v21, %v1178_v61  ;;  %v1212_v53 = vadd.f32 %v1204_v22, %v1179_v5  ;;  %v1213_v39 = vadd.f32 %v1205_v23, %v1180_v16  ;;  %v1214_v11 = vadd.f32 %v1206_v41, %v1181_v6 }
 0x304   : > { %5150 = vst [vmem:[#allocation20_spill] sm:$0xff] %v3718_v37  ;;  %5151 = vst [vmem:[#allocation21_spill] sm:$0xff] %v3720_v45  ;;  %v2419_v63 = vld [vmem:[%s5067_s5 + $0x180] sm:$0xff]  ;;  %v2420_v20 = vld [vmem:[%s5067_s5 + $0x188] sm:$0xff] }
 0x305   : > { %v2421_v33 = vld [vmem:[%s5067_s5 + $0x190] sm:$0xff]  ;;  %v2422_v36 = vld [vmem:[%s5067_s5 + $0x198] sm:$0xff]  ;;  %v2423_v61 = vld [vmem:[%s5067_s5 + $0x1a0] sm:$0xff]  ;;  %v1232_v62 = vmul.f32 %v2419_v63, %v1215_v27  ;;  %v1233_v5 = vmul.f32 %v2420_v20, %v3709_v34 }
 0x306   : > { %v2424_v14 = vld [vmem:[%s5067_s5 + $0x1a8] sm:$0xff]  ;;  %v1234_v10 = vmul.f32 %v2421_v33, %v3712_v35  ;;  %v2425_v15 = vld [vmem:[%s5067_s5 + $0x1b0] sm:$0xff]  ;;  %v2426_v16 = vld [vmem:[%s5067_s5 + $0x1b8] sm:$0xff]  ;;  %v1235_v21 = vmul.f32 %v2422_v36, %v3714_v40  ;;  %v1236_v22 = vmul.f32 %v2423_v61, %v3716_v31 }
 0x307   : > { %v1237_v23 = vmul.f32 %v2424_v14, %v3718_v37  ;;  %v1248_v27 = vld [vmem:[#allocation2 + $0xc] sm:$0xff]  ;;  %v1238_v63 = vmul.f32 %v2425_v15, %v3720_v45  ;;  %v1239_v20 = vmul.f32 %v2426_v16, %v3722_v46  ;;  %v3755_v6 = vld [vmem:[#allocation2 + $0x14] sm:$0xff]  ;;  %v3757_v41 = vld [vmem:[#allocation2 + $0x1c] sm:$0xff]  ;;  %v1240_v35 = vadd.f32 %v1232_v62, %v1207_v38 }
 0x308   : > { %5152 = vst [vmem:[#allocation22_spill] sm:$0xff] %v3755_v6  ;;  %5153 = vst [vmem:[#allocation23_spill] sm:$0xff] %v3757_v41  ;;  %v3759_v33 = vld [vmem:[#allocation2 + $0x24] sm:$0xff]  ;;  %v1241_v34 = vadd.f32 %v1233_v5, %v1208_v59  ;;  %v3761_v58 = vld [vmem:[#allocation2 + $0x2c] sm:$0xff]  ;;  %v1242_v14 = vadd.f32 %v1234_v10, %v1209_v3  ;;  %v1243_v37 = vadd.f32 %v1235_v21, %v1210_v4 }
 0x309   : > { %5154 = vst [vmem:[#allocation24_spill] sm:$0xff] %v3759_v33  ;;  %v3763_v36 = vld [vmem:[#allocation2 + $0x34] sm:$0xff]  ;;  %v3765_v61 = vld [vmem:[#allocation2 + $0x3c] sm:$0xff]  ;;  %v1244_v31 = vadd.f32 %v1236_v22, %v1211_v50  ;;  %v1245_v15 = vadd.f32 %v1237_v23, %v1212_v53  ;;  %v3767_v45 = vld [vmem:[#allocation2 + $0x44] sm:$0xff]  ;;  %v1246_v38 = vadd.f32 %v1238_v63, %v1213_v39  ;;  %v1247_v62 = vadd.f32 %v1239_v20, %v1214_v11 }
 0x30a   : > { %v2427_v16 = vld [vmem:[%s5067_s5 + $0x1c0] sm:$0xff]  ;;  %v2428_v59 = vld [vmem:[%s5067_s5 + $0x1c8] sm:$0xff]  ;;  %v2429_v5 = vld [vmem:[%s5067_s5 + $0x1d0] sm:$0xff] }
 0x30b   : > { %v2430_v50 = vld [vmem:[%s5067_s5 + $0x1d8] sm:$0xff]  ;;  %v2431_v4 = vld [vmem:[%s5067_s5 + $0x1e0] sm:$0xff]  ;;  %v1265_v3 = vmul.f32 %v2427_v16, %v1248_v27  ;;  %v1266_v53 = vmul.f32 %v2428_v59, %v3755_v6  ;;  %v2432_v39 = vld [vmem:[%s5067_s5 + $0x1e8] sm:$0xff]  ;;  %v1267_v21 = vmul.f32 %v2429_v5, %v3757_v41 }
 0x30c   : > { %v2433_v10 = vld [vmem:[%s5067_s5 + $0x1f0] sm:$0xff]  ;;  %v2434_v11 = vld [vmem:[%s5067_s5 + $0x1f8] sm:$0xff]  ;;  %v1268_v22 = vmul.f32 %v2430_v50, %v3759_v33  ;;  %v1269_v23 = vmul.f32 %v2431_v4, %v3761_v58  ;;  %v1270_v27 = vmul.f32 %v2432_v39, %v3763_v36  ;;  %v2435_v59 = vld [vmem:[%s5067_s5 + $0x200] sm:$0xff] }
 0x30d   : > { %v1271_v63 = vmul.f32 %v2433_v10, %v3765_v61  ;;  %v1272_v20 = vmul.f32 %v2434_v11, %v3767_v45  ;;  %v1273_v16 = vadd.f32 %v1265_v3, %v1240_v35  ;;  %v2436_v6 = vld [vmem:[%s5067_s5 + $0x208] sm:$0xff]  ;;  %v1274_v5 = vadd.f32 %v1266_v53, %v1241_v34  ;;  %v2437_v4 = vld [vmem:[%s5067_s5 + $0x210] sm:$0xff]  ;;  %v2438_v35 = vld [vmem:[%s5067_s5 + $0x218] sm:$0xff] }
 0x30e   : > { %v1275_v41 = vadd.f32 %v1267_v21, %v1242_v14  ;;  %v1276_v50 = vadd.f32 %v1268_v22, %v1243_v37  ;;  %v1277_v33 = vadd.f32 %v1269_v23, %v1244_v31  ;;  %v2439_v3 = vld [vmem:[%s5067_s5 + $0x220] sm:$0xff]  ;;  %v1278_v39 = vadd.f32 %v1270_v27, %v1245_v15  ;;  %v2440_v37 = vld [vmem:[%s5067_s5 + $0x228] sm:$0xff]  ;;  %v2441_v34 = vld [vmem:[%s5067_s5 + $0x230] sm:$0xff] }
 0x30f   : > { %v1279_v10 = vadd.f32 %v1271_v63, %v1246_v38  ;;  %v1280_v11 = vadd.f32 %v1272_v20, %v1247_v62  ;;  %v2442_v31 = vld [vmem:[%s5067_s5 + $0x238] sm:$0xff]  ;;  %v1291_v14 = vmul.f32 %v2435_v59, %v3438_v51  ;;  %v3825_v53 = vld [vmem:[#allocation2 + $0x45] sm:$0xff]  ;;  %v1292_v15 = vmul.f32 %v2436_v6, %v3440_v52  ;;  %v2445_v20 = vld [vmem:[%s5067_s5 + $0x250] sm:$0xff] }
 0x310   : > { %5155 = vst [vmem:[#allocation25_spill] sm:$0xff] %v3825_v53  ;;  %v1293_v38 = vmul.f32 %v2437_v4, %v3445_v55  ;;  %v1294_v62 = vmul.f32 %v2438_v35, %v3447_v56  ;;  %v1295_v21 = vmul.f32 %v2439_v3, %v3449_v57  ;;  %v2443_v22 = vld [vmem:[%s5067_s5 + $0x240] sm:$0xff]  ;;  %v2444_v23 = vld [vmem:[%s5067_s5 + $0x248] sm:$0xff]  ;;  %v1296_v51 = vmul.f32 %v2440_v37, %v3454_v60  ;;  %v2446_v59 = vld [vmem:[%s5067_s5 + $0x258] sm:$0xff] }
 0x311   : > { %v1297_v27 = vmul.f32 %v2441_v34, %v3466_v2  ;;  %v1298_v6 = vmul.f32 %v2442_v31, %v3825_v53  ;;  %v1299_v63 = vadd.f32 %v1291_v14, %v1273_v16  ;;  %v2447_v4 = vld [vmem:[%s5067_s5 + $0x260] sm:$0xff]  ;;  %v1300_v35 = vadd.f32 %v1292_v15, %v1274_v5  ;;  %v2448_v16 = vld [vmem:[%s5067_s5 + $0x268] sm:$0xff]  ;;  %v2449_v34 = vld [vmem:[%s5067_s5 + $0x270] sm:$0xff] }
 0x312   : > { %v1301_v3 = vadd.f32 %v1293_v38, %v1275_v41  ;;  %v1302_v37 = vadd.f32 %v1294_v62, %v1276_v50  ;;  %v1303_v60 = vadd.f32 %v1295_v21, %v1277_v33  ;;  %v2450_v31 = vld [vmem:[%s5067_s5 + $0x278] sm:$0xff]  ;;  %v1304_v14 = vadd.f32 %v1296_v51, %v1278_v39  ;;  %v3859_v41 = vld [vmem:[#allocation2 + $0x46] sm:$0xff] }
 0x313   : > { %v1305_v53 = vadd.f32 %v1297_v27, %v1279_v10  ;;  %v1306_v2 = vadd.f32 %v1298_v6, %v1280_v11  ;;  %v1317_v5 = vmul.f32 %v2443_v22, %v3490_v17  ;;  %v1318_v33 = vmul.f32 %v2444_v23, %v3492_v18  ;;  %v2451_v62 = vld [vmem:[%s5067_s5 + $0x280] sm:$0xff]  ;;  %v2452_v39 = vld [vmem:[%s5067_s5 + $0x288] sm:$0xff]  ;;  %v2453_v22 = vld [vmem:[%s5067_s5 + $0x290] sm:$0xff] }
 0x314   : > { %v1319_v50 = vmul.f32 %v2445_v20, %v3494_v19  ;;  %v1320_v15 = vmul.f32 %v2446_v59, %v3500_v24  ;;  %v1321_v38 = vmul.f32 %v2447_v4, %v3502_v25  ;;  %v1322_v17 = vmul.f32 %v2448_v16, %v3504_v26  ;;  %v2454_v23 = vld [vmem:[%s5067_s5 + $0x298] sm:$0xff]  ;;  %v2455_v51 = vld [vmem:[%s5067_s5 + $0x2a0] sm:$0xff]  ;;  %v2457_v4 = vld [vmem:[%s5067_s5 + $0x2b0] sm:$0xff] }
 0x315   : > { %v1323_v10 = vmul.f32 %v2449_v34, %v3508_v29  ;;  %v1324_v11 = vmul.f32 %v2450_v31, %v3859_v41  ;;  %v1325_v21 = vadd.f32 %v1317_v5, %v1299_v63  ;;  %v1326_v27 = vadd.f32 %v1318_v33, %v1300_v35  ;;  %v2456_v63 = vld [vmem:[%s5067_s5 + $0x2a8] sm:$0xff]  ;;  %v2458_v16 = vld [vmem:[%s5067_s5 + $0x2b8] sm:$0xff] }
 0x316   : > { %v1327_v6 = vadd.f32 %v1319_v50, %v1301_v3  ;;  %v1328_v20 = vadd.f32 %v1320_v15, %v1302_v37  ;;  %v1329_v59 = vadd.f32 %v1321_v38, %v1303_v60  ;;  %v1330_v34 = vadd.f32 %v1322_v17, %v1304_v14  ;;  %v3893_v3 = vld [vmem:[#allocation2 + $0x47] sm:$0xff] }
 0x317   : > { %v1331_v31 = vadd.f32 %v1323_v10, %v1305_v53  ;;  %v1332_v5 = vadd.f32 %v1324_v11, %v1306_v2  ;;  %v1343_v35 = vmul.f32 %v2451_v62, %v3538_v0  ;;  %v1344_v60 = vmul.f32 %v2452_v39, %v3540_v1  ;;  %v2459_v15 = vld [vmem:[%s5067_s5 + $0x2c0] sm:$0xff]  ;;  %v2460_v2 = vld [vmem:[%s5067_s5 + $0x2c8] sm:$0xff]  ;;  %v2461_v62 = vld [vmem:[%s5067_s5 + $0x2d0] sm:$0xff] }
 0x318   : > { %v1345_v37 = vmul.f32 %v2453_v22, %v3545_v7  ;;  %v1346_v33 = vmul.f32 %v2454_v23, %v3547_v8  ;;  %v1347_v50 = vmul.f32 %v2455_v51, %v3549_v9  ;;  %v1348_v0 = vmul.f32 %v2456_v63, %v3552_v12  ;;  %v2462_v39 = vld [vmem:[%s5067_s5 + $0x2d8] sm:$0xff]  ;;  %v2463_v17 = vld [vmem:[%s5067_s5 + $0x2e0] sm:$0xff]  ;;  %v2465_v51 = vld [vmem:[%s5067_s5 + $0x2f0] sm:$0xff] }
 0x319   : > { %v1349_v53 = vmul.f32 %v2457_v4, %v3554_v13  ;;  %v1350_v14 = vmul.f32 %v2458_v16, %v3893_v3  ;;  %v1351_v38 = vadd.f32 %v1343_v35, %v1325_v21  ;;  %v1352_v10 = vadd.f32 %v1344_v60, %v1326_v27  ;;  %v2464_v21 = vld [vmem:[%s5067_s5 + $0x2e8] sm:$0xff]  ;;  %v2466_v63 = vld [vmem:[%s5067_s5 + $0x2f8] sm:$0xff] }
 0x31a   : > { %v1353_v11 = vadd.f32 %v1345_v37, %v1327_v6  ;;  %v1354_v22 = vadd.f32 %v1346_v33, %v1328_v20  ;;  %v1355_v23 = vadd.f32 %v1347_v50, %v1329_v59  ;;  %v1356_v4 = vadd.f32 %v1348_v0, %v1330_v34  ;;  %v2467_v37 = vld [vmem:[%s5067_s5 + $0x300] sm:$0xff]  ;;  %v2468_v34 = vld [vmem:[%s5067_s5 + $0x308] sm:$0xff] }
 0x31b   : > { %v1357_v16 = vadd.f32 %v1349_v53, %v1331_v31  ;;  %v1358_v35 = vadd.f32 %v1350_v14, %v1332_v5  ;;  %v1368_v27 = vmul.f32 %v2459_v15, %v3584_v44  ;;  %v1369_v6 = vmul.f32 %v2460_v2, %v3425_v42  ;;  %v5156_v5 = vld [vmem:[#allocation3_spill] sm:$0xff]  ;;  %v5157_v33 = vld [vmem:[#allocation4_spill] sm:$0xff]  ;;  %v2473_v14 = vld [vmem:[%s5067_s5 + $0x330] sm:$0xff] }
 0x31c   : > { %v1370_v20 = vmul.f32 %v2461_v62, %v3427_v43  ;;  %v1371_v59 = vmul.f32 %v2462_v39, %v3432_v47  ;;  %v1372_v60 = vmul.f32 %v2463_v17, %v3434_v48  ;;  %v1373_v31 = vmul.f32 %v2464_v21, %v3436_v49  ;;  %v2469_v43 = vld [vmem:[%s5067_s5 + $0x310] sm:$0xff]  ;;  %v2470_v47 = vld [vmem:[%s5067_s5 + $0x318] sm:$0xff]  ;;  %v2471_v48 = vld [vmem:[%s5067_s5 + $0x320] sm:$0xff] }
 0x31d   : > { %v1374_v44 = vmul.f32 %v2465_v51, %v5156_v5  ;;  %v1375_v42 = vmul.f32 %v2466_v63, %v5157_v33  ;;  %v1376_v50 = vadd.f32 %v1368_v27, %v1351_v38  ;;  %v1377_v15 = vadd.f32 %v1369_v6, %v1352_v10  ;;  %v2472_v53 = vld [vmem:[%s5067_s5 + $0x328] sm:$0xff]  ;;  %v2474_v38 = vld [vmem:[%s5067_s5 + $0x338] sm:$0xff]  ;;  %v5158_v21 = vld [vmem:[#allocation7_spill] sm:$0xff] }
 0x31e   : > { %v1378_v2 = vadd.f32 %v1370_v20, %v1353_v11  ;;  %v1379_v49 = vadd.f32 %v1371_v59, %v1354_v22  ;;  %v1380_v0 = vadd.f32 %v1372_v60, %v1355_v23  ;;  %v1381_v62 = vadd.f32 %v1373_v31, %v1356_v4  ;;  %v3959_v11 = vld [vmem:[#allocation2 + $0x49] sm:$0xff]  ;;  %v2475_v20 = vld [vmem:[%s5067_s5 + $0x340] sm:$0xff]  ;;  %v2478_v5 = vld [vmem:[%s5067_s5 + $0x358] sm:$0xff] }
 0x31f   : > { %v1382_v39 = vadd.f32 %v1374_v44, %v1357_v16  ;;  %v1383_v17 = vadd.f32 %v1375_v42, %v1358_v35  ;;  %v1394_v10 = vmul.f32 %v2467_v37, %v5158_v21  ;;  %5159 = vst [vmem:[#allocation3_spill] sm:$0xff] %v3959_v11  ;;  %v1395_v22 = vmul.f32 %v2468_v34, %v3619_v28  ;;  %v5160_v51 = vld [vmem:[#allocation8_spill] sm:$0xff]  ;;  %v5161_v27 = vld [vmem:[#allocation9_spill] sm:$0xff]  ;;  %v5162_v16 = vld [vmem:[#allocation10_spill] sm:$0xff] }
 0x320   : > { %v1396_v23 = vmul.f32 %v2469_v43, %v3621_v32  ;;  %v1397_v63 = vmul.f32 %v2470_v47, %v5160_v51  ;;  %v1398_v6 = vmul.f32 %v2471_v48, %v5161_v27  ;;  %v2476_v4 = vld [vmem:[%s5067_s5 + $0x348] sm:$0xff]  ;;  %v1399_v35 = vmul.f32 %v2472_v53, %v5162_v16  ;;  %v5163_v59 = vld [vmem:[#allocation11_spill] sm:$0xff]  ;;  %v2477_v31 = vld [vmem:[%s5067_s5 + $0x350] sm:$0xff] }
 0x321   : > { %v1400_v60 = vmul.f32 %v2473_v14, %v5163_v59  ;;  %v1401_v37 = vmul.f32 %v2474_v38, %v3959_v11  ;;  %v1402_v34 = vadd.f32 %v1394_v10, %v1376_v50  ;;  %v2479_v44 = vld [vmem:[%s5067_s5 + $0x360] sm:$0xff]  ;;  %v1403_v33 = vadd.f32 %v1395_v22, %v1377_v15  ;;  %v2480_v50 = vld [vmem:[%s5067_s5 + $0x368] sm:$0xff]  ;;  %v2481_v48 = vld [vmem:[%s5067_s5 + $0x370] sm:$0xff] }
 0x322   : > { %v1404_v42 = vadd.f32 %v1396_v23, %v1378_v2  ;;  %v1405_v43 = vadd.f32 %v1397_v63, %v1379_v49  ;;  %v1406_v47 = vadd.f32 %v1398_v6, %v1380_v0  ;;  %v2482_v53 = vld [vmem:[%s5067_s5 + $0x378] sm:$0xff]  ;;  %v1407_v14 = vadd.f32 %v1399_v35, %v1381_v62  ;;  %v3993_v2 = vld [vmem:[#allocation2 + $0x4a] sm:$0xff]  ;;  %v2483_v11 = vld [vmem:[%s5067_s5 + $0x380] sm:$0xff] }
 0x323   : > { %v1408_v38 = vadd.f32 %v1400_v60, %v1382_v39  ;;  %v1409_v21 = vadd.f32 %v1401_v37, %v1383_v17  ;;  %v1420_v15 = vmul.f32 %v2475_v20, %v3663_v30  ;;  %v5164_v49 = vld [vmem:[#allocation12_spill] sm:$0xff]  ;;  %v5165_v10 = vld [vmem:[#allocation13_spill] sm:$0xff]  ;;  %v1423_v23 = vmul.f32 %v2478_v5, %v3670_v54  ;;  %v5166_v63 = vld [vmem:[#allocation14_spill] sm:$0xff] }
 0x324   : > { %v1421_v0 = vmul.f32 %v2476_v4, %v5164_v49  ;;  %v1422_v22 = vmul.f32 %v2477_v31, %v5165_v10  ;;  %v1424_v6 = vmul.f32 %v2479_v44, %v5166_v63  ;;  %v2484_v62 = vld [vmem:[%s5067_s5 + $0x388] sm:$0xff]  ;;  %v5167_v39 = vld [vmem:[#allocation15_spill] sm:$0xff]  ;;  %v1427_v4 = vmul.f32 %v2482_v53, %v3993_v2  ;;  %v2485_v54 = vld [vmem:[%s5067_s5 + $0x390] sm:$0xff] }
 0x325   : > { %v1425_v30 = vmul.f32 %v2480_v50, %v5167_v39  ;;  %v5168_v17 = vld [vmem:[#allocation16_spill] sm:$0xff]  ;;  %v1428_v35 = vadd.f32 %v1420_v15, %v1402_v34  ;;  %v2486_v60 = vld [vmem:[%s5067_s5 + $0x398] sm:$0xff]  ;;  %v2487_v37 = vld [vmem:[%s5067_s5 + $0x3a0] sm:$0xff]  ;;  %v1431_v44 = vadd.f32 %v1423_v23, %v1405_v43 }
 0x326   : > { %v1426_v20 = vmul.f32 %v2481_v48, %v5168_v17  ;;  %v1429_v31 = vadd.f32 %v1421_v0, %v1403_v33  ;;  %v1430_v5 = vadd.f32 %v1422_v22, %v1404_v42  ;;  %v1432_v50 = vadd.f32 %v1424_v6, %v1406_v47  ;;  %v2488_v34 = vld [vmem:[%s5067_s5 + $0x3a8] sm:$0xff]  ;;  %v2489_v48 = vld [vmem:[%s5067_s5 + $0x3b0] sm:$0xff]  ;;  %v2490_v53 = vld [vmem:[%s5067_s5 + $0x3b8] sm:$0xff] }
 0x327   : > { %v1433_v15 = vadd.f32 %v1425_v30, %v1407_v14  ;;  %v1435_v10 = vadd.f32 %v1427_v4, %v1409_v21  ;;  %v5169_v63 = vld [vmem:[#allocation17_spill] sm:$0xff]  ;;  %v5170_v43 = vld [vmem:[#allocation18_spill] sm:$0xff]  ;;  %v1448_v0 = vmul.f32 %v2485_v54, %v3714_v40  ;;  %v5171_v22 = vld [vmem:[#allocation19_spill] sm:$0xff]  ;;  %v1452_v21 = vmul.f32 %v2489_v48, %v3722_v46 }
 0x328   : > { %v1434_v49 = vadd.f32 %v1426_v20, %v1408_v38  ;;  %v1446_v33 = vmul.f32 %v2483_v11, %v5169_v63  ;;  %v4027_v42 = vld [vmem:[#allocation2 + $0x4b] sm:$0xff]  ;;  %v1447_v47 = vmul.f32 %v2484_v62, %v5170_v43  ;;  %v1449_v23 = vmul.f32 %v2486_v60, %v5171_v22  ;;  %v2491_v17 = vld [vmem:[%s5067_s5 + $0x3c0] sm:$0xff]  ;;  %v2494_v20 = vld [vmem:[%s5067_s5 + $0x3d8] sm:$0xff] }
 0x329   : > { %v5172_v6 = vld [vmem:[#allocation20_spill] sm:$0xff]  ;;  %v5173_v38 = vld [vmem:[#allocation21_spill] sm:$0xff]  ;;  %v1453_v62 = vmul.f32 %v2490_v53, %v4027_v42  ;;  %v2495_v4 = vld [vmem:[%s5067_s5 + $0x3e0] sm:$0xff]  ;;  %v1456_v60 = vadd.f32 %v1448_v0, %v1430_v5  ;;  %v1475_v22 = vmul.f32 %v2494_v20, %v3761_v58 }
 0x32a   : > { %v1450_v39 = vmul.f32 %v2487_v37, %v5172_v6  ;;  %v2492_v14 = vld [vmem:[%s5067_s5 + $0x3c8] sm:$0xff]  ;;  %v1451_v11 = vmul.f32 %v2488_v34, %v5173_v38  ;;  %v1454_v30 = vadd.f32 %v1446_v33, %v1428_v35  ;;  %v2493_v40 = vld [vmem:[%s5067_s5 + $0x3d0] sm:$0xff]  ;;  %v1455_v54 = vadd.f32 %v1447_v47, %v1429_v31  ;;  %v2498_v48 = vld [vmem:[%s5067_s5 + $0x3f8] sm:$0xff] }
 0x32b   : > { %v1457_v37 = vadd.f32 %v1449_v23, %v1431_v44  ;;  %v2496_v46 = vld [vmem:[%s5067_s5 + $0x3e8] sm:$0xff]  ;;  %v2497_v35 = vld [vmem:[%s5067_s5 + $0x3f0] sm:$0xff]  ;;  %v1460_v63 = vadd.f32 %v1452_v21, %v1434_v49  ;;  %v1461_v33 = vadd.f32 %v1453_v62, %v1435_v10  ;;  %v5174_v43 = vld [vmem:[#allocation22_spill] sm:$0xff]  ;;  %v1476_v23 = vmul.f32 %v2495_v4, %v3763_v36 }
 0x32c   : > { %v1458_v34 = vadd.f32 %v1450_v39, %v1432_v50  ;;  %v1459_v53 = vadd.f32 %v1451_v11, %v1433_v15  ;;  %v1472_v31 = vmul.f32 %v2491_v17, %v5174_v43  ;;  %v4061_v5 = vld [vmem:[#allocation2 + $0x4c] sm:$0xff]  ;;  %v5175_v44 = vld [vmem:[#allocation23_spill] sm:$0xff]  ;;  %v1477_v49 = vmul.f32 %v2496_v46, %v3765_v61  ;;  %v2502_v36 = vld [vmem:[%s5067_s5 + $0x418] sm:$0xff] }
 0x32d   : > { %v1473_v50 = vmul.f32 %v2492_v14, %v5175_v44  ;;  %v5176_v47 = vld [vmem:[#allocation24_spill] sm:$0xff]  ;;  %v2499_v6 = vld [vmem:[%s5067_s5 + $0x400] sm:$0xff]  ;;  %v1478_v10 = vmul.f32 %v2497_v35, %v3767_v45  ;;  %v1479_v39 = vmul.f32 %v2498_v48, %v4061_v5  ;;  %v2501_v58 = vld [vmem:[%s5067_s5 + $0x410] sm:$0xff]  ;;  %v1483_v61 = vadd.f32 %v1475_v22, %v1457_v37 }
 0x32e   : > { %v1474_v0 = vmul.f32 %v2493_v40, %v5176_v47  ;;  %v2500_v15 = vld [vmem:[%s5067_s5 + $0x408] sm:$0xff]  ;;  %v1480_v17 = vadd.f32 %v1472_v31, %v1454_v30  ;;  %v2503_v14 = vld [vmem:[%s5067_s5 + $0x420] sm:$0xff]  ;;  %v1484_v21 = vadd.f32 %v1476_v23, %v1458_v34  ;;  %v2505_v62 = vld [vmem:[%s5067_s5 + $0x430] sm:$0xff]  ;;  %v1485_v40 = vadd.f32 %v1477_v49, %v1459_v53 }
 0x32f   : > { %v1481_v38 = vadd.f32 %v1473_v50, %v1455_v54  ;;  %v2504_v45 = vld [vmem:[%s5067_s5 + $0x428] sm:$0xff]  ;;  %v2506_v30 = vld [vmem:[%s5067_s5 + $0x438] sm:$0xff]  ;;  %v1486_v20 = vadd.f32 %v1478_v10, %v1460_v63  ;;  %v1487_v4 = vadd.f32 %v1479_v39, %v1461_v33  ;;  %v1498_v54 = vmul.f32 %v2499_v6, %v3440_v52  ;;  %v5177_v35 = vld [vmem:[#allocation5_spill] sm:$0xff] }
 0x330   : > { %v1482_v11 = vadd.f32 %v1474_v0, %v1456_v60  ;;  %v4095_v60 = vld [vmem:[#allocation2 + $0x4d] sm:$0xff]  ;;  %v1499_v37 = vmul.f32 %v2500_v15, %v3445_v55  ;;  %v1500_v34 = vmul.f32 %v2501_v58, %v3447_v56  ;;  %v1501_v46 = vmul.f32 %v2502_v36, %v3449_v57  ;;  %v2507_v43 = vld [vmem:[%s5067_s5 + $0x440] sm:$0xff]  ;;  %v5178_v63 = vld [vmem:[#allocation6_spill] sm:$0xff] }
 0x331   : > { %v1502_v48 = vmul.f32 %v2503_v14, %v5177_v35  ;;  %v2508_v53 = vld [vmem:[%s5067_s5 + $0x448] sm:$0xff]  ;;  %v1503_v52 = vmul.f32 %v2504_v45, %v5178_v63  ;;  %v5179_v33 = vld [vmem:[#allocation25_spill] sm:$0xff]  ;;  %v1505_v55 = vmul.f32 %v2506_v30, %v4095_v60  ;;  %v1506_v44 = vadd.f32 %v1498_v54, %v1480_v17  ;;  %v2510_v57 = vld [vmem:[%s5067_s5 + $0x458] sm:$0xff] }
 0x332   : > { %v1504_v31 = vmul.f32 %v2505_v62, %v5179_v33  ;;  %v2509_v56 = vld [vmem:[%s5067_s5 + $0x450] sm:$0xff]  ;;  %v2511_v50 = vld [vmem:[%s5067_s5 + $0x460] sm:$0xff]  ;;  %v1507_v47 = vadd.f32 %v1499_v37, %v1481_v38  ;;  %v1508_v0 = vadd.f32 %v1500_v34, %v1482_v11  ;;  %v1509_v22 = vadd.f32 %v1501_v46, %v1483_v61  ;;  %v2512_v6 = vld [vmem:[%s5067_s5 + $0x468] sm:$0xff] }
 0x333   : > { %v1510_v23 = vadd.f32 %v1502_v48, %v1484_v21  ;;  %v2513_v15 = vld [vmem:[%s5067_s5 + $0x470] sm:$0xff]  ;;  %v2514_v49 = vld [vmem:[%s5067_s5 + $0x478] sm:$0xff]  ;;  %v1511_v10 = vadd.f32 %v1503_v52, %v1485_v40  ;;  %v1513_v17 = vadd.f32 %v1505_v55, %v1487_v4  ;;  %v1524_v58 = vmul.f32 %v2507_v43, %v3492_v18  ;;  %v2515_v21 = vld [vmem:[%s5067_s5 + $0x480] sm:$0xff] }
 0x334   : > { %v1512_v39 = vadd.f32 %v1504_v31, %v1486_v20  ;;  %v4129_v36 = vld [vmem:[#allocation2 + $0x4e] sm:$0xff]  ;;  %v1525_v14 = vmul.f32 %v2508_v53, %v3494_v19  ;;  %v1526_v38 = vmul.f32 %v2509_v56, %v3500_v24  ;;  %v1527_v11 = vmul.f32 %v2510_v57, %v3502_v25  ;;  %v2518_v25 = vld [vmem:[%s5067_s5 + $0x498] sm:$0xff] }
 0x335   : > { %v1528_v61 = vmul.f32 %v2511_v50, %v3504_v26  ;;  %v2516_v45 = vld [vmem:[%s5067_s5 + $0x488] sm:$0xff]  ;;  %v1529_v18 = vmul.f32 %v2512_v6, %v3508_v29  ;;  %v1530_v62 = vmul.f32 %v2513_v15, %v3859_v41  ;;  %v1531_v19 = vmul.f32 %v2514_v49, %v4129_v36  ;;  %v2517_v24 = vld [vmem:[%s5067_s5 + $0x490] sm:$0xff]  ;;  %v2519_v26 = vld [vmem:[%s5067_s5 + $0x4a0] sm:$0xff] }
 0x336   : > { %v1532_v30 = vadd.f32 %v1524_v58, %v1506_v44  ;;  %v1533_v40 = vadd.f32 %v1525_v14, %v1507_v47  ;;  %v1534_v20 = vadd.f32 %v1526_v38, %v1508_v0  ;;  %v1535_v29 = vadd.f32 %v1527_v11, %v1509_v22  ;;  %v2520_v54 = vld [vmem:[%s5067_s5 + $0x4a8] sm:$0xff]  ;;  %v2521_v37 = vld [vmem:[%s5067_s5 + $0x4b0] sm:$0xff]  ;;  %v2522_v34 = vld [vmem:[%s5067_s5 + $0x4b8] sm:$0xff] }
 0x337   : > { %v1536_v4 = vadd.f32 %v1528_v61, %v1510_v23  ;;  %v1537_v46 = vadd.f32 %v1529_v18, %v1511_v10  ;;  %v1538_v35 = vadd.f32 %v1530_v62, %v1512_v39  ;;  %v1539_v48 = vadd.f32 %v1531_v19, %v1513_v17  ;;  %v4163_v53 = vld [vmem:[#allocation2 + $0x4f] sm:$0xff]  ;;  %v2523_v44 = vld [vmem:[%s5067_s5 + $0x4c0] sm:$0xff]  ;;  %v2530_v15 = vld [vmem:[%s5067_s5 + $0x4f8] sm:$0xff] }
 0x338   : > { %v1550_v43 = vmul.f32 %v2515_v21, %v3540_v1  ;;  %v1551_v63 = vmul.f32 %v2516_v45, %v3545_v7  ;;  %v1552_v52 = vmul.f32 %v2517_v24, %v3547_v8  ;;  %v1553_v31 = vmul.f32 %v2518_v25, %v3549_v9  ;;  %v2524_v56 = vld [vmem:[%s5067_s5 + $0x4c8] sm:$0xff]  ;;  %v2525_v8 = vld [vmem:[%s5067_s5 + $0x4d0] sm:$0xff]  ;;  %v2526_v9 = vld [vmem:[%s5067_s5 + $0x4d8] sm:$0xff] }
 0x339   : > { %v1554_v55 = vmul.f32 %v2519_v26, %v3552_v12  ;;  %v1555_v1 = vmul.f32 %v2520_v54, %v3554_v13  ;;  %v1556_v57 = vmul.f32 %v2521_v37, %v3893_v3  ;;  %v1557_v7 = vmul.f32 %v2522_v34, %v4163_v53  ;;  %v2527_v12 = vld [vmem:[%s5067_s5 + $0x4e0] sm:$0xff]  ;;  %v2528_v23 = vld [vmem:[%s5067_s5 + $0x4e8] sm:$0xff]  ;;  %v2529_v6 = vld [vmem:[%s5067_s5 + $0x4f0] sm:$0xff] }
 0x33a   : > { %v1558_v50 = vadd.f32 %v1550_v43, %v1532_v30  ;;  %v1559_v47 = vadd.f32 %v1551_v63, %v1533_v40  ;;  %v1560_v0 = vadd.f32 %v1552_v52, %v1534_v20  ;;  %v1561_v13 = vadd.f32 %v1553_v31, %v1535_v29  ;;  %v3068_v17 = vld [vmem:[#allocation2 + $0x18] sm:$0xff]  ;;  %v1592_v14 = vld [vmem:[%s5068_s6] sm:$0xff]  ;;  %v3070_v61 = vld [vmem:[#allocation2 + $0x28] sm:$0xff] }
 0x33b   : > { %v1562_v22 = vadd.f32 %v1554_v55, %v1536_v4  ;;  %v1563_v49 = vadd.f32 %v1555_v1, %v1537_v46  ;;  %v1564_v10 = vadd.f32 %v1556_v57, %v1538_v35  ;;  %v1565_v39 = vadd.f32 %v1557_v7, %v1539_v48  ;;  %v3069_v38 = vld [vmem:[#allocation2 + $0x20] sm:$0xff]  ;;  %v3071_v45 = vld [vmem:[#allocation2 + $0x30] sm:$0xff]  ;;  %v3072_v62 = vld [vmem:[#allocation2 + $0x38] sm:$0xff] }
 0x33c   : > { %v1575_v58 = vmul.f32 %v3068_v17, %v2523_v44  ;;  %v1576_v11 = vmul.f32 %v3069_v38, %v2524_v56  ;;  %v1577_v21 = vmul.f32 %v3070_v61, %v2525_v8  ;;  %v1578_v18 = vmul.f32 %v3071_v45, %v2526_v9  ;;  %v1593_v30 = vld [vmem:[%s5068_s6 + $0x8] sm:$0xff]  ;;  %v1594_v24 = vld [vmem:[%s5068_s6 + $0x10] sm:$0xff]  ;;  %v1595_v25 = vld [vmem:[%s5068_s6 + $0x18] sm:$0xff] }
 0x33d   : > { %v1579_v19 = vmul.f32 %v3072_v62, %v2527_v12  ;;  %v3073_v26 = vld [vmem:[#allocation2 + $0x40] sm:$0xff]  ;;  %v3074_v20 = vld [vmem:[#allocation2 + $0x48] sm:$0xff]  ;;  %v3075_v4 = vld [vmem:[#allocation2 + $0x50] sm:$0xff] }
 0x33e   : > { %v1580_v40 = vmul.f32 %v3073_v26, %v2528_v23  ;;  %v1581_v29 = vmul.f32 %v3074_v20, %v2529_v6  ;;  %v1582_v54 = vmul.f32 %v3075_v4, %v2530_v15  ;;  %v1583_v37 = vadd.f32 %v1575_v58, %v1558_v50  ;;  %v1596_v34 = vld [vmem:[%s5068_s6 + $0x20] sm:$0xff]  ;;  %v1597_v46 = vld [vmem:[%s5068_s6 + $0x28] sm:$0xff]  ;;  %v1598_v35 = vld [vmem:[%s5068_s6 + $0x30] sm:$0xff] }
 0x33f   : > { %v1584_v48 = vadd.f32 %v1576_v11, %v1559_v47  ;;  %v1585_v43 = vadd.f32 %v1577_v21, %v1560_v0  ;;  %v1586_v63 = vadd.f32 %v1578_v18, %v1561_v13  ;;  %v1587_v52 = vadd.f32 %v1579_v19, %v1562_v22  ;;  %v4217_v31 = vld [vmem:[#allocation2 + $0x51] sm:$0xff]  ;;  %v1624_v44 = vld [vmem:[%s3205_s15 + $0x40] sm:$0xff]  ;;  %v1625_v8 = vld [vmem:[%s3205_s15 + $0x48] sm:$0xff] }
 0x340   : > { %v1599_v55 = vld [vmem:[%s5068_s6 + $0x38] sm:$0xff]  ;;  %v1588_v1 = vadd.f32 %v1580_v40, %v1563_v49  ;;  %v1589_v57 = vadd.f32 %v1581_v29, %v1564_v10  ;;  %v1590_v7 = vadd.f32 %v1582_v54, %v1565_v39  ;;  %v1600_v50 = vmul.f32 %v1592_v14, %v3619_v28  ;;  %v1626_v9 = vld [vmem:[%s3205_s15 + $0x50] sm:$0xff]  ;;  %v1628_v47 = vld [vmem:[%s3205_s15 + $0x60] sm:$0xff] }
 0x341   : > { %v4223_v56 = vld [vmem:[#allocation2 + $0x58] sm:$0xff]  ;;  %v4230_v0 = vld [vmem:[#allocation2 + $0x60] sm:$0xff]  ;;  %v4232_v13 = vld [vmem:[#allocation2 + $0x68] sm:$0xff]  ;;  %v1601_v6 = vmul.f32 %v1593_v30, %v3621_v32  ;;  %v1602_v15 = vmul.f32 %v1594_v24, %v5160_v51  ;;  %v1603_v49 = vmul.f32 %v1595_v25, %v5161_v27  ;;  %v1604_v28 = vmul.f32 %v1596_v34, %v5162_v16 }
 0x342   : > { %v1627_v12 = vld [vmem:[%s3205_s15 + $0x58] sm:$0xff]  ;;  %5180 = vst [vmem:[#allocation4_spill] sm:$0xff] %v4232_v13  ;;  %v4234_v22 = vld [vmem:[#allocation2 + $0x70] sm:$0xff]  ;;  %v1629_v10 = vld [vmem:[%s3205_s15 + $0x68] sm:$0xff]  ;;  %v1605_v11 = vmul.f32 %v1597_v46, %v5163_v59  ;;  %v1607_v32 = vmul.f32 %v1599_v55, %v4217_v31  ;;  %v1608_v45 = vadd.f32 %v1600_v50, %v1583_v37  ;;  %v1640_v54 = vadd.f32 %v4223_v56, %v1624_v44 }
 0x343   : > { %5181 = vst [vmem:[#allocation7_spill] sm:$0xff] %v4234_v22  ;;  %v4236_v23 = vld [vmem:[#allocation2 + $0x78] sm:$0xff]  ;;  %v1630_v39 = vld [vmem:[%s3205_s15 + $0x70] sm:$0xff]  ;;  %v4245_v58 = vld [vmem:[#allocation2 + $0x80] sm:$0xff]  ;;  %v1609_v18 = vadd.f32 %v1601_v6, %v1584_v48  ;;  %v1610_v62 = vadd.f32 %v1602_v15, %v1585_v43  ;;  %v1611_v19 = vadd.f32 %v1603_v49, %v1586_v63  ;;  %v1612_v30 = vadd.f32 %v1604_v28, %v1587_v52 }
 0x344   : > { %5182 = vst [vmem:[#allocation8_spill] sm:$0xff] %v4236_v23  ;;  %v1631_v17 = vld [vmem:[%s3205_s15 + $0x78] sm:$0xff]  ;;  %5183 = vst [vmem:[#allocation9_spill] sm:$0xff] %v4245_v58  ;;  %v4247_v14 = vld [vmem:[#allocation2 + $0x88] sm:$0xff]  ;;  %v1613_v20 = vadd.f32 %v1605_v11, %v1588_v1  ;;  %v1615_v4 = vadd.f32 %v1607_v32, %v1590_v7  ;;  %v1642_v48 = vadd.f32 %v4232_v13, %v1626_v9 }
 0x345   : > { %5184 = vst [vmem:[#allocation10_spill] sm:$0xff] %v4247_v14  ;;  %v1639_v38 = vld [vmem:[#allocation2 + $0x90] sm:$0xff]  ;;  %v5185_v61 = vld [vmem:[#allocation3_spill] sm:$0xff]  ;;  %v1657_v40 = vld [vmem:[%s5067_s5 + $0x8] sm:$0xff]  ;;  %v1643_v43 = vadd.f32 %v4234_v22, %v1627_v12  ;;  %v1644_v63 = vadd.f32 %v4236_v23, %v1628_v47  ;;  %v1645_v1 = vadd.f32 %v4245_v58, %v1629_v10 }
 0x346   : > { %v1606_v21 = vmul.f32 %v1598_v35, %v5185_v61  ;;  %v4252_v51 = vld [vmem:[#allocation2 + $0x55] sm:$0xff]  ;;  %v4254_v27 = vld [vmem:[#allocation2 + $0x5d] sm:$0xff]  ;;  %v4256_v16 = vld [vmem:[#allocation2 + $0x65] sm:$0xff]  ;;  %1616 = vst.msk [vmem:[%s3210_s18] sm:$0xff] %vm427_vm2, %v1608_v45  ;;  %v1641_v35 = vadd.f32 %v4230_v0, %v1625_v8  ;;  %v1647_v7 = vadd.f32 %v1639_v38, %v1631_v17  ;;  %v1665_v47 = vmul.f32 %v1657_v40, %v4095_v60 }
 0x347   : > { %v4258_v59 = vld [vmem:[#allocation2 + $0x6d] sm:$0xff]  ;;  %v4260_v24 = vld [vmem:[#allocation2 + $0x75] sm:$0xff]  ;;  %v4262_v25 = vld [vmem:[#allocation2 + $0x7d] sm:$0xff]  ;;  %1617 = vst.msk [vmem:[%s3210_s18 + $0x8] sm:$0xff] %vm427_vm2, %v1609_v18 }
 0x348   : > { %v1656_v26 = vld [vmem:[%s5067_s5] sm:$0xff]  ;;  %v1614_v29 = vadd.f32 %v1606_v21, %v1589_v57  ;;  %v1658_v37 = vld [vmem:[%s5067_s5 + $0x10] sm:$0xff]  ;;  %v1659_v34 = vld [vmem:[%s5067_s5 + $0x18] sm:$0xff]  ;;  %1618 = vst.msk [vmem:[%s3210_s18 + $0x10] sm:$0xff] %vm427_vm2, %v1610_v62  ;;  %v1646_v57 = vadd.f32 %v4247_v14, %v1630_v39 }
 0x349   : > { %v1660_v46 = vld [vmem:[%s5067_s5 + $0x20] sm:$0xff]  ;;  %1619 = vst.msk [vmem:[%s3210_s18 + $0x18] sm:$0xff] %vm427_vm2, %v1611_v19  ;;  %1620 = vst.msk [vmem:[%s3210_s18 + $0x20] sm:$0xff] %vm427_vm2, %v1612_v30  ;;  %v1661_v52 = vld [vmem:[%s5067_s5 + $0x28] sm:$0xff]  ;;  %v1664_v50 = vmul.f32 %v1656_v26, %v5179_v33  ;;  %v1666_v6 = vmul.f32 %v1658_v37, %v4252_v51  ;;  %v1667_v15 = vmul.f32 %v1659_v34, %v4254_v27 }
 0x34a   : > { %v1662_v55 = vld [vmem:[%s5067_s5 + $0x30] sm:$0xff]  ;;  %v1663_v44 = vld [vmem:[%s5067_s5 + $0x38] sm:$0xff]  ;;  %1621 = vst.msk [vmem:[%s3210_s18 + $0x28] sm:$0xff] %vm427_vm2, %v1613_v20  ;;  %1622 = vst.msk [vmem:[%s3210_s18 + $0x30] sm:$0xff] %vm427_vm2, %v1614_v29  ;;  %v1668_v49 = vmul.f32 %v1660_v46, %v4256_v16  ;;  %v1669_v38 = vmul.f32 %v1661_v52, %v4258_v59  ;;  %v1673_v19 = vadd.f32 %v1665_v47, %v1641_v35 }
 0x34b   : > { %1623 = vst.msk [vmem:[%s3210_s18 + $0x38] sm:$0xff] %vm427_vm2, %v1615_v4  ;;  %v4312_v8 = vld [vmem:[#allocation2 + $0x56] sm:$0xff]  ;;  %v4314_v9 = vld [vmem:[#allocation2 + $0x5e] sm:$0xff]  ;;  %v4316_v12 = vld [vmem:[#allocation2 + $0x66] sm:$0xff]  ;;  %v1670_v11 = vmul.f32 %v1662_v55, %v4260_v24  ;;  %v1671_v21 = vmul.f32 %v1663_v44, %v4262_v25  ;;  %v1672_v32 = vadd.f32 %v1664_v50, %v1640_v54  ;;  %v1674_v30 = vadd.f32 %v1666_v6, %v1642_v48 }
 0x34c   : > { %v4322_v28 = vld [vmem:[#allocation2 + $0x6e] sm:$0xff]  ;;  %v4324_v10 = vld [vmem:[#allocation2 + $0x76] sm:$0xff]  ;;  %v4326_v39 = vld [vmem:[#allocation2 + $0x7e] sm:$0xff]  ;;  %v1675_v26 = vadd.f32 %v1667_v15, %v1643_v43  ;;  %v1676_v40 = vadd.f32 %v1668_v49, %v1644_v63  ;;  %v1677_v54 = vadd.f32 %v1669_v38, %v1645_v1 }
 0x34d   : > { %v2531_v33 = vld [vmem:[%s5067_s5 + $0x40] sm:$0xff]  ;;  %v2532_v17 = vld [vmem:[%s5067_s5 + $0x48] sm:$0xff]  ;;  %v2533_v45 = vld [vmem:[%s5067_s5 + $0x50] sm:$0xff]  ;;  %v1678_v37 = vadd.f32 %v1670_v11, %v1646_v57  ;;  %v1679_v34 = vadd.f32 %v1671_v21, %v1647_v7 }
 0x34e   : > { %v2534_v18 = vld [vmem:[%s5067_s5 + $0x58] sm:$0xff]  ;;  %v2535_v62 = vld [vmem:[%s5067_s5 + $0x60] sm:$0xff]  ;;  %v2536_v20 = vld [vmem:[%s5067_s5 + $0x68] sm:$0xff]  ;;  %v1696_v46 = vmul.f32 %v2531_v33, %v3859_v41  ;;  %v1697_v63 = vmul.f32 %v2532_v17, %v4129_v36  ;;  %v1698_v52 = vmul.f32 %v2533_v45, %v4312_v8 }
 0x34f   : > { %v2537_v29 = vld [vmem:[%s5067_s5 + $0x70] sm:$0xff]  ;;  %v2538_v4 = vld [vmem:[%s5067_s5 + $0x78] sm:$0xff]  ;;  %v4360_v43 = vld [vmem:[#allocation2 + $0x67] sm:$0xff]  ;;  %v1699_v55 = vmul.f32 %v2534_v18, %v4314_v9  ;;  %v1700_v44 = vmul.f32 %v2535_v62, %v4316_v12  ;;  %v1701_v47 = vmul.f32 %v2536_v20, %v4322_v28 }
 0x350   : > { %v4356_v35 = vld [vmem:[#allocation2 + $0x57] sm:$0xff]  ;;  %v4358_v48 = vld [vmem:[#allocation2 + $0x5f] sm:$0xff]  ;;  %v4366_v50 = vld [vmem:[#allocation2 + $0x6f] sm:$0xff]  ;;  %v1702_v6 = vmul.f32 %v2537_v29, %v4324_v10  ;;  %v1703_v15 = vmul.f32 %v2538_v4, %v4326_v39  ;;  %v1704_v49 = vadd.f32 %v1696_v46, %v1672_v32  ;;  %v1705_v11 = vadd.f32 %v1697_v63, %v1673_v19 }
 0x351   : > { %v4368_v1 = vld [vmem:[#allocation2 + $0x77] sm:$0xff]  ;;  %v4370_v57 = vld [vmem:[#allocation2 + $0x7f] sm:$0xff]  ;;  %v2540_v7 = vld [vmem:[%s5067_s5 + $0x88] sm:$0xff]  ;;  %v1706_v21 = vadd.f32 %v1698_v52, %v1674_v30  ;;  %v1707_v45 = vadd.f32 %v1699_v55, %v1675_v26  ;;  %v1708_v18 = vadd.f32 %v1700_v44, %v1676_v40  ;;  %v1709_v29 = vadd.f32 %v1701_v47, %v1677_v54 }
 0x352   : > { %5186 = vst [vmem:[#allocation11_spill] sm:$0xff] %v4370_v57  ;;  %v2539_v41 = vld [vmem:[%s5067_s5 + $0x80] sm:$0xff]  ;;  %v2541_v33 = vld [vmem:[%s5067_s5 + $0x90] sm:$0xff]  ;;  %v2542_v17 = vld [vmem:[%s5067_s5 + $0x98] sm:$0xff]  ;;  %v1710_v4 = vadd.f32 %v1702_v6, %v1678_v37  ;;  %v1711_v46 = vadd.f32 %v1703_v15, %v1679_v34  ;;  %v1729_v26 = vmul.f32 %v2540_v7, %v4163_v53 }
 0x353   : > { %v2543_v38 = vld [vmem:[%s5067_s5 + $0xa0] sm:$0xff]  ;;  %v2544_v32 = vld [vmem:[%s5067_s5 + $0xa8] sm:$0xff]  ;;  %v2545_v62 = vld [vmem:[%s5067_s5 + $0xb0] sm:$0xff]  ;;  %v1728_v19 = vmul.f32 %v2539_v41, %v3893_v3  ;;  %v1730_v40 = vmul.f32 %v2541_v33, %v4356_v35  ;;  %v1731_v63 = vmul.f32 %v2542_v17, %v4358_v48 }
 0x354   : > { %v2546_v20 = vld [vmem:[%s5067_s5 + $0xb8] sm:$0xff]  ;;  %v1744_v30 = vld [vmem:[#allocation2 + $0x48] sm:$0xff]  ;;  %v1732_v52 = vmul.f32 %v2543_v38, %v4360_v43  ;;  %v4404_v55 = vld [vmem:[#allocation2 + $0x50] sm:$0xff]  ;;  %v1733_v3 = vmul.f32 %v2544_v32, %v4366_v50  ;;  %v1734_v37 = vmul.f32 %v2545_v62, %v4368_v1  ;;  %v1737_v15 = vadd.f32 %v1729_v26, %v1705_v11 }
 0x355   : > { %v2547_v44 = vld [vmem:[%s5067_s5 + $0xc0] sm:$0xff]  ;;  %v2548_v54 = vld [vmem:[%s5067_s5 + $0xc8] sm:$0xff]  ;;  %v1735_v34 = vmul.f32 %v2546_v20, %v4370_v57  ;;  %v1736_v41 = vadd.f32 %v1728_v19, %v1704_v49  ;;  %v2549_v7 = vld [vmem:[%s5067_s5 + $0xd0] sm:$0xff]  ;;  %v1738_v33 = vadd.f32 %v1730_v40, %v1706_v21  ;;  %v1739_v17 = vadd.f32 %v1731_v63, %v1707_v45 }
 0x356   : > { %v2550_v47 = vld [vmem:[%s5067_s5 + $0xd8] sm:$0xff]  ;;  %v2551_v6 = vld [vmem:[%s5067_s5 + $0xe0] sm:$0xff]  ;;  %v1740_v38 = vadd.f32 %v1732_v52, %v1708_v18  ;;  %v2552_v49 = vld [vmem:[%s5067_s5 + $0xe8] sm:$0xff]  ;;  %v1741_v20 = vadd.f32 %v1733_v3, %v1709_v29  ;;  %v1742_v19 = vadd.f32 %v1734_v37, %v1710_v4  ;;  %v1754_v57 = vmul.f32 %v2547_v44, %v1744_v30 }
 0x357   : > { %v2553_v32 = vld [vmem:[%s5067_s5 + $0xf0] sm:$0xff]  ;;  %v2554_v62 = vld [vmem:[%s5067_s5 + $0xf8] sm:$0xff]  ;;  %v1743_v14 = vadd.f32 %v1735_v34, %v1711_v46  ;;  %v4435_v21 = vld [vmem:[#allocation2 + $0x61] sm:$0xff]  ;;  %v1755_v18 = vmul.f32 %v2548_v54, %v4404_v55  ;;  %v1756_v26 = vmul.f32 %v2549_v7, %v4223_v56  ;;  %v1757_v40 = vmul.f32 %v2550_v47, %v4230_v0 }
 0x358   : > { %v4433_v11 = vld [vmem:[#allocation2 + $0x59] sm:$0xff]  ;;  %5188 = vst [vmem:[#allocation13_spill] sm:$0xff] %v4435_v21  ;;  %v4437_v45 = vld [vmem:[#allocation2 + $0x69] sm:$0xff]  ;;  %v1758_v63 = vmul.f32 %v2551_v6, %v4232_v13  ;;  %v4443_v52 = vld [vmem:[#allocation2 + $0x71] sm:$0xff]  ;;  %v1759_v44 = vmul.f32 %v2552_v49, %v4234_v22  ;;  %v1760_v54 = vmul.f32 %v2553_v32, %v4236_v23  ;;  %v1761_v3 = vmul.f32 %v2554_v62, %v4245_v58 }
 0x359   : > { %5187 = vst [vmem:[#allocation12_spill] sm:$0xff] %v4433_v11  ;;  %5189 = vst [vmem:[#allocation14_spill] sm:$0xff] %v4437_v45  ;;  %v4445_v29 = vld [vmem:[#allocation2 + $0x79] sm:$0xff]  ;;  %v4447_v4 = vld [vmem:[#allocation2 + $0x81] sm:$0xff]  ;;  %v1762_v37 = vadd.f32 %v1754_v57, %v1736_v41  ;;  %v1763_v6 = vadd.f32 %v1755_v18, %v1737_v15  ;;  %v1764_v13 = vadd.f32 %v1756_v26, %v1738_v33 }
 0x35a   : > { %5190 = vst [vmem:[#allocation15_spill] sm:$0xff] %v4443_v52  ;;  %5191 = vst [vmem:[#allocation16_spill] sm:$0xff] %v4445_v29  ;;  %v2555_v46 = vld [vmem:[%s5067_s5 + $0x100] sm:$0xff]  ;;  %v2556_v30 = vld [vmem:[%s5067_s5 + $0x108] sm:$0xff]  ;;  %v1765_v49 = vadd.f32 %v1757_v40, %v1739_v17  ;;  %v1766_v22 = vadd.f32 %v1758_v63, %v1740_v38  ;;  %v1767_v62 = vadd.f32 %v1759_v44, %v1741_v20 }
 0x35b   : > { %5192 = vst [vmem:[#allocation17_spill] sm:$0xff] %v4447_v4  ;;  %v2557_v34 = vld [vmem:[%s5067_s5 + $0x110] sm:$0xff]  ;;  %v2558_v7 = vld [vmem:[%s5067_s5 + $0x118] sm:$0xff]  ;;  %v2559_v47 = vld [vmem:[%s5067_s5 + $0x120] sm:$0xff]  ;;  %v1768_v58 = vadd.f32 %v1760_v54, %v1742_v19  ;;  %v1769_v23 = vadd.f32 %v1761_v3, %v1743_v14  ;;  %v1786_v15 = vmul.f32 %v2555_v46, %v5185_v61  ;;  %v1787_v26 = vmul.f32 %v2556_v30, %v4217_v31 }
 0x35c   : > { %v2560_v57 = vld [vmem:[%s5067_s5 + $0x128] sm:$0xff]  ;;  %v2561_v41 = vld [vmem:[%s5067_s5 + $0x130] sm:$0xff]  ;;  %v2562_v32 = vld [vmem:[%s5067_s5 + $0x138] sm:$0xff]  ;;  %v1788_v40 = vmul.f32 %v2557_v34, %v4433_v11  ;;  %v1789_v63 = vmul.f32 %v2558_v7, %v4435_v21  ;;  %v1790_v20 = vmul.f32 %v2559_v47, %v4437_v45 }
 0x35d   : > { %v4477_v33 = vld [vmem:[#allocation2 + $0x52] sm:$0xff]  ;;  %v4479_v17 = vld [vmem:[#allocation2 + $0x5a] sm:$0xff]  ;;  %v4481_v38 = vld [vmem:[#allocation2 + $0x62] sm:$0xff]  ;;  %v1791_v44 = vmul.f32 %v2560_v57, %v4443_v52  ;;  %v1792_v54 = vmul.f32 %v2561_v41, %v4445_v29  ;;  %v1793_v3 = vmul.f32 %v2562_v32, %v4447_v4  ;;  %v1794_v34 = vadd.f32 %v1786_v15, %v1762_v37 }
 0x35e   : > { %5193 = vst [vmem:[#allocation18_spill] sm:$0xff] %v4479_v17  ;;  %5194 = vst [vmem:[#allocation19_spill] sm:$0xff] %v4481_v38  ;;  %v4483_v18 = vld [vmem:[#allocation2 + $0x6a] sm:$0xff]  ;;  %v4489_v19 = vld [vmem:[#allocation2 + $0x72] sm:$0xff]  ;;  %v1795_v21 = vadd.f32 %v1787_v26, %v1763_v6  ;;  %v1796_v11 = vadd.f32 %v1788_v40, %v1764_v13  ;;  %v1797_v57 = vadd.f32 %v1789_v63, %v1765_v49 }
 0x35f   : > { %5195 = vst [vmem:[#allocation20_spill] sm:$0xff] %v4483_v18  ;;  %5196 = vst [vmem:[#allocation21_spill] sm:$0xff] %v4489_v19  ;;  %v4491_v14 = vld [vmem:[#allocation2 + $0x7a] sm:$0xff]  ;;  %v4493_v61 = vld [vmem:[#allocation2 + $0x82] sm:$0xff]  ;;  %v1798_v52 = vadd.f32 %v1790_v20, %v1766_v22  ;;  %v1799_v15 = vadd.f32 %v1791_v44, %v1767_v62  ;;  %v1800_v4 = vadd.f32 %v1792_v54, %v1768_v58 }
 0x360   : > { %5197 = vst [vmem:[#allocation22_spill] sm:$0xff] %v4491_v14  ;;  %5198 = vst [vmem:[#allocation23_spill] sm:$0xff] %v4493_v61  ;;  %v2563_v46 = vld [vmem:[%s5067_s5 + $0x140] sm:$0xff]  ;;  %v2564_v30 = vld [vmem:[%s5067_s5 + $0x148] sm:$0xff]  ;;  %v1801_v29 = vadd.f32 %v1793_v3, %v1769_v23 }
 0x361   : > { %v2565_v7 = vld [vmem:[%s5067_s5 + $0x150] sm:$0xff]  ;;  %v2566_v47 = vld [vmem:[%s5067_s5 + $0x158] sm:$0xff]  ;;  %v2567_v45 = vld [vmem:[%s5067_s5 + $0x160] sm:$0xff]  ;;  %v1818_v6 = vmul.f32 %v2563_v46, %v3993_v2  ;;  %v1819_v40 = vmul.f32 %v2564_v30, %v4477_v33 }
 0x362   : > { %v2568_v37 = vld [vmem:[%s5067_s5 + $0x168] sm:$0xff]  ;;  %v2569_v41 = vld [vmem:[%s5067_s5 + $0x170] sm:$0xff]  ;;  %v2570_v32 = vld [vmem:[%s5067_s5 + $0x178] sm:$0xff]  ;;  %v1820_v63 = vmul.f32 %v2565_v7, %v4479_v17  ;;  %v1821_v20 = vmul.f32 %v2566_v47, %v4481_v38  ;;  %v1822_v62 = vmul.f32 %v2567_v45, %v4483_v18 }
 0x363   : > { %v4523_v13 = vld [vmem:[#allocation2 + $0x53] sm:$0xff]  ;;  %v4525_v22 = vld [vmem:[#allocation2 + $0x5b] sm:$0xff]  ;;  %v4527_v49 = vld [vmem:[#allocation2 + $0x63] sm:$0xff]  ;;  %v1823_v44 = vmul.f32 %v2568_v37, %v4489_v19  ;;  %v1824_v54 = vmul.f32 %v2569_v41, %v4491_v14  ;;  %v1825_v45 = vmul.f32 %v2570_v32, %v4493_v61  ;;  %v1826_v3 = vadd.f32 %v1818_v6, %v1794_v34 }
 0x364   : > { %5199 = vst [vmem:[#allocation24_spill] sm:$0xff] %v4525_v22  ;;  %5200 = vst [vmem:[#allocation5_spill] sm:$0xff] %v4527_v49  ;;  %v4529_v26 = vld [vmem:[#allocation2 + $0x6b] sm:$0xff]  ;;  %v4535_v58 = vld [vmem:[#allocation2 + $0x73] sm:$0xff]  ;;  %v1827_v38 = vadd.f32 %v1819_v40, %v1795_v21  ;;  %v1828_v17 = vadd.f32 %v1820_v63, %v1796_v11  ;;  %v1829_v37 = vadd.f32 %v1821_v20, %v1797_v57 }
 0x365   : > { %5201 = vst [vmem:[#allocation6_spill] sm:$0xff] %v4529_v26  ;;  %5202 = vst [vmem:[#allocation25_spill] sm:$0xff] %v4535_v58  ;;  %v4537_v23 = vld [vmem:[#allocation2 + $0x7b] sm:$0xff]  ;;  %v4539_v2 = vld [vmem:[#allocation2 + $0x83] sm:$0xff]  ;;  %v1830_v19 = vadd.f32 %v1822_v62, %v1798_v52  ;;  %v1831_v6 = vadd.f32 %v1823_v44, %v1799_v15  ;;  %v1832_v61 = vadd.f32 %v1824_v54, %v1800_v4 }
 0x366   : > { %5203 = vst [vmem:[#allocation3_spill] sm:$0xff] %v4537_v23  ;;  %5204 = vst [vmem:[#allocation26_spill] sm:$0xff] %v4539_v2  ;;  %v2571_v46 = vld [vmem:[%s5067_s5 + $0x180] sm:$0xff]  ;;  %v2572_v30 = vld [vmem:[%s5067_s5 + $0x188] sm:$0xff]  ;;  %v1833_v14 = vadd.f32 %v1825_v45, %v1801_v29 }
 0x367   : > { %v2573_v7 = vld [vmem:[%s5067_s5 + $0x190] sm:$0xff]  ;;  %v2574_v47 = vld [vmem:[%s5067_s5 + $0x198] sm:$0xff]  ;;  %v2575_v18 = vld [vmem:[%s5067_s5 + $0x1a0] sm:$0xff]  ;;  %v1850_v21 = vmul.f32 %v2571_v46, %v4027_v42  ;;  %v1851_v63 = vmul.f32 %v2572_v30, %v4523_v13 }
 0x368   : > { %v2576_v34 = vld [vmem:[%s5067_s5 + $0x1a8] sm:$0xff]  ;;  %v2577_v41 = vld [vmem:[%s5067_s5 + $0x1b0] sm:$0xff]  ;;  %v2578_v32 = vld [vmem:[%s5067_s5 + $0x1b8] sm:$0xff]  ;;  %v1852_v20 = vmul.f32 %v2573_v7, %v4525_v22  ;;  %v1853_v62 = vmul.f32 %v2574_v47, %v4527_v49  ;;  %v1854_v15 = vmul.f32 %v2575_v18, %v4529_v26 }
 0x369   : > { %v4569_v11 = vld [vmem:[#allocation2 + $0x54] sm:$0xff]  ;;  %v4571_v52 = vld [vmem:[#allocation2 + $0x5c] sm:$0xff]  ;;  %v4573_v57 = vld [vmem:[#allocation2 + $0x64] sm:$0xff]  ;;  %v1855_v44 = vmul.f32 %v2576_v34, %v4535_v58  ;;  %v1856_v54 = vmul.f32 %v2577_v41, %v4537_v23  ;;  %v1857_v18 = vmul.f32 %v2578_v32, %v4539_v2  ;;  %v1858_v45 = vadd.f32 %v1850_v21, %v1826_v3 }
 0x36a   : > { %v4575_v40 = vld [vmem:[#allocation2 + $0x6c] sm:$0xff]  ;;  %v4581_v4 = vld [vmem:[#allocation2 + $0x74] sm:$0xff]  ;;  %v4583_v29 = vld [vmem:[#allocation2 + $0x7c] sm:$0xff]  ;;  %v1859_v49 = vadd.f32 %v1851_v63, %v1827_v38  ;;  %v1860_v22 = vadd.f32 %v1852_v20, %v1828_v17  ;;  %v1861_v34 = vadd.f32 %v1853_v62, %v1829_v37  ;;  %v1862_v58 = vadd.f32 %v1854_v15, %v1830_v19 }
 0x36b   : > { %v4585_v42 = vld [vmem:[#allocation2 + $0x84] sm:$0xff]  ;;  %v2581_v7 = vld [vmem:[%s5067_s5 + $0x1d0] sm:$0xff]  ;;  %v2582_v47 = vld [vmem:[%s5067_s5 + $0x1d8] sm:$0xff]  ;;  %v1863_v21 = vadd.f32 %v1855_v44, %v1831_v6  ;;  %v1864_v2 = vadd.f32 %v1856_v54, %v1832_v61  ;;  %v1865_v23 = vadd.f32 %v1857_v18, %v1833_v14 }
 0x36c   : > { %v2579_v46 = vld [vmem:[%s5067_s5 + $0x1c0] sm:$0xff]  ;;  %v2580_v30 = vld [vmem:[%s5067_s5 + $0x1c8] sm:$0xff]  ;;  %v2585_v41 = vld [vmem:[%s5067_s5 + $0x1f0] sm:$0xff]  ;;  %v1884_v19 = vmul.f32 %v2581_v7, %v4571_v52  ;;  %v1885_v37 = vmul.f32 %v2582_v47, %v4573_v57 }
 0x36d   : > { %v2583_v26 = vld [vmem:[%s5067_s5 + $0x1e0] sm:$0xff]  ;;  %v2584_v3 = vld [vmem:[%s5067_s5 + $0x1e8] sm:$0xff]  ;;  %v2586_v32 = vld [vmem:[%s5067_s5 + $0x1f8] sm:$0xff]  ;;  %v1882_v38 = vmul.f32 %v2579_v46, %v4061_v5  ;;  %v1883_v17 = vmul.f32 %v2580_v30, %v4569_v11  ;;  %v1888_v61 = vmul.f32 %v2585_v41, %v4583_v29 }
 0x36e   : > { %v1886_v63 = vmul.f32 %v2583_v26, %v4575_v40  ;;  %v4619_v20 = vld [vmem:[#allocation2 + $0x85] sm:$0xff]  ;;  %v1887_v5 = vmul.f32 %v2584_v3, %v4581_v4  ;;  %v1889_v6 = vmul.f32 %v2586_v32, %v4585_v42  ;;  %v2589_v26 = vld [vmem:[%s5067_s5 + $0x210] sm:$0xff]  ;;  %v2590_v46 = vld [vmem:[%s5067_s5 + $0x218] sm:$0xff]  ;;  %v1892_v54 = vadd.f32 %v1884_v19, %v1860_v22 }
 0x36f   : > { %v2587_v62 = vld [vmem:[%s5067_s5 + $0x200] sm:$0xff]  ;;  %v2588_v14 = vld [vmem:[%s5067_s5 + $0x208] sm:$0xff]  ;;  %v1890_v15 = vadd.f32 %v1882_v38, %v1858_v45  ;;  %v1891_v44 = vadd.f32 %v1883_v17, %v1859_v49  ;;  %v1893_v18 = vadd.f32 %v1885_v37, %v1861_v34  ;;  %v2593_v47 = vld [vmem:[%s5067_s5 + $0x230] sm:$0xff]  ;;  %v1896_v32 = vadd.f32 %v1888_v61, %v1864_v2 }
 0x370   : > { %v2591_v30 = vld [vmem:[%s5067_s5 + $0x220] sm:$0xff]  ;;  %v1894_v7 = vadd.f32 %v1886_v63, %v1862_v58  ;;  %v2592_v45 = vld [vmem:[%s5067_s5 + $0x228] sm:$0xff]  ;;  %v2594_v3 = vld [vmem:[%s5067_s5 + $0x238] sm:$0xff]  ;;  %v1895_v41 = vadd.f32 %v1887_v5, %v1863_v21  ;;  %v1897_v38 = vadd.f32 %v1889_v6, %v1865_v23  ;;  %v1907_v49 = vmul.f32 %v2587_v62, %v4095_v60 }
 0x371   : > { %v1908_v22 = vmul.f32 %v2588_v14, %v4252_v51  ;;  %v1909_v58 = vmul.f32 %v2589_v26, %v4254_v27  ;;  %v1910_v34 = vmul.f32 %v2590_v46, %v4256_v16  ;;  %v1911_v17 = vmul.f32 %v2591_v30, %v4258_v59  ;;  %v4653_v19 = vld [vmem:[#allocation2 + $0x86] sm:$0xff]  ;;  %v2597_v62 = vld [vmem:[%s5067_s5 + $0x250] sm:$0xff]  ;;  %v2598_v14 = vld [vmem:[%s5067_s5 + $0x258] sm:$0xff] }
 0x372   : > { %v2595_v37 = vld [vmem:[%s5067_s5 + $0x240] sm:$0xff]  ;;  %v2596_v23 = vld [vmem:[%s5067_s5 + $0x248] sm:$0xff]  ;;  %v1912_v60 = vmul.f32 %v2592_v45, %v4260_v24  ;;  %v1913_v2 = vmul.f32 %v2593_v47, %v4262_v25  ;;  %v1914_v21 = vmul.f32 %v2594_v3, %v4619_v20  ;;  %v1915_v63 = vadd.f32 %v1907_v49, %v1890_v15  ;;  %v2601_v30 = vld [vmem:[%s5067_s5 + $0x270] sm:$0xff] }
 0x373   : > { %v2599_v5 = vld [vmem:[%s5067_s5 + $0x260] sm:$0xff]  ;;  %v1916_v61 = vadd.f32 %v1908_v22, %v1891_v44  ;;  %v1917_v6 = vadd.f32 %v1909_v58, %v1892_v54  ;;  %v1918_v26 = vadd.f32 %v1910_v34, %v1893_v18  ;;  %v1919_v46 = vadd.f32 %v1911_v17, %v1894_v7  ;;  %v2600_v15 = vld [vmem:[%s5067_s5 + $0x268] sm:$0xff]  ;;  %v2602_v45 = vld [vmem:[%s5067_s5 + $0x278] sm:$0xff] }
 0x374   : > { %v1920_v47 = vadd.f32 %v1912_v60, %v1895_v41  ;;  %v1921_v3 = vadd.f32 %v1913_v2, %v1896_v32  ;;  %v1922_v49 = vadd.f32 %v1914_v21, %v1897_v38  ;;  %v1932_v44 = vmul.f32 %v2595_v37, %v4129_v36  ;;  %v4687_v58 = vld [vmem:[#allocation2 + $0x87] sm:$0xff]  ;;  %v2605_v37 = vld [vmem:[%s5067_s5 + $0x290] sm:$0xff] }
 0x375   : > { %v1933_v54 = vmul.f32 %v2596_v23, %v4312_v8  ;;  %v1934_v18 = vmul.f32 %v2597_v62, %v4314_v9  ;;  %v1935_v7 = vmul.f32 %v2598_v14, %v4316_v12  ;;  %v1936_v22 = vmul.f32 %v2599_v5, %v4322_v28  ;;  %5205 = vst [vmem:[#allocation27_spill] sm:$0xff] %v4687_v58  ;;  %v2603_v34 = vld [vmem:[%s5067_s5 + $0x280] sm:$0xff]  ;;  %v2604_v41 = vld [vmem:[%s5067_s5 + $0x288] sm:$0xff]  ;;  %v2606_v23 = vld [vmem:[%s5067_s5 + $0x298] sm:$0xff] }
 0x376   : > { %v1937_v36 = vmul.f32 %v2600_v15, %v4324_v10  ;;  %v1938_v32 = vmul.f32 %v2601_v30, %v4326_v39  ;;  %v1939_v38 = vmul.f32 %v2602_v45, %v4653_v19  ;;  %v1940_v17 = vadd.f32 %v1932_v44, %v1915_v63  ;;  %v2607_v60 = vld [vmem:[%s5067_s5 + $0x2a0] sm:$0xff]  ;;  %v2608_v63 = vld [vmem:[%s5067_s5 + $0x2a8] sm:$0xff]  ;;  %v2609_v5 = vld [vmem:[%s5067_s5 + $0x2b0] sm:$0xff] }
 0x377   : > { %v1941_v2 = vadd.f32 %v1933_v54, %v1916_v61  ;;  %v1942_v21 = vadd.f32 %v1934_v18, %v1917_v6  ;;  %v1943_v62 = vadd.f32 %v1935_v7, %v1918_v26  ;;  %v1944_v14 = vadd.f32 %v1936_v22, %v1919_v46  ;;  %v2610_v15 = vld [vmem:[%s5067_s5 + $0x2b8] sm:$0xff]  ;;  %v2611_v18 = vld [vmem:[%s5067_s5 + $0x2c0] sm:$0xff] }
 0x378   : > { %v1945_v30 = vadd.f32 %v1937_v36, %v1920_v47  ;;  %v1946_v45 = vadd.f32 %v1938_v32, %v1921_v3  ;;  %v1947_v44 = vadd.f32 %v1939_v38, %v1922_v49  ;;  %v1957_v61 = vmul.f32 %v2603_v34, %v4163_v53  ;;  %v2612_v47 = vld [vmem:[%s5067_s5 + $0x2c8] sm:$0xff]  ;;  %v5206_v49 = vld [vmem:[#allocation11_spill] sm:$0xff]  ;;  %v2613_v34 = vld [vmem:[%s5067_s5 + $0x2d0] sm:$0xff] }
 0x379   : > { %v1958_v6 = vmul.f32 %v2604_v41, %v4356_v35  ;;  %v1959_v26 = vmul.f32 %v2605_v37, %v4358_v48  ;;  %v1960_v46 = vmul.f32 %v2606_v23, %v4360_v43  ;;  %v1961_v54 = vmul.f32 %v2607_v60, %v4366_v50  ;;  %v2614_v41 = vld [vmem:[%s5067_s5 + $0x2d8] sm:$0xff]  ;;  %v2615_v36 = vld [vmem:[%s5067_s5 + $0x2e0] sm:$0xff]  ;;  %v2617_v60 = vld [vmem:[%s5067_s5 + $0x2f0] sm:$0xff] }
 0x37a   : > { %v1962_v3 = vmul.f32 %v2608_v63, %v4368_v1  ;;  %v1963_v53 = vmul.f32 %v2609_v5, %v5206_v49  ;;  %v1964_v7 = vmul.f32 %v2610_v15, %v4687_v58  ;;  %v1965_v22 = vadd.f32 %v1957_v61, %v1940_v17  ;;  %v2616_v17 = vld [vmem:[%s5067_s5 + $0x2e8] sm:$0xff]  ;;  %v2618_v63 = vld [vmem:[%s5067_s5 + $0x2f8] sm:$0xff]  ;;  %v2619_v58 = vld [vmem:[%s5067_s5 + $0x300] sm:$0xff] }
 0x37b   : > { %v1966_v32 = vadd.f32 %v1958_v6, %v1941_v2  ;;  %v1967_v38 = vadd.f32 %v1959_v26, %v1942_v21  ;;  %v1968_v37 = vadd.f32 %v1960_v46, %v1943_v62  ;;  %v1969_v23 = vadd.f32 %v1961_v54, %v1944_v14  ;;  %v5207_v14 = vld [vmem:[#allocation4_spill] sm:$0xff]  ;;  %v5208_v26 = vld [vmem:[#allocation7_spill] sm:$0xff] }
 0x37c   : > { %v1970_v5 = vadd.f32 %v1962_v3, %v1945_v30  ;;  %v1971_v15 = vadd.f32 %v1963_v53, %v1946_v45  ;;  %v1972_v61 = vadd.f32 %v1964_v7, %v1947_v44  ;;  %v1981_v2 = vmul.f32 %v2611_v18, %v4404_v55  ;;  %v4753_v54 = vld [vmem:[#allocation2 + $0x89] sm:$0xff]  ;;  %v5212_v18 = vld [vmem:[#allocation10_spill] sm:$0xff]  ;;  %v2623_v7 = vld [vmem:[%s5067_s5 + $0x320] sm:$0xff] }
 0x37d   : > { %v1982_v21 = vmul.f32 %v2612_v47, %v4223_v56  ;;  %v1983_v62 = vmul.f32 %v2613_v34, %v4230_v0  ;;  %v1984_v6 = vmul.f32 %v2614_v41, %v5207_v14  ;;  %v1985_v46 = vmul.f32 %v2615_v36, %v5208_v26  ;;  %5209 = vst [vmem:[#allocation11_spill] sm:$0xff] %v4753_v54  ;;  %v2620_v30 = vld [vmem:[%s5067_s5 + $0x308] sm:$0xff]  ;;  %v5211_v44 = vld [vmem:[#allocation9_spill] sm:$0xff]  ;;  %v2622_v53 = vld [vmem:[%s5067_s5 + $0x318] sm:$0xff] }
 0x37e   : > { %v5210_v45 = vld [vmem:[#allocation8_spill] sm:$0xff]  ;;  %v1987_v56 = vmul.f32 %v2617_v60, %v5211_v44  ;;  %v1988_v0 = vmul.f32 %v2618_v63, %v5212_v18  ;;  %v1989_v47 = vadd.f32 %v1981_v2, %v1965_v22  ;;  %v2621_v3 = vld [vmem:[%s5067_s5 + $0x310] sm:$0xff]  ;;  %v2626_v63 = vld [vmem:[%s5067_s5 + $0x338] sm:$0xff] }
 0x37f   : > { %v1986_v55 = vmul.f32 %v2616_v17, %v5210_v45  ;;  %v1990_v34 = vadd.f32 %v1982_v21, %v1966_v32  ;;  %v1991_v41 = vadd.f32 %v1983_v62, %v1967_v38  ;;  %v1992_v36 = vadd.f32 %v1984_v6, %v1968_v37  ;;  %v2624_v22 = vld [vmem:[%s5067_s5 + $0x328] sm:$0xff]  ;;  %v2625_v60 = vld [vmem:[%s5067_s5 + $0x330] sm:$0xff]  ;;  %v5215_v62 = vld [vmem:[#allocation14_spill] sm:$0xff] }
 0x380   : > { %v1993_v17 = vadd.f32 %v1985_v46, %v1969_v23  ;;  %v1995_v14 = vadd.f32 %v1987_v56, %v1971_v15  ;;  %v1996_v26 = vadd.f32 %v1988_v0, %v1972_v61  ;;  %v2006_v32 = vmul.f32 %v2619_v58, %v4217_v31  ;;  %v5213_v38 = vld [vmem:[#allocation12_spill] sm:$0xff]  ;;  %v5214_v23 = vld [vmem:[#allocation13_spill] sm:$0xff]  ;;  %v5216_v46 = vld [vmem:[#allocation15_spill] sm:$0xff] }
 0x381   : > { %v1994_v2 = vadd.f32 %v1986_v55, %v1970_v5  ;;  %v2007_v37 = vmul.f32 %v2620_v30, %v5213_v38  ;;  %v2008_v21 = vmul.f32 %v2621_v3, %v5214_v23  ;;  %v2009_v6 = vmul.f32 %v2622_v53, %v5215_v62  ;;  %v2022_v44 = vld [vmem:[#allocation2 + $0x8a] sm:$0xff]  ;;  %v2627_v18 = vld [vmem:[%s5067_s5 + $0x340] sm:$0xff]  ;;  %v2630_v0 = vld [vmem:[%s5067_s5 + $0x358] sm:$0xff] }
 0x382   : > { %v2010_v45 = vmul.f32 %v2623_v7, %v5216_v46  ;;  %v2628_v5 = vld [vmem:[%s5067_s5 + $0x348] sm:$0xff]  ;;  %v5218_v31 = vld [vmem:[#allocation17_spill] sm:$0xff]  ;;  %v2013_v30 = vmul.f32 %v2626_v63, %v4753_v54  ;;  %v2014_v55 = vadd.f32 %v2006_v32, %v1989_v47  ;;  %v2631_v3 = vld [vmem:[%s5067_s5 + $0x360] sm:$0xff] }
 0x383   : > { %v5217_v15 = vld [vmem:[#allocation16_spill] sm:$0xff]  ;;  %v2012_v58 = vmul.f32 %v2625_v60, %v5218_v31  ;;  %v2629_v56 = vld [vmem:[%s5067_s5 + $0x350] sm:$0xff]  ;;  %v2015_v53 = vadd.f32 %v2007_v37, %v1990_v34  ;;  %v2016_v7 = vadd.f32 %v2008_v21, %v1991_v41  ;;  %v2634_v63 = vld [vmem:[%s5067_s5 + $0x378] sm:$0xff]  ;;  %v2031_v34 = vmul.f32 %v2627_v18, %v4477_v33 }
 0x384   : > { %v2011_v61 = vmul.f32 %v2624_v22, %v5217_v15  ;;  %v2017_v22 = vadd.f32 %v2009_v6, %v1992_v36  ;;  %v2018_v15 = vadd.f32 %v2010_v45, %v1993_v17  ;;  %v2632_v47 = vld [vmem:[%s5067_s5 + $0x368] sm:$0xff]  ;;  %v2633_v60 = vld [vmem:[%s5067_s5 + $0x370] sm:$0xff]  ;;  %v2021_v31 = vadd.f32 %v2013_v30, %v1996_v26  ;;  %v5219_v41 = vld [vmem:[#allocation18_spill] sm:$0xff] }
 0x385   : > { %v2020_v54 = vadd.f32 %v2012_v58, %v1995_v14  ;;  %v2032_v36 = vmul.f32 %v2628_v5, %v5219_v41  ;;  %v5220_v17 = vld [vmem:[#allocation19_spill] sm:$0xff]  ;;  %v5221_v21 = vld [vmem:[#allocation20_spill] sm:$0xff]  ;;  %v5222_v45 = vld [vmem:[#allocation21_spill] sm:$0xff]  ;;  %v2038_v5 = vmul.f32 %v2634_v63, %v2022_v44 }
 0x386   : > { %v2019_v32 = vadd.f32 %v2011_v61, %v1994_v2  ;;  %v2033_v37 = vmul.f32 %v2629_v56, %v5220_v17  ;;  %v2034_v6 = vmul.f32 %v2630_v0, %v5221_v21  ;;  %v2035_v46 = vmul.f32 %v2631_v3, %v5222_v45  ;;  %v2047_v62 = vld [vmem:[#allocation2 + $0x8b] sm:$0xff]  ;;  %v2635_v23 = vld [vmem:[%s5067_s5 + $0x380] sm:$0xff]  ;;  %v5223_v14 = vld [vmem:[#allocation22_spill] sm:$0xff] }
 0x387   : > { %v2636_v2 = vld [vmem:[%s5067_s5 + $0x388] sm:$0xff]  ;;  %v2036_v26 = vmul.f32 %v2632_v47, %v5223_v14  ;;  %v5224_v33 = vld [vmem:[#allocation23_spill] sm:$0xff]  ;;  %v2039_v61 = vadd.f32 %v2031_v34, %v2014_v55  ;;  %v2637_v58 = vld [vmem:[%s5067_s5 + $0x390] sm:$0xff]  ;;  %v2040_v0 = vadd.f32 %v2032_v36, %v2015_v53  ;;  %v2046_v17 = vadd.f32 %v2038_v5, %v2021_v31 }
 0x388   : > { %v2037_v18 = vmul.f32 %v2633_v60, %v5224_v33  ;;  %v2638_v30 = vld [vmem:[%s5067_s5 + $0x398] sm:$0xff]  ;;  %v2639_v56 = vld [vmem:[%s5067_s5 + $0x3a0] sm:$0xff]  ;;  %v2041_v3 = vadd.f32 %v2033_v37, %v2016_v7  ;;  %v2042_v41 = vadd.f32 %v2034_v6, %v2017_v22  ;;  %v2043_v47 = vadd.f32 %v2035_v46, %v2018_v15  ;;  %v2640_v44 = vld [vmem:[%s5067_s5 + $0x3a8] sm:$0xff] }
 0x389   : > { %v2641_v55 = vld [vmem:[%s5067_s5 + $0x3b0] sm:$0xff]  ;;  %v2642_v60 = vld [vmem:[%s5067_s5 + $0x3b8] sm:$0xff]  ;;  %v2044_v63 = vadd.f32 %v2036_v26, %v2019_v32  ;;  %v2056_v53 = vmul.f32 %v2635_v23, %v4523_v13  ;;  %v5225_v7 = vld [vmem:[#allocation24_spill] sm:$0xff] }
 0x38a   : > { %v2045_v34 = vadd.f32 %v2037_v18, %v2020_v54  ;;  %v2057_v22 = vmul.f32 %v2636_v2, %v5225_v7  ;;  %v5226_v46 = vld [vmem:[#allocation5_spill] sm:$0xff]  ;;  %v5227_v36 = vld [vmem:[#allocation6_spill] sm:$0xff]  ;;  %v2643_v14 = vld [vmem:[%s5067_s5 + $0x3c0] sm:$0xff]  ;;  %v2063_v2 = vmul.f32 %v2642_v60, %v2047_v62 }
 0x38b   : > { %v2058_v15 = vmul.f32 %v2637_v58, %v5226_v46  ;;  %v2059_v37 = vmul.f32 %v2638_v30, %v5227_v36  ;;  %v5228_v21 = vld [vmem:[#allocation25_spill] sm:$0xff]  ;;  %v2644_v54 = vld [vmem:[%s5067_s5 + $0x3c8] sm:$0xff]  ;;  %v5229_v31 = vld [vmem:[#allocation3_spill] sm:$0xff]  ;;  %v2064_v26 = vadd.f32 %v2056_v53, %v2039_v61 }
 0x38c   : > { %v2060_v6 = vmul.f32 %v2639_v56, %v5228_v21  ;;  %v2072_v45 = vld [vmem:[#allocation2 + $0x8c] sm:$0xff]  ;;  %v2061_v32 = vmul.f32 %v2640_v44, %v5229_v31  ;;  %v5230_v13 = vld [vmem:[#allocation26_spill] sm:$0xff]  ;;  %v2647_v5 = vld [vmem:[%s5067_s5 + $0x3e0] sm:$0xff]  ;;  %v2065_v58 = vadd.f32 %v2057_v22, %v2040_v0  ;;  %v2071_v7 = vadd.f32 %v2063_v2, %v2046_v17 }
 0x38d   : > { %v2062_v23 = vmul.f32 %v2641_v55, %v5230_v13  ;;  %v2645_v33 = vld [vmem:[%s5067_s5 + $0x3d0] sm:$0xff]  ;;  %v2646_v18 = vld [vmem:[%s5067_s5 + $0x3d8] sm:$0xff]  ;;  %v2066_v30 = vadd.f32 %v2058_v15, %v2041_v3  ;;  %v2067_v56 = vadd.f32 %v2059_v37, %v2042_v41  ;;  %v2648_v62 = vld [vmem:[%s5067_s5 + $0x3e8] sm:$0xff]  ;;  %v2081_v0 = vmul.f32 %v2643_v14, %v4569_v11 }
 0x38e   : > { %v2068_v44 = vadd.f32 %v2060_v6, %v2043_v47  ;;  %v2649_v61 = vld [vmem:[%s5067_s5 + $0x3f0] sm:$0xff]  ;;  %v2650_v55 = vld [vmem:[%s5067_s5 + $0x3f8] sm:$0xff]  ;;  %v2069_v60 = vadd.f32 %v2061_v32, %v2044_v63  ;;  %v2082_v3 = vmul.f32 %v2644_v54, %v4571_v52  ;;  %v2083_v41 = vmul.f32 %v2645_v33, %v4573_v57  ;;  %v2651_v15 = vld [vmem:[%s5067_s5 + $0x400] sm:$0xff] }
 0x38f   : > { %v2070_v53 = vadd.f32 %v2062_v23, %v2045_v34  ;;  %v2084_v47 = vmul.f32 %v2646_v18, %v4575_v40  ;;  %v2085_v22 = vmul.f32 %v2647_v5, %v4581_v4  ;;  %v2097_v46 = vld [vmem:[#allocation2 + $0x8d] sm:$0xff]  ;;  %v2086_v34 = vmul.f32 %v2648_v62, %v4583_v29  ;;  %v2654_v40 = vld [vmem:[%s5067_s5 + $0x418] sm:$0xff]  ;;  %v2655_v4 = vld [vmem:[%s5067_s5 + $0x420] sm:$0xff] }
 0x390   : > { %v2652_v63 = vld [vmem:[%s5067_s5 + $0x408] sm:$0xff]  ;;  %v2087_v11 = vmul.f32 %v2649_v61, %v4585_v42  ;;  %v2088_v52 = vmul.f32 %v2650_v55, %v2072_v45  ;;  %v2089_v17 = vadd.f32 %v2081_v0, %v2064_v26  ;;  %v2653_v57 = vld [vmem:[%s5067_s5 + $0x410] sm:$0xff]  ;;  %v2090_v36 = vadd.f32 %v2082_v3, %v2065_v58  ;;  %v2658_v45 = vld [vmem:[%s5067_s5 + $0x438] sm:$0xff] }
 0x391   : > { %v2091_v37 = vadd.f32 %v2083_v41, %v2066_v30  ;;  %v2092_v21 = vadd.f32 %v2084_v47, %v2067_v56  ;;  %v2093_v29 = vadd.f32 %v2085_v22, %v2068_v44  ;;  %v2656_v42 = vld [vmem:[%s5067_s5 + $0x428] sm:$0xff]  ;;  %v2657_v6 = vld [vmem:[%s5067_s5 + $0x430] sm:$0xff]  ;;  %v2094_v14 = vadd.f32 %v2086_v34, %v2069_v60  ;;  %v2659_v18 = vld [vmem:[%s5067_s5 + $0x440] sm:$0xff] }
 0x392   : > { %v2095_v54 = vadd.f32 %v2087_v11, %v2070_v53  ;;  %v2096_v31 = vadd.f32 %v2088_v52, %v2071_v7  ;;  %v2106_v32 = vmul.f32 %v2651_v15, %v4252_v51  ;;  %v2107_v13 = vmul.f32 %v2652_v63, %v4254_v27  ;;  %v2122_v33 = vld [vmem:[#allocation2 + $0x8e] sm:$0xff]  ;;  %v2666_v55 = vld [vmem:[%s5067_s5 + $0x478] sm:$0xff]  ;;  %v2667_v15 = vld [vmem:[%s5067_s5 + $0x480] sm:$0xff] }
 0x393   : > { %v2108_v23 = vmul.f32 %v2653_v57, %v4256_v16  ;;  %v2109_v2 = vmul.f32 %v2654_v40, %v4258_v59  ;;  %v2110_v26 = vmul.f32 %v2655_v4, %v4260_v24  ;;  %v2660_v5 = vld [vmem:[%s5067_s5 + $0x448] sm:$0xff]  ;;  %v2111_v58 = vmul.f32 %v2656_v42, %v4262_v25  ;;  %v2661_v16 = vld [vmem:[%s5067_s5 + $0x450] sm:$0xff]  ;;  %v2662_v59 = vld [vmem:[%s5067_s5 + $0x458] sm:$0xff] }
 0x394   : > { %v2112_v51 = vmul.f32 %v2657_v6, %v4619_v20  ;;  %v2113_v27 = vmul.f32 %v2658_v45, %v2097_v46  ;;  %v2114_v30 = vadd.f32 %v2106_v32, %v2089_v17  ;;  %v2663_v24 = vld [vmem:[%s5067_s5 + $0x460] sm:$0xff]  ;;  %v2115_v56 = vadd.f32 %v2107_v13, %v2090_v36  ;;  %v2664_v20 = vld [vmem:[%s5067_s5 + $0x468] sm:$0xff]  ;;  %v2665_v61 = vld [vmem:[%s5067_s5 + $0x470] sm:$0xff] }
 0x395   : > { %v2116_v44 = vadd.f32 %v2108_v23, %v2091_v37  ;;  %v2117_v62 = vadd.f32 %v2109_v2, %v2092_v21  ;;  %v2118_v25 = vadd.f32 %v2110_v26, %v2093_v29  ;;  %v2119_v60 = vadd.f32 %v2111_v58, %v2094_v14  ;;  %v2147_v46 = vld [vmem:[#allocation2 + $0x8f] sm:$0xff]  ;;  %v2674_v4 = vld [vmem:[%s5067_s5 + $0x4b8] sm:$0xff]  ;;  %v5231_v13 = vld [vmem:[#allocation27_spill] sm:$0xff] }
 0x396   : > { %v2120_v53 = vadd.f32 %v2112_v51, %v2095_v54  ;;  %v2121_v7 = vadd.f32 %v2113_v27, %v2096_v31  ;;  %v2131_v0 = vmul.f32 %v2659_v18, %v4312_v8  ;;  %v2132_v3 = vmul.f32 %v2660_v5, %v4314_v9  ;;  %v2668_v63 = vld [vmem:[%s5067_s5 + $0x488] sm:$0xff]  ;;  %v2673_v40 = vld [vmem:[%s5067_s5 + $0x4b0] sm:$0xff]  ;;  %v2675_v54 = vld [vmem:[%s5067_s5 + $0x4c0] sm:$0xff] }
 0x397   : > { %v2133_v41 = vmul.f32 %v2661_v16, %v4316_v12  ;;  %v2134_v47 = vmul.f32 %v2662_v59, %v4322_v28  ;;  %v2135_v22 = vmul.f32 %v2663_v24, %v4324_v10  ;;  %v2136_v34 = vmul.f32 %v2664_v20, %v4326_v39  ;;  %v2669_v12 = vld [vmem:[%s5067_s5 + $0x490] sm:$0xff]  ;;  %v2670_v28 = vld [vmem:[%s5067_s5 + $0x498] sm:$0xff]  ;;  %v2671_v10 = vld [vmem:[%s5067_s5 + $0x4a0] sm:$0xff] }
 0x398   : > { %v2137_v8 = vmul.f32 %v2665_v61, %v4653_v19  ;;  %v2138_v9 = vmul.f32 %v2666_v55, %v2122_v33  ;;  %v2139_v11 = vadd.f32 %v2131_v0, %v2114_v30  ;;  %v2140_v52 = vadd.f32 %v2132_v3, %v2115_v56  ;;  %v2672_v19 = vld [vmem:[%s5067_s5 + $0x4a8] sm:$0xff]  ;;  %v2681_v5 = vld [vmem:[%s5067_s5 + $0x4f0] sm:$0xff]  ;;  %v2682_v58 = vld [vmem:[%s5067_s5 + $0x4f8] sm:$0xff] }
 0x399   : > { %v2141_v17 = vadd.f32 %v2133_v41, %v2116_v44  ;;  %v2142_v57 = vadd.f32 %v2134_v47, %v2117_v62  ;;  %v2143_v39 = vadd.f32 %v2135_v22, %v2118_v25  ;;  %v2144_v36 = vadd.f32 %v2136_v34, %v2119_v60  ;;  %v2676_v31 = vld [vmem:[%s5067_s5 + $0x4c8] sm:$0xff]  ;;  %v3076_v16 = vld [vmem:[#allocation2 + $0x58] sm:$0xff]  ;;  %v3077_v24 = vld [vmem:[#allocation2 + $0x60] sm:$0xff] }
 0x39a   : > { %v2145_v37 = vadd.f32 %v2137_v8, %v2120_v53  ;;  %v2146_v21 = vadd.f32 %v2138_v9, %v2121_v7  ;;  %v2156_v29 = vmul.f32 %v2667_v15, %v4356_v35  ;;  %v2157_v42 = vmul.f32 %v2668_v63, %v4358_v48  ;;  %v2680_v18 = vld [vmem:[%s5067_s5 + $0x4e8] sm:$0xff]  ;;  %v3079_v25 = vld [vmem:[#allocation2 + $0x70] sm:$0xff]  ;;  %v3080_v61 = vld [vmem:[#allocation2 + $0x78] sm:$0xff] }
 0x39b   : > { %v2158_v6 = vmul.f32 %v2669_v12, %v4360_v43  ;;  %v2159_v45 = vmul.f32 %v2670_v28, %v4366_v50  ;;  %v2160_v14 = vmul.f32 %v2671_v10, %v4368_v1  ;;  %v2161_v32 = vmul.f32 %v2672_v19, %v5206_v49  ;;  %v2677_v43 = vld [vmem:[%s5067_s5 + $0x4d0] sm:$0xff]  ;;  %v2678_v50 = vld [vmem:[%s5067_s5 + $0x4d8] sm:$0xff]  ;;  %v2679_v1 = vld [vmem:[%s5067_s5 + $0x4e0] sm:$0xff] }
 0x39c   : > { %v2162_v35 = vmul.f32 %v2673_v40, %v5231_v13  ;;  %v2163_v23 = vmul.f32 %v2674_v4, %v2147_v46  ;;  %v2164_v48 = vadd.f32 %v2156_v29, %v2139_v11  ;;  %v2165_v2 = vadd.f32 %v2157_v42, %v2140_v52  ;;  %v3078_v44 = vld [vmem:[#allocation2 + $0x68] sm:$0xff]  ;;  %v2196_v60 = vld [vmem:[#allocation2 + $0x91] sm:$0xff]  ;;  %v2197_v53 = vld [vmem:[%s5068_s6] sm:$0xff] }
 0x39d   : > { %v2166_v26 = vadd.f32 %v2158_v6, %v2141_v17  ;;  %v2167_v33 = vadd.f32 %v2159_v45, %v2142_v57  ;;  %v2168_v49 = vadd.f32 %v2160_v14, %v2143_v39  ;;  %v2169_v51 = vadd.f32 %v2161_v32, %v2144_v36  ;;  %v2198_v7 = vld [vmem:[%s5068_s6 + $0x8] sm:$0xff]  ;;  %v3081_v0 = vld [vmem:[#allocation2 + $0x80] sm:$0xff]  ;;  %v3083_v22 = vld [vmem:[#allocation2 + $0x90] sm:$0xff] }
 0x39e   : > { %v2170_v27 = vadd.f32 %v2162_v35, %v2145_v37  ;;  %v2171_v30 = vadd.f32 %v2163_v23, %v2146_v21  ;;  %v2180_v59 = vmul.f32 %v3076_v16, %v2675_v54  ;;  %v2181_v56 = vmul.f32 %v3077_v24, %v2676_v31  ;;  %v3082_v41 = vld [vmem:[#allocation2 + $0x88] sm:$0xff]  ;;  %v2199_v63 = vld [vmem:[%s5068_s6 + $0x10] sm:$0xff]  ;;  %v2200_v34 = vld [vmem:[%s5068_s6 + $0x18] sm:$0xff] }
 0x39f   : > { %v2182_v62 = vmul.f32 %v3078_v44, %v2677_v43  ;;  %v2183_v20 = vmul.f32 %v3079_v25, %v2678_v50  ;;  %v2184_v55 = vmul.f32 %v3080_v61, %v2679_v1  ;;  %v2185_v3 = vmul.f32 %v3081_v0, %v2680_v18  ;;  %v2201_v8 = vld [vmem:[%s5068_s6 + $0x20] sm:$0xff]  ;;  %v2202_v10 = vld [vmem:[%s5068_s6 + $0x28] sm:$0xff]  ;;  %v2203_v52 = vld [vmem:[%s5068_s6 + $0x30] sm:$0xff] }
 0x3a0   : > { %v2186_v47 = vmul.f32 %v3082_v41, %v2681_v5  ;;  %v2187_v46 = vmul.f32 %v3083_v22, %v2682_v58  ;;  %v2188_v15 = vadd.f32 %v2180_v59, %v2164_v48  ;;  %v2189_v9 = vadd.f32 %v2181_v56, %v2165_v2  ;;  %v2204_v17 = vld [vmem:[%s5068_s6 + $0x38] sm:$0xff]  ;;  %v5232_v4 = vld [vmem:[#allocation13_spill] sm:$0xff]  ;;  %v5234_v29 = vld [vmem:[#allocation15_spill] sm:$0xff] }
 0x3a1   : > { %v2190_v11 = vadd.f32 %v2182_v62, %v2166_v26  ;;  %v2191_v12 = vadd.f32 %v2183_v20, %v2167_v33  ;;  %v2192_v28 = vadd.f32 %v2184_v55, %v2168_v49  ;;  %v2193_v57 = vadd.f32 %v2185_v3, %v2169_v51  ;;  %v5233_v37 = vld [vmem:[#allocation14_spill] sm:$0xff]  ;;  %v5235_v6 = vld [vmem:[#allocation16_spill] sm:$0xff]  ;;  %v5236_v14 = vld [vmem:[#allocation17_spill] sm:$0xff] }
 0x3a2   : > { %v2194_v39 = vadd.f32 %v2186_v47, %v2170_v27  ;;  %v2195_v19 = vadd.f32 %v2187_v46, %v2171_v30  ;;  %v2205_v40 = vmul.f32 %v2197_v53, %v5213_v38  ;;  %v2206_v36 = vmul.f32 %v2198_v7, %v5232_v4  ;;  %v5237_v31 = vld [vmem:[#allocation11_spill] sm:$0xff] }
 0x3a3   : > { %v2207_v21 = vmul.f32 %v2199_v63, %v5233_v37  ;;  %v2208_v42 = vmul.f32 %v2200_v34, %v5234_v29  ;;  %v2209_v45 = vmul.f32 %v2201_v8, %v5235_v6  ;;  %v2210_v54 = vmul.f32 %v2202_v10, %v5236_v14 }
 0x3a4   : > { %v2211_v32 = vmul.f32 %v2203_v52, %v5237_v31  ;;  %v2212_v38 = vmul.f32 %v2204_v17, %v2196_v60  ;;  %v2213_v13 = vadd.f32 %v2205_v40, %v2188_v15  ;;  %v2214_v35 = vadd.f32 %v2206_v36, %v2189_v9 }
 0x3a5   : > { %v2215_v23 = vadd.f32 %v2207_v21, %v2190_v11  ;;  %v2216_v48 = vadd.f32 %v2208_v42, %v2191_v12  ;;  %v2217_v43 = vadd.f32 %v2209_v45, %v2192_v28  ;;  %v2218_v50 = vadd.f32 %v2210_v54, %v2193_v57 }
 0x3a6   : > { %v2219_v1 = vadd.f32 %v2211_v32, %v2194_v39  ;;  %v2220_v2 = vadd.f32 %v2212_v38, %v2195_v19  ;;  %2221 = vst.msk [vmem:[%s3210_s18 + $0x40] sm:$0xff] %vm427_vm2, %v2213_v13  ;;  %2222 = vst.msk [vmem:[%s3210_s18 + $0x48] sm:$0xff] %vm427_vm2, %v2214_v35 }
 0x3a7   : > { %2223 = vst.msk [vmem:[%s3210_s18 + $0x50] sm:$0xff] %vm427_vm2, %v2215_v23  ;;  %2224 = vst.msk [vmem:[%s3210_s18 + $0x58] sm:$0xff] %vm427_vm2, %v2216_v48 }
 0x3a8   : > { %2225 = vst.msk [vmem:[%s3210_s18 + $0x60] sm:$0xff] %vm427_vm2, %v2217_v43  ;;  %2226 = vst.msk [vmem:[%s3210_s18 + $0x68] sm:$0xff] %vm427_vm2, %v2218_v50 }
 0x3a9   : > { %2227 = vst.msk [vmem:[%s3210_s18 + $0x70] sm:$0xff] %vm427_vm2, %v2219_v1  ;;  %2228 = vst.msk [vmem:[%s3210_s18 + $0x78] sm:$0xff] %vm427_vm2, %v2220_v2 }
 0x3aa PF: > { %s17_s28 = sadd.s32 1, %s3122_s28   ;;  %s5238_s24 = smov %s3114_s26 }
 0x3ab   : > { %p14_p12 = scmp.ge.s32.totalorder %s17_s28, 6   ;;  %s5239_s25 = smov %s3118_s27 }
 0x3ac   : > { %s5240_s26 = smov %s5243_s29  ;;  %s5241_s27 = smov %s5247_s30 }
 0x3ad   :  { %16 = sbr.rel (!%p14_p12) target bundleno = 3 (0x3), region = 116 }

</bundles_post_ra>
